<compile_context>
chip_gen: v6e
topology: v6e:2x2x1
jax: 0.10.0
libtpu: 0.0.40
codegen_flags: <defaults>
</compile_context>

<pallas_src>
import jax
import jax.numpy as jnp
from jax.experimental import pallas as pl
from jax.experimental.pallas import tpu as pltpu

H_DIM = 400      # logical hidden width (matches the PyTorch module)
H_PAD = 512      # lane-aligned hidden width used inside the kernel (4 x 128)

_SINGLE_BUFFER_WEIGHTS = None    # lazily probed: is Buffered(1) accepted?


def _cdiv(a, b):
    return (a + b - 1) // b


def _round_up(x, m):
    return _cdiv(x, m) * m


def _default_bf16_epilogue():
    """Use a bf16 elementwise epilogue on chips with a bf16 VALU (v6e/v7x)."""
    try:
        kind = jax.devices()[0].device_kind.lower()
    except Exception:
        return True
    for old in ("v2", "v3", "v4", "v5"):   # no bf16 VALU on these generations
        if old in kind:
            return False
    return True


# ------------------------------- kernels ----------------------------------

def _mlp_kernel_bf16(z_ref, w1_ref, b1_ref, w2_ref, b2_ref, w3_ref, b3_ref,
                     w4_ref, b4_ref, out_ref):
    # bf16 elementwise epilogue (v6e/v7x): all bias/ReLU/FMA work in bf16,
    # MXU matmuls bf16 x bf16 with f32 accumulation.
    z = z_ref[...].astype(jnp.bfloat16)                    # (TM, 2)
    w1 = w1_ref[...]                                       # (2, H_PAD) bf16

    # Layer 1: K=2 contraction as two VPU broadcast-FMAs (kept off the MXU).
    h = z[:, 0:1] * w1[0:1, :] + z[:, 1:2] * w1[1:2, :] + b1_ref[...]
    h = jnp.maximum(h, 0.0)                                # (TM, H_PAD) bf16

    # Layer 2: bf16 MXU matmul, f32 acc; bf16 bias + ReLU epilogue.
    h = jnp.dot(h, w2_ref[...], preferred_element_type=jnp.float32)
    h = jnp.maximum(h.astype(jnp.bfloat16) + b2_ref[...], 0.0)

    # Layer 3.
    h = jnp.dot(h, w3_ref[...], preferred_element_type=jnp.float32)
    h = jnp.maximum(h.astype(jnp.bfloat16) + b3_ref[...], 0.0)

    # Layer 4: (TM, H_PAD) @ (H_PAD, 2); final bias add stays f32.
    y = jnp.dot(h, w4_ref[...], preferred_element_type=jnp.float32)
    out_ref[...] = (y + b4_ref[...]).astype(out_ref.dtype)


def _mlp_kernel_f32(z_ref, w1_ref, b1_ref, w2_ref, b2_ref, w3_ref, b3_ref,
                    w4_ref, b4_ref, out_ref):
    # f32 elementwise path (v5e: no bf16 VALU; kernel is MXU-bound there).
    z = z_ref[...]                                         # (TM, 2) f32
    w1 = w1_ref[...]                                       # (2, H_PAD) f32

    h = z[:, 0:1] * w1[0:1, :] + z[:, 1:2] * w1[1:2, :] + b1_ref[...]
    h = jnp.maximum(h, 0.0)

    h = jnp.dot(h.astype(jnp.bfloat16), w2_ref[...],
                preferred_element_type=jnp.float32)
    h = jnp.maximum(h + b2_ref[...], 0.0)

    h = jnp.dot(h.astype(jnp.bfloat16), w3_ref[...],
                preferred_element_type=jnp.float32)
    h = jnp.maximum(h + b3_ref[...], 0.0)

    y = jnp.dot(h.astype(jnp.bfloat16), w4_ref[...],
                preferred_element_type=jnp.float32)
    out_ref[...] = (y + b4_ref[...]).astype(out_ref.dtype)


# ------------------------------ dispatch -----------------------------------

def _choose_tiling(batch, tm_max):
    """Grid steps first (>=2 for big batches -> v7x dual-TC), then TM."""
    tm_max = max(8, _round_up(tm_max, 8))
    steps = _cdiv(batch, tm_max)
    if batch > 512:
        steps = max(steps, 2)
    steps = max(steps, 1)
    tm = _round_up(_cdiv(batch, steps), 8)
    steps = _cdiv(batch, tm)
    return tm, steps, tm * steps


def _build_and_call(kernel_fn, z_padded, prepared, tm, steps,
                    single_buffer_weights):
    b_pad = z_padded.shape[0]
    operands = (z_padded,) + tuple(prepared)

    def resident_spec(arr):
        # Constant index_map -> fetched once, VMEM resident for the whole
        # batch sweep.  Single-buffered when supported (no point double
        # buffering a block whose index never changes).
        if single_buffer_weights:
            return pl.BlockSpec(arr.shape, lambda i: (0, 0),
                                pipeline_mode=pl.Buffered(1))
        return pl.BlockSpec(arr.shape, lambda i: (0, 0))

    in_specs = [pl.BlockSpec((tm, 2), lambda i: (i, 0))]    # z: batch tiled
    in_specs += [resident_spec(p) for p in prepared]

    # Advisory cost estimate: padded 512-wide math, weights read once/call.
    flops = 2 * b_pad * (2 * H_PAD + H_PAD * H_PAD + H_PAD * H_PAD + H_PAD * 2)
    bytes_accessed = int(sum(a.size * a.dtype.itemsize for a in operands)
                         + b_pad * 2 * 4)
    cost = pl.CostEstimate(flops=flops, transcendentals=0,
                           bytes_accessed=bytes_accessed)

    return pl.pallas_call(
        kernel_fn,
        out_shape=jax.ShapeDtypeStruct((b_pad, 2), jnp.float32),
        grid=(steps,),
        in_specs=in_specs,
        out_specs=pl.BlockSpec((tm, 2), lambda i: (i, 0)),
        compiler_params=pltpu.CompilerParams(
            dimension_semantics=("parallel",)),   # shard batch tiles over TCs
        cost_estimate=cost,
    )(*operands)


def generator_forward(z, prepared_params, *, bf16_epilogue=None, tm=1024):
    """Forward pass of the Generator. z: (B, 2) f32 -> (B, 2) f32."""
    global _SINGLE_BUFFER_WEIGHTS
    if bf16_epilogue is None:
        bf16_epilogue = _default_bf16_epilogue()
    kernel_fn = _mlp_kernel_bf16 if bf16_epilogue else _mlp_kernel_f32

    batch = z.shape[0]
    TM, steps, b_pad = _choose_tiling(batch, tm)
    if b_pad != batch:
        z = jnp.pad(z, ((0, b_pad - batch), (0, 0)))

    if _SINGLE_BUFFER_WEIGHTS is None:
        try:
            out = _build_and_call(kernel_fn, z, prepared_params, TM, steps, True)
            jax.block_until_ready(out)
            _SINGLE_BUFFER_WEIGHTS = True
        except Exception:
            _SINGLE_BUFFER_WEIGHTS = False
            out = _build_and_call(kernel_fn, z, prepared_params, TM, steps, False)
    else:
        out = _build_and_call(kernel_fn, z, prepared_params, TM, steps,
                              _SINGLE_BUFFER_WEIGHTS)
    return out[:batch]


# ------------------------------ parameters ---------------------------------

def init_generator_params(key):
    """nn.Linear-style init: U(-1/sqrt(fan_in), +1/sqrt(fan_in)).

    Layout: W as (in_features, out_features), b as (1, out_features), f32.
    """
    dims = [(2, H_DIM), (H_DIM, H_DIM), (H_DIM, H_DIM), (H_DIM, 2)]
    params = []
    keys = jax.random.split(key, 2 * len(dims))
    for li, (fan_in, fan_out) in enumerate(dims):
        bound = 1.0 / jnp.sqrt(jnp.float32(fan_in))
        w = jax.random.uniform(keys[2 * li], (fan_in, fan_out),
                               dtype=jnp.float32, minval=-bound, maxval=bound)
        b = jax.random.uniform(keys[2 * li + 1], (1, fan_out),
                               dtype=jnp.float32, minval=-bound, maxval=bound)
        params.extend([w, b])
    return tuple(params)


def prepare_params(params, *, bf16_epilogue, h_pad=H_PAD):
    """Zero-pad hidden 400 -> 512 and cast to the kernel's operand dtypes."""
    w1, b1, w2, b2, w3, b3, w4, b4 = params
    ph = h_pad - w1.shape[1]
    w1p = jnp.pad(w1, ((0, 0), (0, ph)))                           # (2,512)
    b1p = jnp.pad(b1, ((0, 0), (0, ph)))                           # (1,512)
    w2p = jnp.pad(w2, ((0, ph), (0, ph))).astype(jnp.bfloat16)     # (512,512)
    b2p = jnp.pad(b2, ((0, 0), (0, ph)))                           # (1,512)
    w3p = jnp.pad(w3, ((0, ph), (0, ph))).astype(jnp.bfloat16)     # (512,512)
    b3p = jnp.pad(b3, ((0, 0), (0, ph)))                           # (1,512)
    w4p = jnp.pad(w4, ((0, ph), (0, 0))).astype(jnp.bfloat16)      # (512,2)
    b4p = b4                                                       # (1,2) f32
    if bf16_epilogue:
        w1p = w1p.astype(jnp.bfloat16)
        b1p = b1p.astype(jnp.bfloat16)
        b2p = b2p.astype(jnp.bfloat16)
        b3p = b3p.astype(jnp.bfloat16)
    return (w1p, b1p, w2p, b2p, w3p, b3p, w4p, b4p)


# ------------------------------ references ---------------------------------

def _reference_forward_f32(z, params):
    """Pure f32 reference == the original PyTorch module's math."""
    w1, b1, w2, b2, w3, b3, w4, b4 = params
    h = jnp.maximum(z @ w1 + b1, 0.0)
    h = jnp.maximum(h @ w2 + b2, 0.0)
    h = jnp.maximum(h @ w3 + b3, 0.0)
    return h @ w4 + b4


def _reference_forward_kernel_precision(z, prepared, bf16_epilogue):
    """Reference that mirrors the kernel's exact precision recipe."""
    w1, b1, w2, b2, w3, b3, w4, b4 = prepared
    if bf16_epilogue:
        zb = z.astype(jnp.bfloat16)
        h = jnp.maximum(zb[:, 0:1] * w1[0:1, :] + zb[:, 1:2] * w1[1:2, :] + b1,
                        0.0)
        h = jnp.dot(h, w2, preferred_element_type=jnp.float32)
        h = jnp.maximum(h.astype(jnp.bfloat16) + b2, 0.0)
        h = jnp.dot(h, w3, preferred_element_type=jnp.float32)
        h = jnp.maximum(h.astype(jnp.bfloat16) + b3, 0.0)
        return jnp.dot(h, w4, preferred_element_type=jnp.float32) + b4
    else:
        h = jnp.maximum(z[:, 0:1] * w1[0:1, :] + z[:, 1:2] * w1[1:2, :] + b1,
                        0.0)
        h = jnp.maximum(jnp.dot(h.astype(jnp.bfloat16), w2,
                                preferred_element_type=jnp.float32) + b2, 0.0)
        h = jnp.maximum(jnp.dot(h.astype(jnp.bfloat16), w3,
                                preferred_element_type=jnp.float32) + b3, 0.0)
        return jnp.dot(h.astype(jnp.bfloat16), w4,
                       preferred_element_type=jnp.float32) + b4


# --------------------------------- main -------------------------------------

if __name__ == "__main__":
    key = jax.random.PRNGKey(0)
    pkey, zkey, zkey2, zkey3 = jax.random.split(key, 4)

    params = init_generator_params(pkey)
    bf16_auto = _default_bf16_epilogue()

    def _check(out, z, prepared, use_bf16):
        tight = 1e-2 if use_bf16 else 1e-4
        assert out.dtype == jnp.float32
        assert jnp.allclose(
            out, _reference_forward_kernel_precision(z, prepared, use_bf16),
            atol=tight, rtol=tight)
        assert jnp.allclose(out, _reference_forward_f32(z, params),
                            atol=5e-2, rtol=5e-2)

    # 1) Tiny batch, auto-selected epilogue path (single grid step, TM=8).
    prepared_auto = prepare_params(params, bf16_epilogue=bf16_auto)
    z = jax.random.normal(zkey, (8, 2), dtype=jnp.float32)
    out = generator_forward(z, prepared_auto, bf16_epilogue=bf16_auto)
    jax.block_until_ready(out)
    assert out.shape == (8, 2)
    _check(out, z, prepared_auto, bf16_auto)

    # 2) Non-multiple batch (B=300 -> TM=304, one step, only 4 padded rows),
    #    both epilogue recipes exercised regardless of the local chip.
    z2 = jax.random.normal(zkey2, (300, 2), dtype=jnp.float32)
    for use_bf16 in (True, False):
        prep = prepare_params(params, bf16_epilogue=use_bf16)
        o = generator_forward(z2, prep, bf16_epilogue=use_bf16)
        jax.block_until_ready(o)
        assert o.shape == (300, 2)
        _check(o, z2, prep, use_bf16)

    # 3) B=1200 -> two grid steps (TM=600): exercises the multi-step
    #    "parallel" batch axis (dual-TC sharding on v7x).
    z3 = jax.random.normal(zkey3, (1200, 2), dtype=jnp.float32)
    o3 = generator_forward(z3, prepared_auto, bf16_epilogue=bf16_auto)
    jax.block_until_ready(o3)
    assert o3.shape == (1200, 2)
    _check(o3, z3, prepared_auto, bf16_auto)

    print("KERNEL_OK")
</pallas_src>

<mosaic_0001>
module attributes {stable_mosaic.version = 11 : i64} {
  func.func @_mlp_kernel_bf16(%arg0: i32, %arg1: memref<8x2xf32, #tpu.memory_space<vmem>>, %arg2: memref<2x512xbf16, #tpu.memory_space<vmem>>, %arg3: memref<1x512xbf16, #tpu.memory_space<vmem>>, %arg4: memref<512x512xbf16, #tpu.memory_space<vmem>>, %arg5: memref<1x512xbf16, #tpu.memory_space<vmem>>, %arg6: memref<512x512xbf16, #tpu.memory_space<vmem>>, %arg7: memref<1x512xbf16, #tpu.memory_space<vmem>>, %arg8: memref<512x2xbf16, #tpu.memory_space<vmem>>, %arg9: memref<1x2xf32, #tpu.memory_space<vmem>>, %arg10: memref<8x2xf32, #tpu.memory_space<vmem>>) attributes {dimension_semantics = [#tpu.dimension_semantics<parallel>], iteration_bounds = array<i64: 1>, scalar_prefetch = 0 : i64, scratch_operands = 0 : i64, tpu.core_type = #tpu.core_type<tc>, window_params = [{transform_indices = @transform_0, window_bounds = array<i64: 8, 2>}, {pipeline_mode = #tpu.pipeline_mode<synchronous>, transform_indices = @transform_1, window_bounds = array<i64: 2, 512>}, {pipeline_mode = #tpu.pipeline_mode<synchronous>, transform_indices = @transform_2, window_bounds = array<i64: 1, 512>}, {pipeline_mode = #tpu.pipeline_mode<synchronous>, transform_indices = @transform_3, window_bounds = array<i64: 512, 512>}, {pipeline_mode = #tpu.pipeline_mode<synchronous>, transform_indices = @transform_4, window_bounds = array<i64: 1, 512>}, {pipeline_mode = #tpu.pipeline_mode<synchronous>, transform_indices = @transform_5, window_bounds = array<i64: 512, 512>}, {pipeline_mode = #tpu.pipeline_mode<synchronous>, transform_indices = @transform_6, window_bounds = array<i64: 1, 512>}, {pipeline_mode = #tpu.pipeline_mode<synchronous>, transform_indices = @transform_7, window_bounds = array<i64: 512, 2>}, {pipeline_mode = #tpu.pipeline_mode<synchronous>, transform_indices = @transform_8, window_bounds = array<i64: 1, 2>}, {transform_indices = @transform_9, window_bounds = array<i64: 8, 2>}]} {
    %c0 = arith.constant 0 : index
    %c0_0 = arith.constant 0 : index
    %0 = vector.load %arg1[%c0, %c0_0] : memref<8x2xf32, #tpu.memory_space<vmem>>, vector<8x2xf32>
    %1 = arith.truncf %0 : vector<8x2xf32> to vector<8x2xbf16>
    %c0_1 = arith.constant 0 : index
    %c0_2 = arith.constant 0 : index
    %2 = vector.load %arg2[%c0_1, %c0_2] : memref<2x512xbf16, #tpu.memory_space<vmem>>, vector<2x512xbf16>
    %3 = vector.extract_strided_slice %1 {offsets = [0, 0], sizes = [8, 1], strides = [1, 1]} : vector<8x2xbf16> to vector<8x1xbf16>
    %4 = vector.extract_strided_slice %2 {offsets = [0, 0], sizes = [1, 512], strides = [1, 1]} : vector<2x512xbf16> to vector<1x512xbf16>
    %5 = vector.broadcast %3 : vector<8x1xbf16> to vector<8x512xbf16>
    %6 = vector.broadcast %4 : vector<1x512xbf16> to vector<8x512xbf16>
    %7 = arith.mulf %5, %6 : vector<8x512xbf16>
    %8 = vector.extract_strided_slice %1 {offsets = [0, 1], sizes = [8, 1], strides = [1, 1]} : vector<8x2xbf16> to vector<8x1xbf16>
    %9 = vector.extract_strided_slice %2 {offsets = [1, 0], sizes = [1, 512], strides = [1, 1]} : vector<2x512xbf16> to vector<1x512xbf16>
    %10 = vector.broadcast %8 : vector<8x1xbf16> to vector<8x512xbf16>
    %11 = vector.broadcast %9 : vector<1x512xbf16> to vector<8x512xbf16>
    %12 = arith.mulf %10, %11 : vector<8x512xbf16>
    %13 = arith.addf %7, %12 : vector<8x512xbf16>
    %c0_3 = arith.constant 0 : index
    %c0_4 = arith.constant 0 : index
    %14 = vector.load %arg3[%c0_3, %c0_4] : memref<1x512xbf16, #tpu.memory_space<vmem>>, vector<1x512xbf16>
    %15 = vector.broadcast %14 : vector<1x512xbf16> to vector<8x512xbf16>
    %16 = arith.addf %13, %15 : vector<8x512xbf16>
    %cst = arith.constant 0.000000e+00 : bf16
    %17 = vector.broadcast %cst : bf16 to vector<8x512xbf16>
    %18 = arith.maximumf %16, %17 : vector<8x512xbf16>
    %c0_5 = arith.constant 0 : index
    %c0_6 = arith.constant 0 : index
    %19 = vector.load %arg4[%c0_5, %c0_6] : memref<512x512xbf16, #tpu.memory_space<vmem>>, vector<512x512xbf16>
    %cst_7 = arith.constant dense<0.000000e+00> : vector<8x512xf32>
    %20 = tpu.matmul %18, %19, %cst_7 {dimension_numbers = #tpu.dot_dimension_numbers<[1], [0], [0], [1], [0, 0, 1, 1], [], []>} : vector<8x512xbf16>, vector<512x512xbf16>, vector<8x512xf32> -> vector<8x512xf32>
    %21 = arith.truncf %20 : vector<8x512xf32> to vector<8x512xbf16>
    %c0_8 = arith.constant 0 : index
    %c0_9 = arith.constant 0 : index
    %22 = vector.load %arg5[%c0_8, %c0_9] : memref<1x512xbf16, #tpu.memory_space<vmem>>, vector<1x512xbf16>
    %23 = vector.broadcast %22 : vector<1x512xbf16> to vector<8x512xbf16>
    %24 = arith.addf %21, %23 : vector<8x512xbf16>
    %cst_10 = arith.constant 0.000000e+00 : bf16
    %25 = vector.broadcast %cst_10 : bf16 to vector<8x512xbf16>
    %26 = arith.maximumf %24, %25 : vector<8x512xbf16>
    %c0_11 = arith.constant 0 : index
    %c0_12 = arith.constant 0 : index
    %27 = vector.load %arg6[%c0_11, %c0_12] : memref<512x512xbf16, #tpu.memory_space<vmem>>, vector<512x512xbf16>
    %cst_13 = arith.constant dense<0.000000e+00> : vector<8x512xf32>
    %28 = tpu.matmul %26, %27, %cst_13 {dimension_numbers = #tpu.dot_dimension_numbers<[1], [0], [0], [1], [0, 0, 1, 1], [], []>} : vector<8x512xbf16>, vector<512x512xbf16>, vector<8x512xf32> -> vector<8x512xf32>
    %29 = arith.truncf %28 : vector<8x512xf32> to vector<8x512xbf16>
    %c0_14 = arith.constant 0 : index
    %c0_15 = arith.constant 0 : index
    %30 = vector.load %arg7[%c0_14, %c0_15] : memref<1x512xbf16, #tpu.memory_space<vmem>>, vector<1x512xbf16>
    %31 = vector.broadcast %30 : vector<1x512xbf16> to vector<8x512xbf16>
    %32 = arith.addf %29, %31 : vector<8x512xbf16>
    %cst_16 = arith.constant 0.000000e+00 : bf16
    %33 = vector.broadcast %cst_16 : bf16 to vector<8x512xbf16>
    %34 = arith.maximumf %32, %33 : vector<8x512xbf16>
    %c0_17 = arith.constant 0 : index
    %c0_18 = arith.constant 0 : index
    %35 = vector.load %arg8[%c0_17, %c0_18] : memref<512x2xbf16, #tpu.memory_space<vmem>>, vector<512x2xbf16>
    %cst_19 = arith.constant dense<0.000000e+00> : vector<8x2xf32>
    %36 = tpu.matmul %34, %35, %cst_19 {dimension_numbers = #tpu.dot_dimension_numbers<[1], [0], [0], [1], [0, 0, 1, 1], [], []>} : vector<8x512xbf16>, vector<512x2xbf16>, vector<8x2xf32> -> vector<8x2xf32>
    %c0_20 = arith.constant 0 : index
    %c0_21 = arith.constant 0 : index
    %37 = vector.load %arg9[%c0_20, %c0_21] : memref<1x2xf32, #tpu.memory_space<vmem>>, vector<1x2xf32>
    %38 = vector.broadcast %37 : vector<1x2xf32> to vector<8x2xf32>
    %39 = arith.addf %36, %38 : vector<8x2xf32>
    %c0_22 = arith.constant 0 : index
    %c0_23 = arith.constant 0 : index
    %40 = vector.load %arg10[%c0_22, %c0_23] : memref<8x2xf32, #tpu.memory_space<vmem>>, vector<8x2xf32>
    tpu.vector_store %arg10[%c0_22, %c0_23], %39 {strides = array<i32>} : memref<8x2xf32, #tpu.memory_space<vmem>>, vector<8x2xf32>,
    return
  }
  func.func @transform_0(%arg0: i32) -> (i32, i32) {
    %c0_i32 = arith.constant 0 : i32
    %c0_i32_0 = arith.constant 0 : i32
    return %arg0, %c0_i32 : i32, i32
  }
  func.func @transform_1(%arg0: i32) -> (i32, i32) {
    %c0_i32 = arith.constant 0 : i32
    %c0_i32_0 = arith.constant 0 : i32
    %c0_i32_1 = arith.constant 0 : i32
    return %c0_i32, %c0_i32_0 : i32, i32
  }
  func.func @transform_2(%arg0: i32) -> (i32, i32) {
    %c0_i32 = arith.constant 0 : i32
    %c0_i32_0 = arith.constant 0 : i32
    %c0_i32_1 = arith.constant 0 : i32
    return %c0_i32, %c0_i32_0 : i32, i32
  }
  func.func @transform_3(%arg0: i32) -> (i32, i32) {
    %c0_i32 = arith.constant 0 : i32
    %c0_i32_0 = arith.constant 0 : i32
    %c0_i32_1 = arith.constant 0 : i32
    return %c0_i32, %c0_i32_0 : i32, i32
  }
  func.func @transform_4(%arg0: i32) -> (i32, i32) {
    %c0_i32 = arith.constant 0 : i32
    %c0_i32_0 = arith.constant 0 : i32
    %c0_i32_1 = arith.constant 0 : i32
    return %c0_i32, %c0_i32_0 : i32, i32
  }
  func.func @transform_5(%arg0: i32) -> (i32, i32) {
    %c0_i32 = arith.constant 0 : i32
    %c0_i32_0 = arith.constant 0 : i32
    %c0_i32_1 = arith.constant 0 : i32
    return %c0_i32, %c0_i32_0 : i32, i32
  }
  func.func @transform_6(%arg0: i32) -> (i32, i32) {
    %c0_i32 = arith.constant 0 : i32
    %c0_i32_0 = arith.constant 0 : i32
    %c0_i32_1 = arith.constant 0 : i32
    return %c0_i32, %c0_i32_0 : i32, i32
  }
  func.func @transform_7(%arg0: i32) -> (i32, i32) {
    %c0_i32 = arith.constant 0 : i32
    %c0_i32_0 = arith.constant 0 : i32
    %c0_i32_1 = arith.constant 0 : i32
    return %c0_i32, %c0_i32_0 : i32, i32
  }
  func.func @transform_8(%arg0: i32) -> (i32, i32) {
    %c0_i32 = arith.constant 0 : i32
    %c0_i32_0 = arith.constant 0 : i32
    %c0_i32_1 = arith.constant 0 : i32
    return %c0_i32, %c0_i32_0 : i32, i32
  }
  func.func @transform_9(%arg0: i32) -> (i32, i32) {
    %c0_i32 = arith.constant 0 : i32
    %c0_i32_0 = arith.constant 0 : i32
    return %arg0, %c0_i32 : i32, i32
  }
}

module attributes {stable_mosaic.version = 11 : i64} {
  func.func @_mlp_kernel_bf16(%arg0: i32, %arg1: memref<8x2xf32, #tpu.memory_space<vmem>>, %arg2: memref<2x512xbf16, #tpu.memory_space<vmem>>, %arg3: memref<1x512xbf16, #tpu.memory_space<vmem>>, %arg4: memref<512x512xbf16, #tpu.memory_space<vmem>>, %arg5: memref<1x512xbf16, #tpu.memory_space<vmem>>, %arg6: memref<512x512xbf16, #tpu.memory_space<vmem>>, %arg7: memref<1x512xbf16, #tpu.memory_space<vmem>>, %arg8: memref<512x2xbf16, #tpu.memory_space<vmem>>, %arg9: memref<1x2xf32, #tpu.memory_space<vmem>>, %arg10: memref<8x2xf32, #tpu.memory_space<vmem>>) attributes {dimension_semantics = [#tpu.dimension_semantics<parallel>], iteration_bounds = array<i64: 1>, scalar_prefetch = 0 : i64, scratch_operands = 0 : i64, tpu.core_type = #tpu.core_type<tc>, window_params = [{transform_indices = @transform_0, window_bounds = array<i64: 8, 2>}, {pipeline_mode = #tpu.pipeline_mode<synchronous>, transform_indices = @transform_1, window_bounds = array<i64: 2, 512>}, {pipeline_mode = #tpu.pipeline_mode<synchronous>, transform_indices = @transform_2, window_bounds = array<i64: 1, 512>}, {pipeline_mode = #tpu.pipeline_mode<synchronous>, transform_indices = @transform_3, window_bounds = array<i64: 512, 512>}, {pipeline_mode = #tpu.pipeline_mode<synchronous>, transform_indices = @transform_4, window_bounds = array<i64: 1, 512>}, {pipeline_mode = #tpu.pipeline_mode<synchronous>, transform_indices = @transform_5, window_bounds = array<i64: 512, 512>}, {pipeline_mode = #tpu.pipeline_mode<synchronous>, transform_indices = @transform_6, window_bounds = array<i64: 1, 512>}, {pipeline_mode = #tpu.pipeline_mode<synchronous>, transform_indices = @transform_7, window_bounds = array<i64: 512, 2>}, {pipeline_mode = #tpu.pipeline_mode<synchronous>, transform_indices = @transform_8, window_bounds = array<i64: 1, 2>}, {transform_indices = @transform_9, window_bounds = array<i64: 8, 2>}]} {
    %c0 = arith.constant 0 : index
    %c0_0 = arith.constant 0 : index
    %0 = vector.load %arg1[%c0, %c0_0] : memref<8x2xf32, #tpu.memory_space<vmem>>, vector<8x2xf32>
    %1 = arith.truncf %0 : vector<8x2xf32> to vector<8x2xbf16>
    %c0_1 = arith.constant 0 : index
    %c0_2 = arith.constant 0 : index
    %2 = vector.load %arg2[%c0_1, %c0_2] : memref<2x512xbf16, #tpu.memory_space<vmem>>, vector<2x512xbf16>
    %3 = vector.extract_strided_slice %1 {offsets = [0, 0], sizes = [8, 1], strides = [1, 1]} : vector<8x2xbf16> to vector<8x1xbf16>
    %4 = vector.extract_strided_slice %2 {offsets = [0, 0], sizes = [1, 512], strides = [1, 1]} : vector<2x512xbf16> to vector<1x512xbf16>
    %5 = vector.broadcast %3 : vector<8x1xbf16> to vector<8x512xbf16>
    %6 = vector.broadcast %4 : vector<1x512xbf16> to vector<8x512xbf16>
    %7 = arith.mulf %5, %6 : vector<8x512xbf16>
    %8 = vector.extract_strided_slice %1 {offsets = [0, 1], sizes = [8, 1], strides = [1, 1]} : vector<8x2xbf16> to vector<8x1xbf16>
    %9 = vector.extract_strided_slice %2 {offsets = [1, 0], sizes = [1, 512], strides = [1, 1]} : vector<2x512xbf16> to vector<1x512xbf16>
    %10 = vector.broadcast %8 : vector<8x1xbf16> to vector<8x512xbf16>
    %11 = vector.broadcast %9 : vector<1x512xbf16> to vector<8x512xbf16>
    %12 = arith.mulf %10, %11 : vector<8x512xbf16>
    %13 = arith.addf %7, %12 : vector<8x512xbf16>
    %c0_3 = arith.constant 0 : index
    %c0_4 = arith.constant 0 : index
    %14 = vector.load %arg3[%c0_3, %c0_4] : memref<1x512xbf16, #tpu.memory_space<vmem>>, vector<1x512xbf16>
    %15 = vector.broadcast %14 : vector<1x512xbf16> to vector<8x512xbf16>
    %16 = arith.addf %13, %15 : vector<8x512xbf16>
    %cst = arith.constant 0.000000e+00 : bf16
    %17 = vector.broadcast %cst : bf16 to vector<8x512xbf16>
    %18 = arith.maximumf %16, %17 : vector<8x512xbf16>
    %c0_5 = arith.constant 0 : index
    %c0_6 = arith.constant 0 : index
    %19 = vector.load %arg4[%c0_5, %c0_6] : memref<512x512xbf16, #tpu.memory_space<vmem>>, vector<512x512xbf16>
    %cst_7 = arith.constant dense<0.000000e+00> : vector<8x512xf32>
    %20 = tpu.matmul %18, %19, %cst_7 {dimension_numbers = #tpu.dot_dimension_numbers<[1], [0], [0], [1], [0, 0, 1, 1], [], []>} : vector<8x512xbf16>, vector<512x512xbf16>, vector<8x512xf32> -> vector<8x512xf32>
    %21 = arith.truncf %20 : vector<8x512xf32> to vector<8x512xbf16>
    %c0_8 = arith.constant 0 : index
    %c0_9 = arith.constant 0 : index
    %22 = vector.load %arg5[%c0_8, %c0_9] : memref<1x512xbf16, #tpu.memory_space<vmem>>, vector<1x512xbf16>
    %23 = vector.broadcast %22 : vector<1x512xbf16> to vector<8x512xbf16>
    %24 = arith.addf %21, %23 : vector<8x512xbf16>
    %cst_10 = arith.constant 0.000000e+00 : bf16
    %25 = vector.broadcast %cst_10 : bf16 to vector<8x512xbf16>
    %26 = arith.maximumf %24, %25 : vector<8x512xbf16>
    %c0_11 = arith.constant 0 : index
    %c0_12 = arith.constant 0 : index
    %27 = vector.load %arg6[%c0_11, %c0_12] : memref<512x512xbf16, #tpu.memory_space<vmem>>, vector<512x512xbf16>
    %cst_13 = arith.constant dense<0.000000e+00> : vector<8x512xf32>
    %28 = tpu.matmul %26, %27, %cst_13 {dimension_numbers = #tpu.dot_dimension_numbers<[1], [0], [0], [1], [0, 0, 1, 1], [], []>} : vector<8x512xbf16>, vector<512x512xbf16>, vector<8x512xf32> -> vector<8x512xf32>
    %29 = arith.truncf %28 : vector<8x512xf32> to vector<8x512xbf16>
    %c0_14 = arith.constant 0 : index
    %c0_15 = arith.constant 0 : index
    %30 = vector.load %arg7[%c0_14, %c0_15] : memref<1x512xbf16, #tpu.memory_space<vmem>>, vector<1x512xbf16>
    %31 = vector.broadcast %30 : vector<1x512xbf16> to vector<8x512xbf16>
    %32 = arith.addf %29, %31 : vector<8x512xbf16>
    %cst_16 = arith.constant 0.000000e+00 : bf16
    %33 = vector.broadcast %cst_16 : bf16 to vector<8x512xbf16>
    %34 = arith.maximumf %32, %33 : vector<8x512xbf16>
    %c0_17 = arith.constant 0 : index
    %c0_18 = arith.constant 0 : index
    %35 = vector.load %arg8[%c0_17, %c0_18] : memref<512x2xbf16, #tpu.memory_space<vmem>>, vector<512x2xbf16>
    %cst_19 = arith.constant dense<0.000000e+00> : vector<8x2xf32>
    %36 = tpu.matmul %34, %35, %cst_19 {dimension_numbers = #tpu.dot_dimension_numbers<[1], [0], [0], [1], [0, 0, 1, 1], [], []>} : vector<8x512xbf16>, vector<512x2xbf16>, vector<8x2xf32> -> vector<8x2xf32>
    %c0_20 = arith.constant 0 : index
    %c0_21 = arith.constant 0 : index
    %37 = vector.load %arg9[%c0_20, %c0_21] : memref<1x2xf32, #tpu.memory_space<vmem>>, vector<1x2xf32>
    %38 = vector.broadcast %37 : vector<1x2xf32> to vector<8x2xf32>
    %39 = arith.addf %36, %38 : vector<8x2xf32>
    %c0_22 = arith.constant 0 : index
    %c0_23 = arith.constant 0 : index
    %40 = vector.load %arg10[%c0_22, %c0_23] : memref<8x2xf32, #tpu.memory_space<vmem>>, vector<8x2xf32>
    tpu.vector_store %arg10[%c0_22, %c0_23], %39 {strides = array<i32>} : memref<8x2xf32, #tpu.memory_space<vmem>>, vector<8x2xf32>,
    return
  }
  func.func @transform_0(%arg0: i32) -> (i32, i32) {
    %c0_i32 = arith.constant 0 : i32
    %c0_i32_0 = arith.constant 0 : i32
    return %arg0, %c0_i32 : i32, i32
  }
  func.func @transform_1(%arg0: i32) -> (i32, i32) {
    %c0_i32 = arith.constant 0 : i32
    %c0_i32_0 = arith.constant 0 : i32
    %c0_i32_1 = arith.constant 0 : i32
    return %c0_i32, %c0_i32_0 : i32, i32
  }
  func.func @transform_2(%arg0: i32) -> (i32, i32) {
    %c0_i32 = arith.constant 0 : i32
    %c0_i32_0 = arith.constant 0 : i32
    %c0_i32_1 = arith.constant 0 : i32
    return %c0_i32, %c0_i32_0 : i32, i32
  }
  func.func @transform_3(%arg0: i32) -> (i32, i32) {
    %c0_i32 = arith.constant 0 : i32
    %c0_i32_0 = arith.constant 0 : i32
    %c0_i32_1 = arith.constant 0 : i32
    return %c0_i32, %c0_i32_0 : i32, i32
  }
  func.func @transform_4(%arg0: i32) -> (i32, i32) {
    %c0_i32 = arith.constant 0 : i32
    %c0_i32_0 = arith.constant 0 : i32
    %c0_i32_1 = arith.constant 0 : i32
    return %c0_i32, %c0_i32_0 : i32, i32
  }
  func.func @transform_5(%arg0: i32) -> (i32, i32) {
    %c0_i32 = arith.constant 0 : i32
    %c0_i32_0 = arith.constant 0 : i32
    %c0_i32_1 = arith.constant 0 : i32
    return %c0_i32, %c0_i32_0 : i32, i32
  }
  func.func @transform_6(%arg0: i32) -> (i32, i32) {
    %c0_i32 = arith.constant 0 : i32
    %c0_i32_0 = arith.constant 0 : i32
    %c0_i32_1 = arith.constant 0 : i32
    return %c0_i32, %c0_i32_0 : i32, i32
  }
  func.func @transform_7(%arg0: i32) -> (i32, i32) {
    %c0_i32 = arith.constant 0 : i32
    %c0_i32_0 = arith.constant 0 : i32
    %c0_i32_1 = arith.constant 0 : i32
    return %c0_i32, %c0_i32_0 : i32, i32
  }
  func.func @transform_8(%arg0: i32) -> (i32, i32) {
    %c0_i32 = arith.constant 0 : i32
    %c0_i32_0 = arith.constant 0 : i32
    %c0_i32_1 = arith.constant 0 : i32
    return %c0_i32, %c0_i32_0 : i32, i32
  }
  func.func @transform_9(%arg0: i32) -> (i32, i32) {
    %c0_i32 = arith.constant 0 : i32
    %c0_i32_0 = arith.constant 0 : i32
    return %arg0, %c0_i32 : i32, i32
  }
}

</mosaic_0001>

<bundles_post_ra>
// kernel: tpu_custom_call.1
= control target key start
LH: loop header
LB: loop body
LE: loop exit
PB: predicated region body
PF: predicated region fallthrough
CT: control target
= control target key end

     0   :  { %14 = vsyncpa [#allocation3], 0  ;;  %s3634_s0 = inlined_call_operand.vmem [shape: f32[8,2], index: 0, kind: input, shape index: {}]   ;;  %s3635_s1 = inlined_call_operand.vmem [shape: bf16[2,512], index: 1, kind: input, shape index: {}]   ;;  %s3636_s2 = inlined_call_operand.vmem [shape: bf16[1,512], index: 2, kind: input, shape index: {}]   ;;  %s3637_s3 = inlined_call_operand.hbm [shape: bf16[512,512], index: 3, kind: input, shape index: {}]   ;;  %s3638_s4 = inlined_call_operand.vmem [shape: bf16[1,512], index: 4, kind: input, shape index: {}]   ;;  %s3639_s5 = inlined_call_operand.hbm [shape: bf16[512,512], index: 5, kind: input, shape index: {}]   ;;  %s3640_s6 = inlined_call_operand.vmem [shape: bf16[1,512], index: 6, kind: input, shape index: {}]   ;;  %s3641_s7 = inlined_call_operand.vmem [shape: bf16[512,2], index: 7, kind: input, shape index: {}]   ;;  %s3642_s8 = inlined_call_operand.vmem [shape: f32[1,2], index: 8, kind: input, shape index: {}]   ;;  %s3643_s9 = inlined_call_operand.vmem [shape: f32[8,2], index: 9, kind: output, shape index: {}]  }
   0x1   :  { %15 = vsyncpa [#allocation5], 0  ;;  %s3381_s30 = smov [#allocation2]  }
   0x2   :  { %s27_s10 = sshll.u32 %s3381_s30, 4  ;;  %s28_s10 = int_to_ptr.vmem [resolvable:$true] %s27_s10 }
   0x3   :  { %s3345_s11 = scalar_lea.vmem %s28_s10, 16384  ;;  %p3350_p1 = scmp.lt.s32.totalorder %s28_s10, %s28_s10 }
   0x4   :  { %p3346_p0 = scmp.ne.s32.totalorder %s28_s10, %s3345_s11  ;;  %p3351_p2 = scmp.lt.s32.totalorder %s3345_s11, %s3345_s11 }
   0x6   :  { %p3352_p3 = por %p3351_p2, %p3350_p1 }
   0x8   :  { %p3353_p4 = pnand %p3352_p3, %p3346_p0 }
   0xa   :  { %3356 = shalt.err (!%p3353_p4)
}
   0xb   :  { %s3382_s12 = smov 256   ;;  %s3383_s13 = smov 16  }
   0xc   :  { %33 = dma.hbm_to_vmem [thread:$0]  %s3637_s3, 16384, %s28_s10, [#allocation3], %s3382_s12, %s3382_s12, %s3383_s13  }
   0xd   :  { %s3384_s16 = smov [#allocation4]  }
   0xe   :  { %s41_s17 = sshll.u32 %s3384_s16, 4  ;;  %s42_s17 = int_to_ptr.vmem [resolvable:$true] %s41_s17 }
   0xf   :  { %s3365_s18 = scalar_lea.vmem %s42_s17, 16384  ;;  %p3370_p6 = scmp.lt.s32.totalorder %s42_s17, %s42_s17 }
  0x10   :  { %p3366_p5 = scmp.ne.s32.totalorder %s42_s17, %s3365_s18  ;;  %p3371_p7 = scmp.lt.s32.totalorder %s3365_s18, %s3365_s18 }
  0x12   :  { %p3372_p8 = por %p3371_p7, %p3370_p6 }
  0x14   :  { %p3373_p9 = pnand %p3372_p8, %p3366_p5 }
  0x16   :  { %3376 = shalt.err (!%p3373_p9)
}
  0x17   :  { %47 = dma.hbm_to_vmem [thread:$0]  %s3639_s5, 16384, %s42_s17, [#allocation5], %s3382_s12, %s3382_s12, %s3383_s13  }
  0x18   :  { %3377 = dma.done.wait [#allocation3], 16384  }
  0x19   :  { %3378 = vsyncadd [#allocation3], 4294950912 }
  0x1a   :  { %3379 = dma.done.wait [#allocation5], 16384  }
  0x1b   :  { %3380 = vsyncadd [#allocation5], 4294950912  ;;  %v3385_v0 = vmov 0   ;;  %v61_v1 = vld [vmem:[%s3634_s0] sm:$0xff]  ;;  %v3386_v12 = vmov 1   ;;  %vm2567_vm0 = vcmask 15360  }
  0x1c   :  { %2919 = vset.pattern.permute.xlu0 %v3385_v0  ;;  %v62_v2 = vpack.c.bf16 %v61_v1, %v61_v1  ;;  %v2921_v3 = vld [vmem:[#allocation2 + $0xe4] ss:$16 sps:$4 sm:$0xff]   ;;  %v2925_v5 = vld [vmem:[#allocation2 + $0xe0] ss:$16 sps:$4 sm:$0xff]  }
  0x1d   :  { %v2923_v4 = vld [vmem:[#allocation2 + $0x2e4] ss:$16 sps:$4 sm:$0xff]   ;;  %v2926_v6 = vld [vmem:[#allocation2 + $0x2e0] ss:$16 sps:$4 sm:$0xff]   ;;  %996 = vmatprep.subr.bf16.mxu0 %v2921_v3 }
  0x1e   :  { %66 = vperm.xlu0 %2919, %v62_v2   ;;  %v2927_v7 = vld [vmem:[#allocation2 + $0xc4] ss:$16 sps:$4 sm:$0xff]   ;;  %1037 = vmatprep.subr.bf16.mxu1 %v2923_v4  ;;  %v2931_v9 = vld [vmem:[#allocation2 + $0xc0] ss:$16 sps:$4 sm:$0xff]  }
  0x1f   :  { %997 = vmatpush1.bf16.msra.mxu0 %v2925_v5  ;;  %v2929_v8 = vld [vmem:[#allocation2 + $0x2c4] ss:$16 sps:$4 sm:$0xff]   ;;  %1038 = vmatpush1.bf16.msra.mxu1 %v2926_v6  ;;  %v2932_v10 = vld [vmem:[#allocation2 + $0x2c0] ss:$16 sps:$4 sm:$0xff]   ;;  %v3019_v5 = vld [vmem:[#allocation2 + $0xec] ss:$16 sps:$4 sm:$0xff]  }
  0x20   :  { %998 = vmatprep.subr.bf16.mxu0 %v2927_v7  ;;  %1039 = vmatprep.subr.bf16.mxu1 %v2929_v8  ;;  %v2933_v11 = vld [vmem:[#allocation2 + $0xa4] ss:$16 sps:$4 sm:$0xff]   ;;  %v2937_v14 = vld [vmem:[#allocation2 + $0xa0] ss:$16 sps:$4 sm:$0xff]   ;;  %v3022_v6 = vld [vmem:[#allocation2 + $0x2ec] ss:$16 sps:$4 sm:$0xff]  }
  0x21   :  { %v2935_v13 = vld [vmem:[#allocation2 + $0x2a4] ss:$16 sps:$4 sm:$0xff]   ;;  %v2938_v15 = vld [vmem:[#allocation2 + $0x2a0] ss:$16 sps:$4 sm:$0xff]   ;;  %v3387_v7 = vmov 1966171168  }
  0x22   :  { %2920 = vset.pattern.permute.xlu0 %v3386_v12  ;;  %v2939_v16 = vld [vmem:[#allocation2 + $0x84] ss:$16 sps:$4 sm:$0xff]   ;;  %v2943_v18 = vld [vmem:[#allocation2 + $0x80] ss:$16 sps:$4 sm:$0xff]   ;;  %v79_v8 = vunpack.c.l.s4 %v3387_v7  ;;  %v3017_v7 = vld [vmem:[#allocation2 + $0xe8] ss:$16 sps:$4 sm:$0xff]  }
  0x23   :  { %127 = vperm.xlu0 %2920, %v62_v2   ;;  %999 = vmatpush1.bf16.msra.mxu0 %v2931_v9  ;;  %v2941_v17 = vld [vmem:[#allocation2 + $0x284] ss:$16 sps:$4 sm:$0xff]   ;;  %v2944_v19 = vld [vmem:[#allocation2 + $0x280] ss:$16 sps:$4 sm:$0xff]   ;;  %v81_v9 = vlaneseq }
  0x24   :  { %1040 = vmatpush1.bf16.msra.mxu1 %v2932_v10  ;;  %1000 = vmatprep.subr.bf16.mxu0 %v2933_v11  ;;  %v2945_v20 = vld [vmem:[#allocation2 + $0x64] ss:$16 sps:$4 sm:$0xff]   ;;  %v2949_v22 = vld [vmem:[#allocation2 + $0x60] ss:$16 sps:$4 sm:$0xff]   ;;  %v80_v11 = vunpack.c.0.s8 %v79_v8  ;;  %v3020_v8 = vld [vmem:[#allocation2 + $0x2e8] ss:$16 sps:$4 sm:$0xff]  }
  0x25   :  { %1041 = vmatprep.subr.bf16.mxu1 %v2935_v13  ;;  %v2947_v21 = vld [vmem:[#allocation2 + $0x264] ss:$16 sps:$4 sm:$0xff]   ;;  %v2950_v23 = vld [vmem:[#allocation2 + $0x260] ss:$16 sps:$4 sm:$0xff]   ;;  %v82_v12 = vshrl.u32 %v81_v9, 7 }
  0x26   :  { %v2951_v24 = vld [vmem:[#allocation2 + $0x44] ss:$16 sps:$4 sm:$0xff]   ;;  %v2955_v26 = vld [vmem:[#allocation2 + $0x40] ss:$16 sps:$4 sm:$0xff]  }
  0x27   :  { %1001 = vmatpush1.bf16.msra.mxu0 %v2937_v14  ;;  %v2953_v25 = vld [vmem:[#allocation2 + $0x244] ss:$16 sps:$4 sm:$0xff]   ;;  %v2956_v27 = vld [vmem:[#allocation2 + $0x240] ss:$16 sps:$4 sm:$0xff]   ;;  %v3451_v14 = vsub.s32 %v80_v11, %v82_v12 }
  0x28   :  { %1042 = vmatpush1.bf16.msra.mxu1 %v2938_v15  ;;  %1002 = vmatprep.subr.bf16.mxu0 %v2939_v16  ;;  %v2957_v28 = vld [vmem:[#allocation2 + $0x24] ss:$16 sps:$4 sm:$0xff]   ;;  %v2961_v30 = vld [vmem:[#allocation2 + $0x20] ss:$16 sps:$4 sm:$0xff]  }
  0x29   :  { %1043 = vmatprep.subr.bf16.mxu1 %v2941_v17  ;;  %v2959_v29 = vld [vmem:[#allocation2 + $0x224] ss:$16 sps:$4 sm:$0xff]   ;;  %v2962_v31 = vld [vmem:[#allocation2 + $0x220] ss:$16 sps:$4 sm:$0xff]  }
  0x2a   :  { %v2963_v32 = vld [vmem:[#allocation2 + $0x4] ss:$16 sps:$4 sm:$0xff]   ;;  %v2967_v34 = vld [vmem:[#allocation2] ss:$16 sps:$4 sm:$0xff]  }
  0x2b   :  { %1003 = vmatpush1.bf16.msra.mxu0 %v2943_v18  ;;  %v2965_v33 = vld [vmem:[#allocation2 + $0x204] ss:$16 sps:$4 sm:$0xff]   ;;  %v2968_v35 = vld [vmem:[#allocation2 + $0x200] ss:$16 sps:$4 sm:$0xff]  }
  0x2c   :  { %1044 = vmatpush1.bf16.msra.mxu1 %v2944_v19  ;;  %1004 = vmatprep.subr.bf16.mxu0 %v2945_v20  ;;  %v2969_v36 = vld [vmem:[#allocation2 + $0x1e4] ss:$16 sps:$4 sm:$0xff]   ;;  %v2973_v38 = vld [vmem:[#allocation2 + $0x1e0] ss:$16 sps:$4 sm:$0xff]  }
  0x2d   :  { %1045 = vmatprep.subr.bf16.mxu1 %v2947_v21  ;;  %v2971_v37 = vld [vmem:[#allocation2 + $0x3e4] ss:$16 sps:$4 sm:$0xff]   ;;  %v2974_v39 = vld [vmem:[#allocation2 + $0x3e0] ss:$16 sps:$4 sm:$0xff]  }
  0x2e   :  { %v2975_v40 = vld [vmem:[#allocation2 + $0x1c4] ss:$16 sps:$4 sm:$0xff]   ;;  %v2979_v42 = vld [vmem:[#allocation2 + $0x1c0] ss:$16 sps:$4 sm:$0xff]  }
  0x2f   :  { %1005 = vmatpush1.bf16.msra.mxu0 %v2949_v22  ;;  %v2977_v41 = vld [vmem:[#allocation2 + $0x3c4] ss:$16 sps:$4 sm:$0xff]   ;;  %v2980_v43 = vld [vmem:[#allocation2 + $0x3c0] ss:$16 sps:$4 sm:$0xff]  }
  0x30   :  { %1046 = vmatpush1.bf16.msra.mxu1 %v2950_v23  ;;  %1006 = vmatprep.subr.bf16.mxu0 %v2951_v24  ;;  %v2981_v44 = vld [vmem:[#allocation2 + $0x1a4] ss:$16 sps:$4 sm:$0xff]   ;;  %v2985_v46 = vld [vmem:[#allocation2 + $0x1a0] ss:$16 sps:$4 sm:$0xff]  }
  0x31   :  { %1047 = vmatprep.subr.bf16.mxu1 %v2953_v25  ;;  %v2983_v45 = vld [vmem:[#allocation2 + $0x3a4] ss:$16 sps:$4 sm:$0xff]   ;;  %v2986_v47 = vld [vmem:[#allocation2 + $0x3a0] ss:$16 sps:$4 sm:$0xff]  }
  0x32   :  { %v2987_v48 = vld [vmem:[#allocation2 + $0x184] ss:$16 sps:$4 sm:$0xff]   ;;  %v2991_v50 = vld [vmem:[#allocation2 + $0x180] ss:$16 sps:$4 sm:$0xff]  }
  0x33   :  { %1007 = vmatpush1.bf16.msra.mxu0 %v2955_v26  ;;  %v2989_v49 = vld [vmem:[#allocation2 + $0x384] ss:$16 sps:$4 sm:$0xff]   ;;  %v2992_v51 = vld [vmem:[#allocation2 + $0x380] ss:$16 sps:$4 sm:$0xff]  }
  0x34   :  { %1048 = vmatpush1.bf16.msra.mxu1 %v2956_v27  ;;  %1008 = vmatprep.subr.bf16.mxu0 %v2957_v28  ;;  %v2993_v52 = vld [vmem:[#allocation2 + $0x164] ss:$16 sps:$4 sm:$0xff]   ;;  %v2997_v54 = vld [vmem:[#allocation2 + $0x160] ss:$16 sps:$4 sm:$0xff]   ;;  %v3460_v27 = vsub.s32 0, %v82_v12 }
  0x35   :  { %1049 = vmatprep.subr.bf16.mxu1 %v2959_v29  ;;  %v2995_v53 = vld [vmem:[#allocation2 + $0x364] ss:$16 sps:$4 sm:$0xff]   ;;  %v2998_v55 = vld [vmem:[#allocation2 + $0x360] ss:$16 sps:$4 sm:$0xff]  }
  0x36   :  { %v2999_v56 = vld [vmem:[#allocation2 + $0x144] ss:$16 sps:$4 sm:$0xff]   ;;  %v3003_v58 = vld [vmem:[#allocation2 + $0x140] ss:$16 sps:$4 sm:$0xff]  }
  0x37   :  { %1009 = vmatpush1.bf16.msra.mxu0 %v2961_v30  ;;  %v3001_v57 = vld [vmem:[#allocation2 + $0x344] ss:$16 sps:$4 sm:$0xff]   ;;  %v3004_v59 = vld [vmem:[#allocation2 + $0x340] ss:$16 sps:$4 sm:$0xff]  }
  0x38   :  { %1050 = vmatpush1.bf16.msra.mxu1 %v2962_v31  ;;  %1010 = vmatprep.subr.bf16.mxu0 %v2963_v32  ;;  %v3005_v60 = vld [vmem:[#allocation2 + $0x124] ss:$16 sps:$4 sm:$0xff]   ;;  %v3009_v62 = vld [vmem:[#allocation2 + $0x120] ss:$16 sps:$4 sm:$0xff]  }
  0x39   :  { %1051 = vmatprep.subr.bf16.mxu1 %v2965_v33  ;;  %v3007_v61 = vld [vmem:[#allocation2 + $0x324] ss:$16 sps:$4 sm:$0xff]   ;;  %v3010_v63 = vld [vmem:[#allocation2 + $0x320] ss:$16 sps:$4 sm:$0xff]  }
  0x3a   :  { %v3011_v1 = vld [vmem:[#allocation2 + $0x104] ss:$16 sps:$4 sm:$0xff]   ;;  %v3015_v3 = vld [vmem:[#allocation2 + $0x100] ss:$16 sps:$4 sm:$0xff]  }
  0x3b   :  { %1011 = vmatpush1.bf16.msra.mxu0 %v2967_v34  ;;  %v3013_v2 = vld [vmem:[#allocation2 + $0x304] ss:$16 sps:$4 sm:$0xff]   ;;  %v3016_v4 = vld [vmem:[#allocation2 + $0x300] ss:$16 sps:$4 sm:$0xff]  }
  0x3c   :  { %1052 = vmatpush1.bf16.msra.mxu1 %v2968_v35  ;;  %1012 = vmatprep.subr.bf16.mxu0 %v2969_v36  ;;  %v2575_v10 = vld.sshfl [vmem:[%s3635_s1] sm:$0x33 pattern:$0x75316420] }
  0x3d   :  { %1053 = vmatprep.subr.bf16.mxu1 %v2971_v37  ;;  %v77_v13 = vcombine.high %v2575_v10, %v2575_v10  ;;  %v2576_v15 = vld.sshfl [vmem:[%s3636_s2] sm:$0x33 pattern:$0x75316420]  ;;  %v84_v16 = vrot.slane %v2575_v10, %v3451_v14 }
  0x3e   :  { %v175_v18 = vcombine.high %v2576_v15, %v2576_v15  ;;  %v182_v22 = vrot.slane %v2576_v15, %v3451_v14 }
  0x3f   :  { %1013 = vmatpush2.bf16.msra.mxu0 %v2973_v38  ;;  %v91_v17 = vrot.slane %v77_v13, %v3451_v14  ;;  %v92_v19 = vcombine.high %v84_v16, %v84_v16  ;;  %v130_v23 = vshrl.u32 %v84_v16, 16  ;;  %v95_v30 = vpack.i.b16 %v84_v16, %v84_v16  ;;  %v3025_v16 = vld [vmem:[#allocation2 + $0xcc] ss:$16 sps:$4 sm:$0xff]  }
  0x40   :  { %1054 = vmatpush2.bf16.msra.mxu1 %v2974_v39  ;;  %1014 = vmatprep.subr.bf16.mxu0 %v2975_v40  ;;  %v189_v21 = vrot.slane %v175_v18, %v3451_v14  ;;  %v190_v29 = vcombine.high %v182_v22, %v182_v22  ;;  %v3023_v18 = vld [vmem:[#allocation2 + $0xc8] ss:$16 sps:$4 sm:$0xff]  }
  0x41   :  { %1055 = vmatprep.subr.bf16.mxu1 %v2977_v41  ;;  %v93_v20 = vcombine.high %v91_v17, %v91_v17  ;;  %v137_v24 = vshrl.u32 %v91_v17, 16  ;;  %v144_v25 = vshrl.u32 %v92_v19, 16  ;;  %v102_v31 = vpack.i.b16 %v91_v17, %v91_v17  ;;  %v3028_v17 = vld [vmem:[#allocation2 + $0x2cc] ss:$16 sps:$4 sm:$0xff]  }
  0x42   :  { %v191_v28 = vcombine.high %v189_v21, %v189_v21  ;;  %v109_v32 = vpack.i.b16 %v92_v19, %v92_v19  ;;  %v131_v34 = vpack.i.b16 %v130_v23, %v130_v23  ;;  %v200_v39 = vpack.i.b16 %v189_v21, %v189_v21  ;;  %v3026_v19 = vld [vmem:[#allocation2 + $0x2c8] ss:$16 sps:$4 sm:$0xff]   ;;  %v3034_v21 = vld [vmem:[#allocation2 + $0x2ac] ss:$16 sps:$4 sm:$0xff]  }
  0x43   :  { %1015 = vmatpush2.bf16.msra.mxu0 %v2979_v42  ;;  %v151_v26 = vshrl.u32 %v93_v20, 16  ;;  %v116_v33 = vpack.i.b16 %v93_v20, %v93_v20  ;;  %v138_v35 = vpack.i.b16 %v137_v24, %v137_v24  ;;  %v145_v36 = vpack.i.b16 %v144_v25, %v144_v25  ;;  %v3031_v20 = vld [vmem:[#allocation2 + $0xac] ss:$16 sps:$4 sm:$0xff]   ;;  %v3032_v23 = vld [vmem:[#allocation2 + $0x2a8] ss:$16 sps:$4 sm:$0xff]  }
  0x44   :  { %1056 = vmatpush2.bf16.msra.mxu1 %v2980_v43  ;;  %1016 = vmatprep.subr.bf16.mxu0 %v2981_v44  ;;  %v214_v40 = vpack.i.b16 %v191_v28, %v191_v28  ;;  %v193_v41 = vpack.i.b16 %v182_v22, %v182_v22  ;;  %v207_v42 = vpack.i.b16 %v190_v29, %v190_v29  ;;  %v3029_v22 = vld [vmem:[#allocation2 + $0xa8] ss:$16 sps:$4 sm:$0xff]   ;;  %v3037_v24 = vld [vmem:[#allocation2 + $0x8c] ss:$16 sps:$4 sm:$0xff]  }
  0x45   :  { %1057 = vmatprep.subr.bf16.mxu1 %v2983_v45  ;;  %v152_v37 = vpack.i.b16 %v151_v26, %v151_v26  ;;  %v100_v43 = vrot.slane %v95_v30, %v3460_v27  ;;  %v107_v44 = vrot.slane %v102_v31, %v3460_v27  ;;  %v114_v45 = vrot.slane %v109_v32, %v3460_v27  ;;  %v3040_v25 = vld [vmem:[#allocation2 + $0x28c] ss:$16 sps:$4 sm:$0xff]   ;;  %v3035_v26 = vld [vmem:[#allocation2 + $0x88] ss:$16 sps:$4 sm:$0xff]  }
  0x46   :  { %v3038_v28 = vld [vmem:[#allocation2 + $0x288] ss:$16 sps:$4 sm:$0xff]   ;;  %v3043_v29 = vld [vmem:[#allocation2 + $0x6c] ss:$16 sps:$4 sm:$0xff]  }
  0x47   :  { %1017 = vmatpush2.bf16.msra.mxu0 %v2985_v46  ;;  %v121_v46 = vrot.slane %v116_v33, %v3460_v27  ;;  %v3046_v30 = vld [vmem:[#allocation2 + $0x26c] ss:$16 sps:$4 sm:$0xff]   ;;  %v3041_v31 = vld [vmem:[#allocation2 + $0x68] ss:$16 sps:$4 sm:$0xff]  }
  0x48   :  { %1058 = vmatpush2.bf16.msra.mxu1 %v2986_v47  ;;  %1018 = vmatprep.subr.bf16.mxu0 %v2987_v48  ;;  %v136_v47 = vrot.slane %v131_v34, %v3460_v27  ;;  %v143_v48 = vrot.slane %v138_v35, %v3460_v27  ;;  %v3044_v32 = vld [vmem:[#allocation2 + $0x268] ss:$16 sps:$4 sm:$0xff]   ;;  %v3049_v33 = vld [vmem:[#allocation2 + $0x4c] ss:$16 sps:$4 sm:$0xff]  }
  0x49   :  { %1059 = vmatprep.subr.bf16.mxu1 %v2989_v49  ;;  %v150_v49 = vrot.slane %v145_v36, %v3460_v27  ;;  %v3052_v34 = vld [vmem:[#allocation2 + $0x24c] ss:$16 sps:$4 sm:$0xff]   ;;  %v3047_v35 = vld [vmem:[#allocation2 + $0x48] ss:$16 sps:$4 sm:$0xff]  }
  0x4a   :  { %v3050_v36 = vld [vmem:[#allocation2 + $0x248] ss:$16 sps:$4 sm:$0xff]  }
  0x4b   :  { %1019 = vmatpush2.bf16.msra.mxu0 %v2991_v50  ;;  %v157_v50 = vrot.slane %v152_v37, %v3460_v27  ;;  %v3055_v37 = vld [vmem:[#allocation2 + $0x2c] ss:$16 sps:$4 sm:$0xff]  }
  0x4c   :  { %1060 = vmatpush2.bf16.msra.mxu1 %v2992_v51  ;;  %1020 = vmatprep.subr.bf16.mxu0 %v2993_v52  ;;  %v205_v51 = vrot.slane %v200_v39, %v3460_v27  ;;  %v219_v52 = vrot.slane %v214_v40, %v3460_v27  ;;  %v3053_v39 = vld [vmem:[#allocation2 + $0x28] ss:$16 sps:$4 sm:$0xff]  }
  0x4d   :  { %1061 = vmatprep.subr.bf16.mxu1 %v2995_v53  ;;  %v198_v53 = vrot.slane %v193_v41, %v3460_v27  ;;  %v3056_v40 = vld [vmem:[#allocation2 + $0x228] ss:$16 sps:$4 sm:$0xff]   ;;  %v3061_v41 = vld [vmem:[#allocation2 + $0xc] ss:$16 sps:$4 sm:$0xff]  }
  0x4f   :  { %1021 = vmatpush2.bf16.msra.mxu0 %v2997_v54  ;;  %v212_v54 = vrot.slane %v207_v42, %v3460_v27  ;;  %v3064_v42 = vld [vmem:[#allocation2 + $0x20c] ss:$16 sps:$4 sm:$0xff]  }
  0x50   :  { %1062 = vmatpush2.bf16.msra.mxu1 %v2998_v55  ;;  %1022 = vmatprep.subr.bf16.mxu0 %v2999_v56 }
  0x51   :  { %1063 = vmatprep.subr.bf16.mxu1 %v3001_v57 }
  0x53   :  { %1023 = vmatpush2.bf16.msra.mxu0 %v3003_v58 }
  0x54   :  { %1064 = vmatpush2.bf16.msra.mxu1 %v3004_v59  ;;  %1024 = vmatprep.subr.bf16.mxu0 %v3005_v60 }
  0x55   :  { %1065 = vmatprep.subr.bf16.mxu1 %v3007_v61 }
  0x57   :  { %1025 = vmatpush2.bf16.msra.mxu0 %v3009_v62 }
  0x58   :  { %1066 = vmatpush2.bf16.msra.mxu1 %v3010_v63  ;;  %1026 = vmatprep.subr.bf16.mxu0 %v3011_v1 }
  0x59   :  { %1067 = vmatprep.subr.bf16.mxu1 %v3013_v2 }
  0x5b   :  { %1027 = vmatpush2.bf16.msra.mxu0 %v3015_v3 }
  0x5c   :  { %1068 = vmatpush2.bf16.msra.mxu1 %v3016_v4  ;;  %1078 = vmatprep.subr.bf16.mxu0 %v3019_v5 }
  0x5d   :  { %1119 = vmatprep.subr.bf16.mxu1 %v3022_v6 }
  0x99   :  { %v67_v38 = vpop.permute.xlu0 %66 }
  0x9a   :  { %v122_v55 = vmul.bf16 %v100_v43, %v67_v38  ;;  %v123_v56 = vmul.bf16 %v107_v44, %v67_v38  ;;  %v124_v57 = vmul.bf16 %v114_v45, %v67_v38  ;;  %v125_v58 = vmul.bf16 %v121_v46, %v67_v38  ;;  %v3058_v38 = vld [vmem:[#allocation2 + $0x22c] ss:$16 sps:$4 sm:$0xff]   ;;  %v3059_v43 = vld [vmem:[#allocation2 + $0x8] ss:$16 sps:$4 sm:$0xff]  }
  0x9b   :  { %v3062_v44 = vld [vmem:[#allocation2 + $0x208] ss:$16 sps:$4 sm:$0xff]   ;;  %v3067_v45 = vld [vmem:[#allocation2 + $0x1ec] ss:$16 sps:$4 sm:$0xff]  }
  0x9c   :  { %v3070_v46 = vld [vmem:[#allocation2 + $0x3ec] ss:$16 sps:$4 sm:$0xff]  }
  0x9e   :  { %v128_v59 = vpop.permute.xlu0 %127 }
  0x9f   :  { %v158_v60 = vmul.bf16 %v136_v47, %v128_v59  ;;  %v159_v61 = vmul.bf16 %v143_v48, %v128_v59  ;;  %v160_v62 = vmul.bf16 %v150_v49, %v128_v59  ;;  %v161_v63 = vmul.bf16 %v157_v50, %v128_v59  ;;  %v3065_v47 = vld [vmem:[#allocation2 + $0x1e8] ss:$16 sps:$4 sm:$0xff]   ;;  %v3073_v49 = vld [vmem:[#allocation2 + $0x1cc] ss:$16 sps:$4 sm:$0xff]  }
  0xa0   :  { %v3068_v48 = vld [vmem:[#allocation2 + $0x3e8] ss:$16 sps:$4 sm:$0xff]   ;;  %v3076_v50 = vld [vmem:[#allocation2 + $0x3cc] ss:$16 sps:$4 sm:$0xff]  }
  0xa1   :  { %v162_v1 = vadd.bf16 %v158_v60, %v122_v55  ;;  %v164_v2 = vadd.bf16 %v160_v62, %v124_v57  ;;  %v163_v3 = vadd.bf16 %v159_v61, %v123_v56  ;;  %v165_v4 = vadd.bf16 %v161_v63, %v125_v58  ;;  %v3077_v55 = vld [vmem:[#allocation2 + $0x1a8] ss:$16 sps:$4 sm:$0xff]   ;;  %v3085_v57 = vld [vmem:[#allocation2 + $0x18c] ss:$16 sps:$4 sm:$0xff]  }
  0xa2   :  { %v3080_v56 = vld [vmem:[#allocation2 + $0x3a8] ss:$16 sps:$4 sm:$0xff]   ;;  %v3088_v58 = vld [vmem:[#allocation2 + $0x38c] ss:$16 sps:$4 sm:$0xff]  }
  0xa3   :  { %v221_v5 = vadd.bf16 %v205_v51, %v163_v3  ;;  %v223_v6 = vadd.bf16 %v219_v52, %v165_v4  ;;  %v220_v9 = vadd.bf16 %v198_v53, %v162_v1  ;;  %v222_v10 = vadd.bf16 %v212_v54, %v164_v2  ;;  %v3071_v51 = vld [vmem:[#allocation2 + $0x1c8] ss:$16 sps:$4 sm:$0xff]   ;;  %v3079_v53 = vld [vmem:[#allocation2 + $0x1ac] ss:$16 sps:$4 sm:$0xff]  }
  0xa4   :  { %v3074_v52 = vld [vmem:[#allocation2 + $0x3c8] ss:$16 sps:$4 sm:$0xff]   ;;  %v3082_v54 = vld [vmem:[#allocation2 + $0x3ac] ss:$16 sps:$4 sm:$0xff]  }
  0xa5   :  { %v225_v11 = vmax.bf16 %v3385_v0, %v221_v5  ;;  %v227_v12 = vmax.bf16 %v3385_v0, %v223_v6  ;;  %v3477_v13 = vmax.bf16 %v3385_v0, %v220_v9  ;;  %v3480_v15 = vmax.bf16 %v3385_v0, %v222_v10  ;;  %v3083_v59 = vld [vmem:[#allocation2 + $0x188] ss:$16 sps:$4 sm:$0xff]   ;;  %v3091_v61 = vld [vmem:[#allocation2 + $0x16c] ss:$16 sps:$4 sm:$0xff]  }
  0xa6   :  { %v3086_v60 = vld [vmem:[#allocation2 + $0x388] ss:$16 sps:$4 sm:$0xff]   ;;  %v3094_v62 = vld [vmem:[#allocation2 + $0x36c] ss:$16 sps:$4 sm:$0xff]  }
  0xa7   :  { %1028 = vmatprep.mubr.bf16.mxu0 %v225_v11  ;;  %1069 = vmatprep.mubr.bf16.mxu1 %v227_v12  ;;  %v3089_v63 = vld [vmem:[#allocation2 + $0x168] ss:$16 sps:$4 sm:$0xff]   ;;  %v3097_v2 = vld [vmem:[#allocation2 + $0x14c] ss:$16 sps:$4 sm:$0xff]  }
  0xa8   :  { %1029 = vmatmul.mubr.bf16.vlgmr.msra.gmra.mxu0 %v3477_v13  ;;  %1070 = vmatmul.mubr.bf16.vlgmr.msra.gmra.mxu1 %v3480_v15  ;;  %v3092_v1 = vld [vmem:[#allocation2 + $0x368] ss:$16 sps:$4 sm:$0xff]   ;;  %v3100_v3 = vld [vmem:[#allocation2 + $0x34c] ss:$16 sps:$4 sm:$0xff]  }
  0xa9   :  { %1079 = vmatpush1.bf16.msra.mxu0 %v3017_v7  ;;  %1120 = vmatpush1.bf16.msra.mxu1 %v3020_v8  ;;  %v3095_v4 = vld [vmem:[#allocation2 + $0x148] ss:$16 sps:$4 sm:$0xff]   ;;  %v3103_v6 = vld [vmem:[#allocation2 + $0x12c] ss:$16 sps:$4 sm:$0xff]  }
  0xaa   :  { %1110 = vmatprep.mubr.bf16.mxu0 %v225_v11  ;;  %1151 = vmatprep.mubr.bf16.mxu1 %v227_v12  ;;  %v3098_v5 = vld [vmem:[#allocation2 + $0x348] ss:$16 sps:$4 sm:$0xff]   ;;  %v3106_v7 = vld [vmem:[#allocation2 + $0x32c] ss:$16 sps:$4 sm:$0xff]  }
  0xab   :  { %1080 = vmatprep.subr.bf16.mxu0 %v3025_v16  ;;  %1121 = vmatprep.subr.bf16.mxu1 %v3028_v17  ;;  %v3101_v8 = vld [vmem:[#allocation2 + $0x128] ss:$16 sps:$4 sm:$0xff]   ;;  %v3109_v10 = vld [vmem:[#allocation2 + $0x10c] ss:$16 sps:$4 sm:$0xff]   ;;  %v3115_v17 = vld [vmem:[#allocation4 + $0xe4] ss:$16 sps:$4 sm:$0xff]  }
  0xac   :  { %v3104_v9 = vld [vmem:[#allocation2 + $0x328] ss:$16 sps:$4 sm:$0xff]   ;;  %v3112_v11 = vld [vmem:[#allocation2 + $0x30c] ss:$16 sps:$4 sm:$0xff]  }
  0xad   :  { %1081 = vmatpush1.bf16.msra.mxu0 %v3023_v18  ;;  %1122 = vmatpush1.bf16.msra.mxu1 %v3026_v19  ;;  %v3107_v12 = vld [vmem:[#allocation2 + $0x108] ss:$16 sps:$4 sm:$0xff]   ;;  %v3113_v18 = vld [vmem:[#allocation4 + $0xe0] ss:$16 sps:$4 sm:$0xff]   ;;  %v3118_v19 = vld [vmem:[#allocation4 + $0xc4] ss:$16 sps:$4 sm:$0xff]  }
  0xae   :  { %1082 = vmatprep.subr.bf16.mxu0 %v3031_v20  ;;  %1123 = vmatprep.subr.bf16.mxu1 %v3034_v21  ;;  %v3110_v16 = vld [vmem:[#allocation2 + $0x308] ss:$16 sps:$4 sm:$0xff]   ;;  %v3116_v20 = vld [vmem:[#allocation4 + $0xc0] ss:$16 sps:$4 sm:$0xff]   ;;  %v3121_v21 = vld [vmem:[#allocation4 + $0xa4] ss:$16 sps:$4 sm:$0xff]  }
  0xb1   :  { %1083 = vmatpush1.bf16.msra.mxu0 %v3029_v22  ;;  %1124 = vmatpush1.bf16.msra.mxu1 %v3032_v23  ;;  %v3119_v22 = vld [vmem:[#allocation4 + $0xa0] ss:$16 sps:$4 sm:$0xff]   ;;  %v3124_v23 = vld [vmem:[#allocation4 + $0x84] ss:$16 sps:$4 sm:$0xff]  }
  0xb2   :  { %1084 = vmatprep.subr.bf16.mxu0 %v3037_v24  ;;  %1125 = vmatprep.subr.bf16.mxu1 %v3040_v25  ;;  %v3161_v24 = vld [vmem:[#allocation4 + $0x2e0] ss:$16 sps:$4 sm:$0xff]   ;;  %v3163_v25 = vld [vmem:[#allocation4 + $0x2e4] ss:$16 sps:$4 sm:$0xff]  }
  0xb5   :  { %1085 = vmatpush1.bf16.msra.mxu0 %v3035_v26  ;;  %1126 = vmatpush1.bf16.msra.mxu1 %v3038_v28  ;;  %v3122_v26 = vld [vmem:[#allocation4 + $0x80] ss:$16 sps:$4 sm:$0xff]   ;;  %v3127_v28 = vld [vmem:[#allocation4 + $0x64] ss:$16 sps:$4 sm:$0xff]  }
  0xb6   :  { %1086 = vmatprep.subr.bf16.mxu0 %v3043_v29  ;;  %1127 = vmatprep.subr.bf16.mxu1 %v3046_v30  ;;  %v3167_v29 = vld [vmem:[#allocation4 + $0x2c0] ss:$16 sps:$4 sm:$0xff]   ;;  %v3130_v30 = vld [vmem:[#allocation4 + $0x44] ss:$16 sps:$4 sm:$0xff]  }
  0xb9   :  { %1087 = vmatpush1.bf16.msra.mxu0 %v3041_v31  ;;  %1128 = vmatpush1.bf16.msra.mxu1 %v3044_v32  ;;  %v3128_v31 = vld [vmem:[#allocation4 + $0x40] ss:$16 sps:$4 sm:$0xff]  }
  0xba   :  { %1088 = vmatprep.subr.bf16.mxu0 %v3049_v33  ;;  %1129 = vmatprep.subr.bf16.mxu1 %v3052_v34  ;;  %v3173_v32 = vld [vmem:[#allocation4 + $0x2a0] ss:$16 sps:$4 sm:$0xff]   ;;  %v3175_v33 = vld [vmem:[#allocation4 + $0x2a4] ss:$16 sps:$4 sm:$0xff]  }
  0xbb   :  { %v3133_v34 = vld [vmem:[#allocation4 + $0x24] ss:$16 sps:$4 sm:$0xff]  }
  0xbd   :  { %1089 = vmatpush1.bf16.msra.mxu0 %v3047_v35  ;;  %1130 = vmatpush1.bf16.msra.mxu1 %v3050_v36  ;;  %v3131_v35 = vld [vmem:[#allocation4 + $0x20] ss:$16 sps:$4 sm:$0xff]  }
  0xbe   :  { %1090 = vmatprep.subr.bf16.mxu0 %v3055_v37  ;;  %1131 = vmatprep.subr.bf16.mxu1 %v3058_v38  ;;  %v3179_v36 = vld [vmem:[#allocation4 + $0x280] ss:$16 sps:$4 sm:$0xff]   ;;  %v3181_v37 = vld [vmem:[#allocation4 + $0x284] ss:$16 sps:$4 sm:$0xff]  }
  0xbf   :  { %v3136_v38 = vld [vmem:[#allocation4 + $0x4] ss:$16 sps:$4 sm:$0xff]  }
  0xc1   :  { %1091 = vmatpush1.bf16.msra.mxu0 %v3053_v39  ;;  %1132 = vmatpush1.bf16.msra.mxu1 %v3056_v40  ;;  %v3134_v39 = vld [vmem:[#allocation4] ss:$16 sps:$4 sm:$0xff]  }
  0xc2   :  { %1092 = vmatprep.subr.bf16.mxu0 %v3061_v41  ;;  %1133 = vmatprep.subr.bf16.mxu1 %v3064_v42  ;;  %v3185_v40 = vld [vmem:[#allocation4 + $0x260] ss:$16 sps:$4 sm:$0xff]   ;;  %v3187_v41 = vld [vmem:[#allocation4 + $0x264] ss:$16 sps:$4 sm:$0xff]  }
  0xc3   :  { %v3139_v42 = vld [vmem:[#allocation4 + $0x1e4] ss:$16 sps:$4 sm:$0xff]  }
  0xc5   :  { %1093 = vmatpush1.bf16.msra.mxu0 %v3059_v43  ;;  %1134 = vmatpush1.bf16.msra.mxu1 %v3062_v44  ;;  %v3137_v43 = vld [vmem:[#allocation4 + $0x1e0] ss:$16 sps:$4 sm:$0xff]  }
  0xc6   :  { %1094 = vmatprep.subr.bf16.mxu0 %v3067_v45  ;;  %1135 = vmatprep.subr.bf16.mxu1 %v3070_v46  ;;  %v3191_v44 = vld [vmem:[#allocation4 + $0x240] ss:$16 sps:$4 sm:$0xff]   ;;  %v3193_v45 = vld [vmem:[#allocation4 + $0x244] ss:$16 sps:$4 sm:$0xff]  }
  0xc7   :  { %v3142_v46 = vld [vmem:[#allocation4 + $0x1c4] ss:$16 sps:$4 sm:$0xff]  }
  0xc9   :  { %1095 = vmatpush2.bf16.msra.mxu0 %v3065_v47  ;;  %1136 = vmatpush2.bf16.msra.mxu1 %v3068_v48  ;;  %v3140_v47 = vld [vmem:[#allocation4 + $0x1c0] ss:$16 sps:$4 sm:$0xff]  }
  0xca   :  { %1096 = vmatprep.subr.bf16.mxu0 %v3073_v49  ;;  %1137 = vmatprep.subr.bf16.mxu1 %v3076_v50  ;;  %v3197_v48 = vld [vmem:[#allocation4 + $0x220] ss:$16 sps:$4 sm:$0xff]   ;;  %v3199_v49 = vld [vmem:[#allocation4 + $0x224] ss:$16 sps:$4 sm:$0xff]  }
  0xcb   :  { %v3145_v50 = vld [vmem:[#allocation4 + $0x1a4] ss:$16 sps:$4 sm:$0xff]  }
  0xcd   :  { %1097 = vmatpush2.bf16.msra.mxu0 %v3071_v51  ;;  %1138 = vmatpush2.bf16.msra.mxu1 %v3074_v52  ;;  %v3143_v51 = vld [vmem:[#allocation4 + $0x1a0] ss:$16 sps:$4 sm:$0xff]  }
  0xce   :  { %1098 = vmatprep.subr.bf16.mxu0 %v3079_v53  ;;  %1139 = vmatprep.subr.bf16.mxu1 %v3082_v54  ;;  %v3203_v52 = vld [vmem:[#allocation4 + $0x200] ss:$16 sps:$4 sm:$0xff]   ;;  %v3205_v53 = vld [vmem:[#allocation4 + $0x204] ss:$16 sps:$4 sm:$0xff]  }
  0xcf   :  { %v3148_v54 = vld [vmem:[#allocation4 + $0x184] ss:$16 sps:$4 sm:$0xff]  }
  0xd1   :  { %1099 = vmatpush2.bf16.msra.mxu0 %v3077_v55  ;;  %1140 = vmatpush2.bf16.msra.mxu1 %v3080_v56  ;;  %v3146_v55 = vld [vmem:[#allocation4 + $0x180] ss:$16 sps:$4 sm:$0xff]  }
  0xd2   :  { %1100 = vmatprep.subr.bf16.mxu0 %v3085_v57  ;;  %1141 = vmatprep.subr.bf16.mxu1 %v3088_v58  ;;  %v3209_v56 = vld [vmem:[#allocation4 + $0x3e0] ss:$16 sps:$4 sm:$0xff]   ;;  %v3211_v57 = vld [vmem:[#allocation4 + $0x3e4] ss:$16 sps:$4 sm:$0xff]  }
  0xd3   :  { %v3151_v58 = vld [vmem:[#allocation4 + $0x164] ss:$16 sps:$4 sm:$0xff]  }
  0xd5   :  { %1101 = vmatpush2.bf16.msra.mxu0 %v3083_v59  ;;  %1142 = vmatpush2.bf16.msra.mxu1 %v3086_v60  ;;  %v3149_v59 = vld [vmem:[#allocation4 + $0x160] ss:$16 sps:$4 sm:$0xff]  }
  0xd6   :  { %1102 = vmatprep.subr.bf16.mxu0 %v3091_v61  ;;  %1143 = vmatprep.subr.bf16.mxu1 %v3094_v62  ;;  %v3215_v60 = vld [vmem:[#allocation4 + $0x3c0] ss:$16 sps:$4 sm:$0xff]   ;;  %v3217_v61 = vld [vmem:[#allocation4 + $0x3c4] ss:$16 sps:$4 sm:$0xff]  }
  0xd7   :  { %v3154_v62 = vld [vmem:[#allocation4 + $0x144] ss:$16 sps:$4 sm:$0xff]  }
  0xd9   :  { %1103 = vmatpush2.bf16.msra.mxu0 %v3089_v63  ;;  %1144 = vmatpush2.bf16.msra.mxu1 %v3092_v1  ;;  %v3152_v63 = vld [vmem:[#allocation4 + $0x140] ss:$16 sps:$4 sm:$0xff]  }
  0xda   :  { %1104 = vmatprep.subr.bf16.mxu0 %v3097_v2  ;;  %1145 = vmatprep.subr.bf16.mxu1 %v3100_v3  ;;  %v3221_v1 = vld [vmem:[#allocation4 + $0x3a0] ss:$16 sps:$4 sm:$0xff]   ;;  %v3223_v2 = vld [vmem:[#allocation4 + $0x3a4] ss:$16 sps:$4 sm:$0xff]  }
  0xdb   :  { %v3157_v3 = vld [vmem:[#allocation4 + $0x124] ss:$16 sps:$4 sm:$0xff]  }
  0xdd   :  { %1105 = vmatpush2.bf16.msra.mxu0 %v3095_v4  ;;  %1146 = vmatpush2.bf16.msra.mxu1 %v3098_v5  ;;  %v3155_v4 = vld [vmem:[#allocation4 + $0x120] ss:$16 sps:$4 sm:$0xff]  }
  0xde   :  { %1106 = vmatprep.subr.bf16.mxu0 %v3103_v6  ;;  %1147 = vmatprep.subr.bf16.mxu1 %v3106_v7  ;;  %v3227_v5 = vld [vmem:[#allocation4 + $0x380] ss:$16 sps:$4 sm:$0xff]   ;;  %v3229_v6 = vld [vmem:[#allocation4 + $0x384] ss:$16 sps:$4 sm:$0xff]  }
  0xdf   :  { %v3160_v7 = vld [vmem:[#allocation4 + $0x104] ss:$16 sps:$4 sm:$0xff]  }
  0xe1   :  { %1107 = vmatpush2.bf16.msra.mxu0 %v3101_v8  ;;  %1148 = vmatpush2.bf16.msra.mxu1 %v3104_v9  ;;  %v3158_v8 = vld [vmem:[#allocation4 + $0x100] ss:$16 sps:$4 sm:$0xff]  }
  0xe2   :  { %1108 = vmatprep.subr.bf16.mxu0 %v3109_v10  ;;  %1149 = vmatprep.subr.bf16.mxu1 %v3112_v11  ;;  %v3233_v9 = vld [vmem:[#allocation4 + $0x360] ss:$16 sps:$4 sm:$0xff]   ;;  %v3235_v10 = vld [vmem:[#allocation4 + $0x364] ss:$16 sps:$4 sm:$0xff]   ;;  %v3166_v11 = vld [vmem:[#allocation4 + $0xec] ss:$16 sps:$4 sm:$0xff]  }
  0xe5   :  { %1109 = vmatpush2.bf16.msra.mxu0 %v3107_v12  ;;  %1150 = vmatpush2.bf16.msra.mxu1 %v3110_v16  ;;  %v3239_v12 = vld [vmem:[#allocation4 + $0x340] ss:$16 sps:$4 sm:$0xff]   ;;  %v3241_v16 = vld [vmem:[#allocation4 + $0x344] ss:$16 sps:$4 sm:$0xff]  }
  0xe6   :  { %1994 = vmatprep.subr.bf16.mxu0 %v3115_v17  ;;  %2035 = vmatprep.subr.bf16.mxu1 %v3163_v25  ;;  %v3247_v17 = vld [vmem:[#allocation4 + $0x324] ss:$16 sps:$4 sm:$0xff]  }
  0xe8   :  { %1111 = vmatmul.mubr.bf16.vlgmr.msra.gmra.mxu0 %v3477_v13  ;;  %1152 = vmatmul.mubr.bf16.vlgmr.msra.gmra.mxu1 %v3480_v15  ;;  %v3125_v13 = vld [vmem:[#allocation4 + $0x60] ss:$16 sps:$4 sm:$0xff]   ;;  %v3169_v15 = vld [vmem:[#allocation4 + $0x2c4] ss:$16 sps:$4 sm:$0xff]  }
  0xe9   :  { %1995 = vmatpush1.bf16.msra.mxu0 %v3113_v18  ;;  %2036 = vmatpush1.bf16.msra.mxu1 %v3161_v24  ;;  %v3245_v18 = vld [vmem:[#allocation4 + $0x320] ss:$16 sps:$4 sm:$0xff]  }
  0xea   :  { %1996 = vmatprep.subr.bf16.mxu0 %v3118_v19  ;;  %2037 = vmatprep.subr.bf16.mxu1 %v3169_v15  ;;  %v3253_v19 = vld [vmem:[#allocation4 + $0x304] ss:$16 sps:$4 sm:$0xff]  }
  0xed   :  { %1997 = vmatpush1.bf16.msra.mxu0 %v3116_v20  ;;  %2038 = vmatpush1.bf16.msra.mxu1 %v3167_v29  ;;  %v3251_v20 = vld [vmem:[#allocation4 + $0x300] ss:$16 sps:$4 sm:$0xff]  }
  0xee   :  { %1998 = vmatprep.subr.bf16.mxu0 %v3121_v21  ;;  %2039 = vmatprep.subr.bf16.mxu1 %v3175_v33  ;;  %v3259_v21 = vld [vmem:[#allocation4 + $0x2ec] ss:$16 sps:$4 sm:$0xff]  }
  0xf1   :  { %1999 = vmatpush1.bf16.msra.mxu0 %v3119_v22  ;;  %2040 = vmatpush1.bf16.msra.mxu1 %v3173_v32  ;;  %v2705_v22 = vld.sshfl [vmem:[%s3638_s4] sm:$0x33 pattern:$0x75316420] }
  0xf2   :  { %2000 = vmatprep.subr.bf16.mxu0 %v3124_v23  ;;  %2041 = vmatprep.subr.bf16.mxu1 %v3181_v37  ;;  %v1173_v23 = vcombine.high %v2705_v22, %v2705_v22  ;;  %v3490_v24 = vrot.slane %v2705_v22, %v3451_v14 }
  0xf4   :  { %v3493_v25 = vrot.slane %v1173_v23, %v3451_v14 }
  0xf5   :  { %2001 = vmatpush1.bf16.msra.mxu0 %v3122_v26  ;;  %2042 = vmatpush1.bf16.msra.mxu1 %v3179_v36  ;;  %v1191_v26 = vpack.i.b16 %v3490_v24, %v3490_v24 }
  0xf6   :  { %2002 = vmatprep.subr.bf16.mxu0 %v3127_v28  ;;  %2043 = vmatprep.subr.bf16.mxu1 %v3187_v41  ;;  %v1198_v28 = vpack.i.b16 %v3493_v25, %v3493_v25 }
  0xf9   :  { %2003 = vmatpush1.bf16.msra.mxu0 %v3125_v13  ;;  %2044 = vmatpush1.bf16.msra.mxu1 %v3185_v40 }
  0xfa   :  { %2004 = vmatprep.subr.bf16.mxu0 %v3130_v30  ;;  %2045 = vmatprep.subr.bf16.mxu1 %v3193_v45  ;;  %v1196_v30 = vrot.slane %v1191_v26, %v3460_v27 }
  0xfd   :  { %2005 = vmatpush1.bf16.msra.mxu0 %v3128_v31  ;;  %2046 = vmatpush1.bf16.msra.mxu1 %v3191_v44  ;;  %v3164_v44 = vld [vmem:[#allocation4 + $0xe8] ss:$16 sps:$4 sm:$0xff]  }
  0xfe   :  { %2006 = vmatprep.subr.bf16.mxu0 %v3133_v34  ;;  %2047 = vmatprep.subr.bf16.mxu1 %v3199_v49  ;;  %v3176_v49 = vld [vmem:[#allocation4 + $0xa8] ss:$16 sps:$4 sm:$0xff]  }
 0x101   :  { %2007 = vmatpush1.bf16.msra.mxu0 %v3131_v35  ;;  %2048 = vmatpush1.bf16.msra.mxu1 %v3197_v48  ;;  %v1203_v35 = vrot.slane %v1198_v28, %v3460_v27  ;;  %v3178_v48 = vld [vmem:[#allocation4 + $0xac] ss:$16 sps:$4 sm:$0xff]  }
 0x102   :  { %2008 = vmatprep.subr.bf16.mxu0 %v3136_v38  ;;  %2049 = vmatprep.subr.bf16.mxu1 %v3205_v53  ;;  %v3188_v53 = vld [vmem:[#allocation4 + $0x68] ss:$16 sps:$4 sm:$0xff]  }
 0x105   :  { %2009 = vmatpush1.bf16.msra.mxu0 %v3134_v39  ;;  %2050 = vmatpush1.bf16.msra.mxu1 %v3203_v52  ;;  %v3190_v52 = vld [vmem:[#allocation4 + $0x6c] ss:$16 sps:$4 sm:$0xff]  }
 0x106   :  { %2010 = vmatprep.subr.bf16.mxu0 %v3139_v42  ;;  %2051 = vmatprep.subr.bf16.mxu1 %v3211_v57  ;;  %v3200_v57 = vld [vmem:[#allocation4 + $0x28] ss:$16 sps:$4 sm:$0xff]  }
 0x109   :  { %2011 = vmatpush2.bf16.msra.mxu0 %v3137_v43  ;;  %2052 = vmatpush2.bf16.msra.mxu1 %v3209_v56  ;;  %v3202_v56 = vld [vmem:[#allocation4 + $0x2c] ss:$16 sps:$4 sm:$0xff]  }
 0x10a   :  { %2012 = vmatprep.subr.bf16.mxu0 %v3142_v46  ;;  %2053 = vmatprep.subr.bf16.mxu1 %v3217_v61  ;;  %v3172_v46 = vld [vmem:[#allocation4 + $0xcc] ss:$16 sps:$4 sm:$0xff]   ;;  %v3212_v61 = vld [vmem:[#allocation4 + $0x1e8] ss:$16 sps:$4 sm:$0xff]  }
 0x10d   :  { %2013 = vmatpush2.bf16.msra.mxu0 %v3140_v47  ;;  %2054 = vmatpush2.bf16.msra.mxu1 %v3215_v60  ;;  %v3170_v47 = vld [vmem:[#allocation4 + $0xc8] ss:$16 sps:$4 sm:$0xff]   ;;  %v3214_v60 = vld [vmem:[#allocation4 + $0x1ec] ss:$16 sps:$4 sm:$0xff]  }
 0x10e   :  { %2014 = vmatprep.subr.bf16.mxu0 %v3145_v50  ;;  %2055 = vmatprep.subr.bf16.mxu1 %v3223_v2  ;;  %v3184_v50 = vld [vmem:[#allocation4 + $0x8c] ss:$16 sps:$4 sm:$0xff]   ;;  %v3224_v2 = vld [vmem:[#allocation4 + $0x1a8] ss:$16 sps:$4 sm:$0xff]  }
 0x111   :  { %2015 = vmatpush2.bf16.msra.mxu0 %v3143_v51  ;;  %2056 = vmatpush2.bf16.msra.mxu1 %v3221_v1  ;;  %v3182_v51 = vld [vmem:[#allocation4 + $0x88] ss:$16 sps:$4 sm:$0xff]   ;;  %v3226_v1 = vld [vmem:[#allocation4 + $0x1ac] ss:$16 sps:$4 sm:$0xff]  }
 0x112   :  { %2016 = vmatprep.subr.bf16.mxu0 %v3148_v54  ;;  %2057 = vmatprep.subr.bf16.mxu1 %v3229_v6  ;;  %v3196_v54 = vld [vmem:[#allocation4 + $0x4c] ss:$16 sps:$4 sm:$0xff]   ;;  %v3236_v6 = vld [vmem:[#allocation4 + $0x168] ss:$16 sps:$4 sm:$0xff]  }
 0x115   :  { %2017 = vmatpush2.bf16.msra.mxu0 %v3146_v55  ;;  %2058 = vmatpush2.bf16.msra.mxu1 %v3227_v5  ;;  %v3194_v55 = vld [vmem:[#allocation4 + $0x48] ss:$16 sps:$4 sm:$0xff]   ;;  %v3238_v5 = vld [vmem:[#allocation4 + $0x16c] ss:$16 sps:$4 sm:$0xff]  }
 0x116   :  { %2018 = vmatprep.subr.bf16.mxu0 %v3151_v58  ;;  %2059 = vmatprep.subr.bf16.mxu1 %v3235_v10  ;;  %v3208_v58 = vld [vmem:[#allocation4 + $0xc] ss:$16 sps:$4 sm:$0xff]   ;;  %v3242_v10 = vld [vmem:[#allocation4 + $0x148] ss:$16 sps:$4 sm:$0xff]  }
 0x119   :  { %2019 = vmatpush2.bf16.msra.mxu0 %v3149_v59  ;;  %2060 = vmatpush2.bf16.msra.mxu1 %v3233_v9  ;;  %v3206_v59 = vld [vmem:[#allocation4 + $0x8] ss:$16 sps:$4 sm:$0xff]   ;;  %v1189_v9 = vcombine.high %v3493_v25, %v3493_v25 }
 0x11a   :  { %2020 = vmatprep.subr.bf16.mxu0 %v3154_v62  ;;  %2061 = vmatprep.subr.bf16.mxu1 %v3241_v16  ;;  %v3220_v62 = vld [vmem:[#allocation4 + $0x1cc] ss:$16 sps:$4 sm:$0xff]  }
 0x11b   :  { %v1212_v16 = vpack.i.b16 %v1189_v9, %v1189_v9  ;;  %v3298_v9 = vld [vmem:[#allocation4 + $0x34c] ss:$16 sps:$4 sm:$0xff]  }
 0x11d   :  { %2021 = vmatpush2.bf16.msra.mxu0 %v3152_v63  ;;  %2062 = vmatpush2.bf16.msra.mxu1 %v3239_v12  ;;  %v3218_v63 = vld [vmem:[#allocation4 + $0x1c8] ss:$16 sps:$4 sm:$0xff]   ;;  %v3250_v12 = vld [vmem:[#allocation4 + $0x12c] ss:$16 sps:$4 sm:$0xff]   ;;  %v1217_v25 = vrot.slane %v1212_v16, %v3460_v27 }
 0x11e   :  { %2022 = vmatprep.subr.bf16.mxu0 %v3157_v3  ;;  %2063 = vmatprep.subr.bf16.mxu1 %v3247_v17  ;;  %v3232_v3 = vld [vmem:[#allocation4 + $0x18c] ss:$16 sps:$4 sm:$0xff]  }
 0x11f   :  { %v3304_v16 = vld [vmem:[#allocation4 + $0x30c] ss:$16 sps:$4 sm:$0xff]  }
 0x121   :  { %2023 = vmatpush2.bf16.msra.mxu0 %v3155_v4  ;;  %2064 = vmatpush2.bf16.msra.mxu1 %v3245_v18  ;;  %v3230_v4 = vld [vmem:[#allocation4 + $0x188] ss:$16 sps:$4 sm:$0xff]  }
 0x122   :  { %2024 = vmatprep.subr.bf16.mxu0 %v3160_v7  ;;  %2065 = vmatprep.subr.bf16.mxu1 %v3253_v19  ;;  %v1188_v7 = vcombine.high %v3490_v24, %v3490_v24  ;;  %v3256_v24 = vld [vmem:[#allocation4 + $0x10c] ss:$16 sps:$4 sm:$0xff]  }
 0x125   :  { %2025 = vmatpush2.bf16.msra.mxu0 %v3158_v8  ;;  %2066 = vmatpush2.bf16.msra.mxu1 %v3251_v20  ;;  %v3244_v8 = vld [vmem:[#allocation4 + $0x14c] ss:$16 sps:$4 sm:$0xff]   ;;  %v3248_v20 = vld [vmem:[#allocation4 + $0x128] ss:$16 sps:$4 sm:$0xff]  }
 0x126   :  { %2076 = vmatprep.subr.bf16.mxu0 %v3166_v11  ;;  %2117 = vmatprep.subr.bf16.mxu1 %v3259_v21  ;;  %v1205_v11 = vpack.i.b16 %v1188_v7, %v1188_v7  ;;  %v3295_v7 = vld [vmem:[#allocation4 + $0x36c] ss:$16 sps:$4 sm:$0xff]  }
 0x128   :  { %v1210_v21 = vrot.slane %v1205_v11, %v3460_v27  ;;  %v3301_v11 = vld [vmem:[#allocation4 + $0x32c] ss:$16 sps:$4 sm:$0xff]  }
 0x168   :  { %v1030_v13 = vpop.f32.mrf.mxu0  ;;  %v1071_v29 = vpop.f32.mrf.mxu1 }
 0x169   :  { %v1072_v15 = vadd.f32 %v1071_v29, %v1030_v13 }
 0x16a   :  { %v1032_v31 = vpop.f32.mrf.mxu0  ;;  %v1073_v32 = vpop.f32.mrf.mxu1 }
 0x16b   :  { %v1160_v33 = vpack.c.bf16 %v1072_v15, %v1072_v15  ;;  %v1074_v34 = vadd.f32 %v1073_v32, %v1032_v31 }
 0x16c   :  { %v1034_v36 = vpop.f32.mrf.mxu0  ;;  %v1075_v37 = vpop.f32.mrf.mxu1 }
 0x16d   :  { %v1161_v38 = vpack.c.bf16 %v1074_v34, %v1074_v34  ;;  %v1218_v39 = vadd.bf16 %v1196_v30, %v1160_v33  ;;  %v3254_v30 = vld [vmem:[#allocation4 + $0x108] ss:$16 sps:$4 sm:$0xff]  }
 0x16e   :  { %v1035_v40 = vpop.f32.mrf.mxu0  ;;  %v1076_v41 = vpop.f32.mrf.mxu1  ;;  %v3257_v36 = vld [vmem:[#allocation4 + $0x2e8] ss:$16 sps:$4 sm:$0xff]  }
 0x16f   :  { %v1219_v42 = vadd.bf16 %v1203_v35, %v1161_v38  ;;  %v3503_v45 = vmax.bf16 %v3385_v0, %v1218_v39  ;;  %v3262_v38 = vld [vmem:[#allocation4 + $0x2cc] ss:$16 sps:$4 sm:$0xff]   ;;  %v3260_v39 = vld [vmem:[#allocation4 + $0x2c8] ss:$16 sps:$4 sm:$0xff]  }
 0x170   :  { %v3265_v40 = vld [vmem:[#allocation4 + $0x2ac] ss:$16 sps:$4 sm:$0xff]   ;;  %v3263_v41 = vld [vmem:[#allocation4 + $0x2a8] ss:$16 sps:$4 sm:$0xff]  }
 0x171   :  { %v1223_v43 = vmax.bf16 %v3385_v0, %v1219_v42  ;;  %v3268_v42 = vld [vmem:[#allocation4 + $0x28c] ss:$16 sps:$4 sm:$0xff]  }
 0x173   :  { %2026 = vmatprep.mubr.bf16.mxu0 %v1223_v43 }
 0x174   :  { %2027 = vmatmul.mubr.bf16.vlgmr.msra.gmra.mxu0 %v3503_v45 }
 0x175   :  { %2077 = vmatpush1.bf16.msra.mxu0 %v3164_v44  ;;  %2108 = vmatprep.mubr.bf16.mxu0 %v1223_v43  ;;  %v3305_v43 = vld [vmem:[%s3641_s7 + $0x78] sm:$0xff]  }
 0x176   :  { %2078 = vmatprep.subr.bf16.mxu0 %v3172_v46  ;;  %v3306_v44 = vld [vmem:[%s3641_s7 + $0x38] sm:$0xff]  }
 0x177   :  { %v3266_v46 = vld [vmem:[#allocation4 + $0x288] ss:$16 sps:$4 sm:$0xff]  }
 0x179   :  { %2079 = vmatpush1.bf16.msra.mxu0 %v3170_v47  ;;  %v3308_v47 = vld [vmem:[%s3641_s7 + $0x30] sm:$0xff]  }
 0x17a   :  { %2080 = vmatprep.subr.bf16.mxu0 %v3178_v48  ;;  %v3271_v48 = vld [vmem:[#allocation4 + $0x26c] ss:$16 sps:$4 sm:$0xff]  }
 0x17d   :  { %2081 = vmatpush1.bf16.msra.mxu0 %v3176_v49  ;;  %v3309_v49 = vld [vmem:[%s3641_s7 + $0x68] sm:$0xff]  }
 0x17e   :  { %2082 = vmatprep.subr.bf16.mxu0 %v3184_v50  ;;  %v3269_v50 = vld [vmem:[#allocation4 + $0x268] ss:$16 sps:$4 sm:$0xff]  }
 0x181   :  { %2083 = vmatpush1.bf16.msra.mxu0 %v3182_v51  ;;  %v3310_v51 = vld [vmem:[%s3641_s7 + $0x28] sm:$0xff]  }
 0x182   :  { %2084 = vmatprep.subr.bf16.mxu0 %v3190_v52  ;;  %v3274_v52 = vld [vmem:[#allocation4 + $0x24c] ss:$16 sps:$4 sm:$0xff]  }
 0x185   :  { %2085 = vmatpush1.bf16.msra.mxu0 %v3188_v53  ;;  %v3311_v53 = vld [vmem:[%s3641_s7 + $0x60] sm:$0xff]  }
 0x186   :  { %2086 = vmatprep.subr.bf16.mxu0 %v3196_v54  ;;  %v3272_v54 = vld [vmem:[#allocation4 + $0x248] ss:$16 sps:$4 sm:$0xff]  }
 0x189   :  { %2087 = vmatpush1.bf16.msra.mxu0 %v3194_v55  ;;  %v3312_v55 = vld [vmem:[%s3641_s7 + $0x20] sm:$0xff]  }
 0x18a   :  { %2088 = vmatprep.subr.bf16.mxu0 %v3202_v56  ;;  %v3277_v56 = vld [vmem:[#allocation4 + $0x22c] ss:$16 sps:$4 sm:$0xff]  }
 0x18d   :  { %2089 = vmatpush1.bf16.msra.mxu0 %v3200_v57  ;;  %v3313_v57 = vld [vmem:[%s3641_s7 + $0x58] sm:$0xff]  }
 0x18e   :  { %2090 = vmatprep.subr.bf16.mxu0 %v3208_v58  ;;  %v3275_v58 = vld [vmem:[#allocation4 + $0x228] ss:$16 sps:$4 sm:$0xff]  }
 0x191   :  { %2091 = vmatpush1.bf16.msra.mxu0 %v3206_v59  ;;  %v3314_v59 = vld [vmem:[%s3641_s7 + $0x18] sm:$0xff]  }
 0x192   :  { %2092 = vmatprep.subr.bf16.mxu0 %v3214_v60  ;;  %v3280_v60 = vld [vmem:[#allocation4 + $0x20c] ss:$16 sps:$4 sm:$0xff]  }
 0x195   :  { %2093 = vmatpush2.bf16.msra.mxu0 %v3212_v61  ;;  %v3278_v61 = vld [vmem:[#allocation4 + $0x208] ss:$16 sps:$4 sm:$0xff]  }
 0x196   :  { %2094 = vmatprep.subr.bf16.mxu0 %v3220_v62  ;;  %v3283_v62 = vld [vmem:[#allocation4 + $0x3ec] ss:$16 sps:$4 sm:$0xff]  }
 0x199   :  { %2095 = vmatpush2.bf16.msra.mxu0 %v3218_v63  ;;  %v3281_v63 = vld [vmem:[#allocation4 + $0x3e8] ss:$16 sps:$4 sm:$0xff]  }
 0x19a   :  { %2096 = vmatprep.subr.bf16.mxu0 %v3226_v1  ;;  %v3286_v1 = vld [vmem:[#allocation4 + $0x3cc] ss:$16 sps:$4 sm:$0xff]  }
 0x19d   :  { %2097 = vmatpush2.bf16.msra.mxu0 %v3224_v2  ;;  %v3284_v2 = vld [vmem:[#allocation4 + $0x3c8] ss:$16 sps:$4 sm:$0xff]  }
 0x19e   :  { %2098 = vmatprep.subr.bf16.mxu0 %v3232_v3  ;;  %v3289_v3 = vld [vmem:[#allocation4 + $0x3ac] ss:$16 sps:$4 sm:$0xff]  }
 0x1a1   :  { %2099 = vmatpush2.bf16.msra.mxu0 %v3230_v4  ;;  %v3287_v4 = vld [vmem:[#allocation4 + $0x3a8] ss:$16 sps:$4 sm:$0xff]  }
 0x1a2   :  { %2100 = vmatprep.subr.bf16.mxu0 %v3238_v5  ;;  %v3292_v5 = vld [vmem:[#allocation4 + $0x38c] ss:$16 sps:$4 sm:$0xff]  }
 0x1a5   :  { %2101 = vmatpush2.bf16.msra.mxu0 %v3236_v6  ;;  %v3290_v6 = vld [vmem:[#allocation4 + $0x388] ss:$16 sps:$4 sm:$0xff]  }
 0x1a6   :  { %2102 = vmatprep.subr.bf16.mxu0 %v3244_v8  ;;  %v3293_v8 = vld [vmem:[#allocation4 + $0x368] ss:$16 sps:$4 sm:$0xff]  }
 0x1a8   :  { %v1112_v17 = vpop.f32.mrf.mxu0  ;;  %v1153_v18 = vpop.f32.mrf.mxu1 }
 0x1a9   :  { %v1154_v19 = vadd.f32 %v1153_v18, %v1112_v17  ;;  %2103 = vmatpush2.bf16.msra.mxu0 %v3242_v10  ;;  %v3296_v10 = vld [vmem:[#allocation4 + $0x348] ss:$16 sps:$4 sm:$0xff]   ;;  %v3315_v18 = vld [vmem:[%s3641_s7 + $0x50] sm:$0xff]  }
 0x1aa   :  { %v1114_v22 = vpop.f32.mrf.mxu0  ;;  %v1155_v23 = vpop.f32.mrf.mxu1  ;;  %2104 = vmatprep.subr.bf16.mxu0 %v3250_v12  ;;  %v3299_v12 = vld [vmem:[#allocation4 + $0x328] ss:$16 sps:$4 sm:$0xff]  }
 0x1ab   :  { %v1162_v26 = vpack.c.bf16 %v1154_v19, %v1154_v19  ;;  %v1156_v28 = vadd.f32 %v1155_v23, %v1114_v22  ;;  %v3302_v17 = vld [vmem:[#allocation4 + $0x308] ss:$16 sps:$4 sm:$0xff]   ;;  %v3316_v19 = vld [vmem:[%s3641_s7 + $0x10] sm:$0xff]   ;;  %v3319_v22 = vld [vmem:[%s3641_s7 + $0x40] sm:$0xff]  }
 0x1ac   :  { %v1116_v13 = vpop.f32.mrf.mxu0  ;;  %v1157_v29 = vpop.f32.mrf.mxu1  ;;  %v3320_v23 = vld [vmem:[%s3641_s7] sm:$0xff]  }
 0x1ad   :  { %v1163_v15 = vpack.c.bf16 %v1156_v28, %v1156_v28  ;;  %2105 = vmatpush2.bf16.msra.mxu0 %v3248_v20  ;;  %v1220_v31 = vadd.bf16 %v1210_v21, %v1162_v26  ;;  %v3317_v20 = vld [vmem:[%s3641_s7 + $0x48] sm:$0xff]   ;;  %v3322_v26 = vld [vmem:[%s3641_s7 + $0xb8] sm:$0xff]   ;;  %v3323_v28 = vld [vmem:[%s3641_s7 + $0xf0] sm:$0xff]  }
 0x1ae   :  { %v1117_v32 = vpop.f32.mrf.mxu0  ;;  %v1158_v33 = vpop.f32.mrf.mxu1  ;;  %2106 = vmatprep.subr.bf16.mxu0 %v3256_v24  ;;  %v3318_v21 = vld [vmem:[%s3641_s7 + $0x8] sm:$0xff]   ;;  %v3321_v24 = vld [vmem:[%s3641_s7 + $0xf8] sm:$0xff]  }
 0x1af   :  { %v1221_v34 = vadd.bf16 %v1217_v25, %v1163_v15  ;;  %v3514_v37 = vmax.bf16 %v3385_v0, %v1220_v31  ;;  %v3324_v25 = vld [vmem:[%s3641_s7 + $0xb0] sm:$0xff]   ;;  %v3325_v13 = vld [vmem:[%s3641_s7 + $0xe8] sm:$0xff]   ;;  %v3327_v15 = vld [vmem:[%s3641_s7 + $0xe0] sm:$0xff]  }
 0x1b0   :  { %v3326_v29 = vld [vmem:[%s3641_s7 + $0xa8] sm:$0xff]   ;;  %v3329_v31 = vld [vmem:[%s3641_s7 + $0xd8] sm:$0xff]   ;;  %v3331_v33 = vld [vmem:[%s3641_s7 + $0xd0] sm:$0xff]  }
 0x1b1   :  { %2107 = vmatpush2.bf16.msra.mxu0 %v3254_v30  ;;  %v1225_v35 = vmax.bf16 %v3385_v0, %v1221_v34  ;;  %v3328_v30 = vld [vmem:[%s3641_s7 + $0xa0] sm:$0xff]   ;;  %v3330_v32 = vld [vmem:[%s3641_s7 + $0x98] sm:$0xff]   ;;  %v3332_v34 = vld [vmem:[%s3641_s7 + $0x90] sm:$0xff]  }
 0x1b2   :  { %2868 = vmatprep.subr.bf16.mxu0 %v3305_v43  ;;  %v2834_v43 = vld.sshfl [vmem:[%s3640_s6] sm:$0x33 pattern:$0x75316420] }
 0x1b3   :  { %2067 = vmatprep.mubr.bf16.mxu1 %v1225_v35 }
 0x1b4   :  { %2068 = vmatmul.mubr.bf16.vlgmr.msra.gmra.mxu1 %v3514_v37  ;;  %2109 = vmatmul.mubr.bf16.vlgmr.msra.gmra.mxu0 %v3503_v45  ;;  %v3307_v45 = vld [vmem:[%s3641_s7 + $0x70] sm:$0xff]  }
 0x1b5   :  { %2118 = vmatpush1.bf16.msra.mxu1 %v3257_v36  ;;  %2149 = vmatprep.mubr.bf16.mxu1 %v1225_v35 }
 0x1b6   :  { %2119 = vmatprep.subr.bf16.mxu1 %v3262_v38  ;;  %2869 = vmatpush3.bf16.msra.mxu0 %v3306_v44  ;;  %v3334_v38 = vld [vmem:[%s3641_s7 + $0x88] sm:$0xff]   ;;  %v2171_v44 = vcombine.high %v2834_v43, %v2834_v43 }
 0x1b7   :  { %2870 = vmatprep.subr.bf16.mxu0 %v3307_v45  ;;  %v2178_v45 = vrot.slane %v2834_v43, %v3451_v14 }
 0x1b9   :  { %2120 = vmatpush1.bf16.msra.mxu1 %v3260_v39 }
 0x1ba   :  { %2121 = vmatprep.subr.bf16.mxu1 %v3265_v40  ;;  %2871 = vmatpush3.bf16.msra.mxu0 %v3308_v47  ;;  %v2189_v47 = vpack.i.b16 %v2178_v45, %v2178_v45 }
 0x1bb   :  { %2872 = vmatprep.subr.bf16.mxu0 %v3309_v49 }
 0x1bd   :  { %2122 = vmatpush1.bf16.msra.mxu1 %v3263_v41  ;;  %v3335_v41 = vld [vmem:[%s3641_s7 + $0xc0] sm:$0xff]  }
 0x1be   :  { %2123 = vmatprep.subr.bf16.mxu1 %v3268_v42  ;;  %2873 = vmatpush3.bf16.msra.mxu0 %v3310_v51  ;;  %v3336_v42 = vld [vmem:[%s3641_s7 + $0x80] sm:$0xff]  }
 0x1bf   :  { %2874 = vmatprep.subr.bf16.mxu0 %v3311_v53 }
 0x1c1   :  { %2124 = vmatpush1.bf16.msra.mxu1 %v3266_v46  ;;  %v2185_v46 = vrot.slane %v2171_v44, %v3451_v14 }
 0x1c2   :  { %2125 = vmatprep.subr.bf16.mxu1 %v3271_v48  ;;  %2875 = vmatpush3.bf16.msra.mxu0 %v3312_v55 }
 0x1c3   :  { %2876 = vmatprep.subr.bf16.mxu0 %v3313_v57  ;;  %v2196_v48 = vpack.i.b16 %v2185_v46, %v2185_v46 }
 0x1c5   :  { %2126 = vmatpush1.bf16.msra.mxu1 %v3269_v50  ;;  %v2201_v57 = vrot.slane %v2196_v48, %v3460_v27 }
 0x1c6   :  { %2127 = vmatprep.subr.bf16.mxu1 %v3274_v52  ;;  %2877 = vmatpush3.bf16.msra.mxu0 %v3314_v59  ;;  %v2194_v52 = vrot.slane %v2189_v47, %v3460_v27 }
 0x1c7   :  { %2878 = vmatprep.subr.bf16.mxu0 %v3315_v18 }
 0x1c9   :  { %2128 = vmatpush1.bf16.msra.mxu1 %v3272_v54 }
 0x1ca   :  { %2129 = vmatprep.subr.bf16.mxu1 %v3277_v56  ;;  %2879 = vmatpush3.bf16.msra.mxu0 %v3316_v19 }
 0x1cb   :  { %2880 = vmatprep.subr.bf16.mxu0 %v3317_v20 }
 0x1cd   :  { %2130 = vmatpush1.bf16.msra.mxu1 %v3275_v58 }
 0x1ce   :  { %2131 = vmatprep.subr.bf16.mxu1 %v3280_v60  ;;  %2881 = vmatpush3.bf16.msra.mxu0 %v3318_v21 }
 0x1cf   :  { %2882 = vmatprep.subr.bf16.mxu0 %v3319_v22 }
 0x1d1   :  { %2132 = vmatpush1.bf16.msra.mxu1 %v3278_v61 }
 0x1d2   :  { %2133 = vmatprep.subr.bf16.mxu1 %v3283_v62  ;;  %2883 = vmatpush3.bf16.msra.mxu0 %v3320_v23 }
 0x1d5   :  { %2134 = vmatpush2.bf16.msra.mxu1 %v3281_v63 }
 0x1d6   :  { %2135 = vmatprep.subr.bf16.mxu1 %v3286_v1 }
 0x1d9   :  { %2136 = vmatpush2.bf16.msra.mxu1 %v3284_v2 }
 0x1da   :  { %2137 = vmatprep.subr.bf16.mxu1 %v3289_v3  ;;  %v2186_v3 = vcombine.high %v2178_v45, %v2178_v45 }
 0x1dd   :  { %2138 = vmatpush2.bf16.msra.mxu1 %v3287_v4  ;;  %v2187_v4 = vcombine.high %v2185_v46, %v2185_v46 }
 0x1de   :  { %2139 = vmatprep.subr.bf16.mxu1 %v3292_v5  ;;  %v2203_v5 = vpack.i.b16 %v2186_v3, %v2186_v3 }
 0x1e1   :  { %2140 = vmatpush2.bf16.msra.mxu1 %v3290_v6  ;;  %v2210_v6 = vpack.i.b16 %v2187_v4, %v2187_v4 }
 0x1e2   :  { %2141 = vmatprep.subr.bf16.mxu1 %v3295_v7 }
 0x1e5   :  { %2142 = vmatpush2.bf16.msra.mxu1 %v3293_v8 }
 0x1e6   :  { %2143 = vmatprep.subr.bf16.mxu1 %v3298_v9  ;;  %v2208_v9 = vrot.slane %v2203_v5, %v3460_v27 }
 0x1e9   :  { %2144 = vmatpush2.bf16.msra.mxu1 %v3296_v10 }
 0x1ea   :  { %2145 = vmatprep.subr.bf16.mxu1 %v3301_v11 }
 0x1ed   :  { %2146 = vmatpush2.bf16.msra.mxu1 %v3299_v12 }
 0x1ee   :  { %2147 = vmatprep.subr.bf16.mxu1 %v3304_v16  ;;  %v2215_v16 = vrot.slane %v2210_v6, %v3460_v27  ;;  %v2835_v27 = vld [vmem:[%s3642_s8] ss:$0 sm:$0xff] }
 0x1f1   :  { %2148 = vmatpush2.bf16.msra.mxu1 %v3302_v17 }
 0x1f2   :  { %2890 = vmatprep.subr.bf16.mxu1 %v3321_v24 }
 0x1f4   :  { %2150 = vmatmul.mubr.bf16.vlgmr.msra.gmra.mxu1 %v3514_v37  ;;  %v3333_v37 = vld [vmem:[%s3641_s7 + $0xc8] sm:$0xff]  }
 0x1f5   :  { %2891 = vmatpush3.bf16.msra.mxu1 %v3322_v26 }
 0x1f6   :  { %2892 = vmatprep.subr.bf16.mxu1 %v3323_v28 }
 0x1f9   :  { %2893 = vmatpush3.bf16.msra.mxu1 %v3324_v25 }
 0x1fa   :  { %2894 = vmatprep.subr.bf16.mxu1 %v3325_v13 }
 0x1fd   :  { %2895 = vmatpush3.bf16.msra.mxu1 %v3326_v29 }
 0x1fe   :  { %2896 = vmatprep.subr.bf16.mxu1 %v3327_v15 }
 0x201   :  { %2897 = vmatpush3.bf16.msra.mxu1 %v3328_v30 }
 0x202   :  { %2898 = vmatprep.subr.bf16.mxu1 %v3329_v31 }
 0x205   :  { %2899 = vmatpush3.bf16.msra.mxu1 %v3330_v32 }
 0x206   :  { %2900 = vmatprep.subr.bf16.mxu1 %v3331_v33 }
 0x209   :  { %2901 = vmatpush3.bf16.msra.mxu1 %v3332_v34 }
 0x20a   :  { %2902 = vmatprep.subr.bf16.mxu1 %v3333_v37 }
 0x20d   :  { %2903 = vmatpush3.bf16.msra.mxu1 %v3334_v38 }
 0x20e   :  { %2904 = vmatprep.subr.bf16.mxu1 %v3335_v41 }
 0x211   :  { %2905 = vmatpush3.bf16.msra.mxu1 %v3336_v42 }
 0x234   :  { %v2028_v35 = vpop.f32.mrf.mxu0 }
 0x236   :  { %v2030_v36 = vpop.f32.mrf.mxu0 }
 0x238   :  { %v2032_v39 = vpop.f32.mrf.mxu0 }
 0x23a   :  { %v2033_v40 = vpop.f32.mrf.mxu0 }
 0x274   :  { %v2069_v49 = vpop.f32.mrf.mxu1  ;;  %v2110_v50 = vpop.f32.mrf.mxu0 }
 0x275   :  { %v2070_v51 = vadd.f32 %v2069_v49, %v2028_v35 }
 0x276   :  { %v2071_v53 = vpop.f32.mrf.mxu1  ;;  %v2112_v54 = vpop.f32.mrf.mxu0 }
 0x277   :  { %v2158_v55 = vpack.c.bf16 %v2070_v51, %v2070_v51  ;;  %v2072_v56 = vadd.f32 %v2071_v53, %v2030_v36 }
 0x278   :  { %v2073_v58 = vpop.f32.mrf.mxu1  ;;  %v2114_v59 = vpop.f32.mrf.mxu0 }
 0x279   :  { %v2159_v60 = vpack.c.bf16 %v2072_v56, %v2072_v56  ;;  %v2216_v61 = vadd.bf16 %v2194_v52, %v2158_v55 }
 0x27a   :  { %v2074_v62 = vpop.f32.mrf.mxu1  ;;  %v2115_v63 = vpop.f32.mrf.mxu0 }
 0x27b   :  { %v2217_v14 = vadd.bf16 %v2201_v57, %v2159_v60  ;;  %v2220_v2 = vmax.bf16 %v3385_v0, %v2216_v61 }
 0x27d   :  { %v2221_v1 = vmax.bf16 %v3385_v0, %v2217_v14 }
 0x27f   :  { %2519 = vmatprep.mubr.bf16.mxu0 %v2221_v1 }
 0x280   :  { %2520 = vmatmul.mubr.bf16.vlgmr.msra.gmra.mxu0 %v2220_v2 }
 0x2b4   :  { %v2151_v7 = vpop.f32.mrf.mxu1 }
 0x2b5   :  { %v2152_v8 = vadd.f32 %v2151_v7, %v2110_v50 }
 0x2b6   :  { %v2153_v10 = vpop.f32.mrf.mxu1 }
 0x2b7   :  { %v2160_v11 = vpack.c.bf16 %v2152_v8, %v2152_v8  ;;  %v2154_v12 = vadd.f32 %v2153_v10, %v2112_v54 }
 0x2b8   :  { %v2155_v17 = vpop.f32.mrf.mxu1 }
 0x2b9   :  { %v2161_v18 = vpack.c.bf16 %v2154_v12, %v2154_v12  ;;  %v2218_v19 = vadd.bf16 %v2208_v9, %v2160_v11 }
 0x2ba   :  { %v2156_v20 = vpop.f32.mrf.mxu1 }
 0x2bb   :  { %v2219_v21 = vadd.bf16 %v2215_v16, %v2161_v18  ;;  %v2222_v23 = vmax.bf16 %v3385_v0, %v2218_v19 }
 0x2bd   :  { %v2223_v22 = vmax.bf16 %v3385_v0, %v2219_v21 }
 0x2bf   :  { %2559 = vmatprep.mubr.bf16.mxu1 %v2223_v22 }
 0x2c0   :  { %2560 = vmatmul.mubr.bf16.vlgmr.msra.gmra.mxu1 %v2222_v23 }
 0x340   :  { %v2884_v24 = vpop.f32.mrf.mxu0 }
 0x342   :  { %v2885_v26 = vpop.f32.mrf.mxu0 }
 0x343   :  { %v2886_v13 = vadd.f32 %v2885_v26, %v2884_v24 }
 0x344   :  { %v2887_v28 = vpop.f32.mrf.mxu0 }
 0x345   :  { %v2522_v30 = vadd.f32 %v2886_v13, %v2835_v27 }
 0x346   :  { %v2888_v25 = vpop.f32.mrf.mxu0 }
 0x380   :  { %v2906_v29 = vpop.f32.mrf.mxu1 }
 0x382   :  { %v2907_v15 = vpop.f32.mrf.mxu1 }
 0x383   :  { %v2908_v31 = vadd.f32 %v2907_v15, %v2906_v29 }
 0x384   :  { %v2909_v32 = vpop.f32.mrf.mxu1 }
 0x385   :  { %v2562_v33 = vadd.f32 %v2908_v31, %v2522_v30 }
 0x386   :  { %v2910_v34 = vpop.f32.mrf.mxu1 }
 0x387   :  { %2568 = vst.msk [vmem:[%s3643_s9] sm:$0xff] %vm2567_vm0, %v2562_v33 }
 0x388   :  { %2573 = vsyncpa [#allocation3], 1 }
 0x389   :  { %2574 = vsyncpa [#allocation5], 1 }

// kernel: tpu_custom_call.1
= control target key start
LH: loop header
LB: loop body
LE: loop exit
PB: predicated region body
PF: predicated region fallthrough
CT: control target
= control target key end

     0   :  { %14 = vsyncpa [#allocation3], 0  ;;  %s3634_s0 = inlined_call_operand.vmem [shape: f32[8,2], index: 0, kind: input, shape index: {}]   ;;  %s3635_s1 = inlined_call_operand.vmem [shape: bf16[2,512], index: 1, kind: input, shape index: {}]   ;;  %s3636_s2 = inlined_call_operand.vmem [shape: bf16[1,512], index: 2, kind: input, shape index: {}]   ;;  %s3637_s3 = inlined_call_operand.hbm [shape: bf16[512,512], index: 3, kind: input, shape index: {}]   ;;  %s3638_s4 = inlined_call_operand.vmem [shape: bf16[1,512], index: 4, kind: input, shape index: {}]   ;;  %s3639_s5 = inlined_call_operand.hbm [shape: bf16[512,512], index: 5, kind: input, shape index: {}]   ;;  %s3640_s6 = inlined_call_operand.vmem [shape: bf16[1,512], index: 6, kind: input, shape index: {}]   ;;  %s3641_s7 = inlined_call_operand.vmem [shape: bf16[512,2], index: 7, kind: input, shape index: {}]   ;;  %s3642_s8 = inlined_call_operand.vmem [shape: f32[1,2], index: 8, kind: input, shape index: {}]   ;;  %s3643_s9 = inlined_call_operand.vmem [shape: f32[8,2], index: 9, kind: output, shape index: {}]  }
   0x1   :  { %15 = vsyncpa [#allocation5], 0  ;;  %s3381_s30 = smov [#allocation2]  }
   0x2   :  { %s27_s10 = sshll.u32 %s3381_s30, 4  ;;  %s28_s10 = int_to_ptr.vmem [resolvable:$true] %s27_s10 }
   0x3   :  { %s3345_s11 = scalar_lea.vmem %s28_s10, 16384  ;;  %p3350_p1 = scmp.lt.s32.totalorder %s28_s10, %s28_s10 }
   0x4   :  { %p3346_p0 = scmp.ne.s32.totalorder %s28_s10, %s3345_s11  ;;  %p3351_p2 = scmp.lt.s32.totalorder %s3345_s11, %s3345_s11 }
   0x6   :  { %p3352_p3 = por %p3351_p2, %p3350_p1 }
   0x8   :  { %p3353_p4 = pnand %p3352_p3, %p3346_p0 }
   0xa   :  { %3356 = shalt.err (!%p3353_p4)
}
   0xb   :  { %s3382_s12 = smov 256   ;;  %s3383_s13 = smov 16  }
   0xc   :  { %33 = dma.hbm_to_vmem [thread:$0]  %s3637_s3, 16384, %s28_s10, [#allocation3], %s3382_s12, %s3382_s12, %s3383_s13  }
   0xd   :  { %s3384_s16 = smov [#allocation4]  }
   0xe   :  { %s41_s17 = sshll.u32 %s3384_s16, 4  ;;  %s42_s17 = int_to_ptr.vmem [resolvable:$true] %s41_s17 }
   0xf   :  { %s3365_s18 = scalar_lea.vmem %s42_s17, 16384  ;;  %p3370_p6 = scmp.lt.s32.totalorder %s42_s17, %s42_s17 }
  0x10   :  { %p3366_p5 = scmp.ne.s32.totalorder %s42_s17, %s3365_s18  ;;  %p3371_p7 = scmp.lt.s32.totalorder %s3365_s18, %s3365_s18 }
  0x12   :  { %p3372_p8 = por %p3371_p7, %p3370_p6 }
  0x14   :  { %p3373_p9 = pnand %p3372_p8, %p3366_p5 }
  0x16   :  { %3376 = shalt.err (!%p3373_p9)
}
  0x17   :  { %47 = dma.hbm_to_vmem [thread:$0]  %s3639_s5, 16384, %s42_s17, [#allocation5], %s3382_s12, %s3382_s12, %s3383_s13  }
  0x18   :  { %3377 = dma.done.wait [#allocation3], 16384  }
  0x19   :  { %3378 = vsyncadd [#allocation3], 4294950912 }
  0x1a   :  { %3379 = dma.done.wait [#allocation5], 16384  }
  0x1b   :  { %3380 = vsyncadd [#allocation5], 4294950912  ;;  %v3385_v0 = vmov 0   ;;  %v61_v1 = vld [vmem:[%s3634_s0] sm:$0xff]  ;;  %v3386_v12 = vmov 1   ;;  %vm2567_vm0 = vcmask 15360  }
  0x1c   :  { %2919 = vset.pattern.permute.xlu0 %v3385_v0  ;;  %v62_v2 = vpack.c.bf16 %v61_v1, %v61_v1  ;;  %v2921_v3 = vld [vmem:[#allocation2 + $0xe4] ss:$16 sps:$4 sm:$0xff]   ;;  %v2925_v5 = vld [vmem:[#allocation2 + $0xe0] ss:$16 sps:$4 sm:$0xff]  }
  0x1d   :  { %v2923_v4 = vld [vmem:[#allocation2 + $0x2e4] ss:$16 sps:$4 sm:$0xff]   ;;  %v2926_v6 = vld [vmem:[#allocation2 + $0x2e0] ss:$16 sps:$4 sm:$0xff]   ;;  %996 = vmatprep.subr.bf16.mxu0 %v2921_v3 }
  0x1e   :  { %66 = vperm.xlu0 %2919, %v62_v2   ;;  %v2927_v7 = vld [vmem:[#allocation2 + $0xc4] ss:$16 sps:$4 sm:$0xff]   ;;  %1037 = vmatprep.subr.bf16.mxu1 %v2923_v4  ;;  %v2931_v9 = vld [vmem:[#allocation2 + $0xc0] ss:$16 sps:$4 sm:$0xff]  }
  0x1f   :  { %997 = vmatpush1.bf16.msra.mxu0 %v2925_v5  ;;  %v2929_v8 = vld [vmem:[#allocation2 + $0x2c4] ss:$16 sps:$4 sm:$0xff]   ;;  %1038 = vmatpush1.bf16.msra.mxu1 %v2926_v6  ;;  %v2932_v10 = vld [vmem:[#allocation2 + $0x2c0] ss:$16 sps:$4 sm:$0xff]   ;;  %v3019_v5 = vld [vmem:[#allocation2 + $0xec] ss:$16 sps:$4 sm:$0xff]  }
  0x20   :  { %998 = vmatprep.subr.bf16.mxu0 %v2927_v7  ;;  %1039 = vmatprep.subr.bf16.mxu1 %v2929_v8  ;;  %v2933_v11 = vld [vmem:[#allocation2 + $0xa4] ss:$16 sps:$4 sm:$0xff]   ;;  %v2937_v14 = vld [vmem:[#allocation2 + $0xa0] ss:$16 sps:$4 sm:$0xff]   ;;  %v3022_v6 = vld [vmem:[#allocation2 + $0x2ec] ss:$16 sps:$4 sm:$0xff]  }
  0x21   :  { %v2935_v13 = vld [vmem:[#allocation2 + $0x2a4] ss:$16 sps:$4 sm:$0xff]   ;;  %v2938_v15 = vld [vmem:[#allocation2 + $0x2a0] ss:$16 sps:$4 sm:$0xff]   ;;  %v3387_v7 = vmov 1966171168  }
  0x22   :  { %2920 = vset.pattern.permute.xlu0 %v3386_v12  ;;  %v2939_v16 = vld [vmem:[#allocation2 + $0x84] ss:$16 sps:$4 sm:$0xff]   ;;  %v2943_v18 = vld [vmem:[#allocation2 + $0x80] ss:$16 sps:$4 sm:$0xff]   ;;  %v79_v8 = vunpack.c.l.s4 %v3387_v7  ;;  %v3017_v7 = vld [vmem:[#allocation2 + $0xe8] ss:$16 sps:$4 sm:$0xff]  }
  0x23   :  { %127 = vperm.xlu0 %2920, %v62_v2   ;;  %999 = vmatpush1.bf16.msra.mxu0 %v2931_v9  ;;  %v2941_v17 = vld [vmem:[#allocation2 + $0x284] ss:$16 sps:$4 sm:$0xff]   ;;  %v2944_v19 = vld [vmem:[#allocation2 + $0x280] ss:$16 sps:$4 sm:$0xff]   ;;  %v81_v9 = vlaneseq }
  0x24   :  { %1040 = vmatpush1.bf16.msra.mxu1 %v2932_v10  ;;  %1000 = vmatprep.subr.bf16.mxu0 %v2933_v11  ;;  %v2945_v20 = vld [vmem:[#allocation2 + $0x64] ss:$16 sps:$4 sm:$0xff]   ;;  %v2949_v22 = vld [vmem:[#allocation2 + $0x60] ss:$16 sps:$4 sm:$0xff]   ;;  %v80_v11 = vunpack.c.0.s8 %v79_v8  ;;  %v3020_v8 = vld [vmem:[#allocation2 + $0x2e8] ss:$16 sps:$4 sm:$0xff]  }
  0x25   :  { %1041 = vmatprep.subr.bf16.mxu1 %v2935_v13  ;;  %v2947_v21 = vld [vmem:[#allocation2 + $0x264] ss:$16 sps:$4 sm:$0xff]   ;;  %v2950_v23 = vld [vmem:[#allocation2 + $0x260] ss:$16 sps:$4 sm:$0xff]   ;;  %v82_v12 = vshrl.u32 %v81_v9, 7 }
  0x26   :  { %v2951_v24 = vld [vmem:[#allocation2 + $0x44] ss:$16 sps:$4 sm:$0xff]   ;;  %v2955_v26 = vld [vmem:[#allocation2 + $0x40] ss:$16 sps:$4 sm:$0xff]  }
  0x27   :  { %1001 = vmatpush1.bf16.msra.mxu0 %v2937_v14  ;;  %v2953_v25 = vld [vmem:[#allocation2 + $0x244] ss:$16 sps:$4 sm:$0xff]   ;;  %v2956_v27 = vld [vmem:[#allocation2 + $0x240] ss:$16 sps:$4 sm:$0xff]   ;;  %v3451_v14 = vsub.s32 %v80_v11, %v82_v12 }
  0x28   :  { %1042 = vmatpush1.bf16.msra.mxu1 %v2938_v15  ;;  %1002 = vmatprep.subr.bf16.mxu0 %v2939_v16  ;;  %v2957_v28 = vld [vmem:[#allocation2 + $0x24] ss:$16 sps:$4 sm:$0xff]   ;;  %v2961_v30 = vld [vmem:[#allocation2 + $0x20] ss:$16 sps:$4 sm:$0xff]  }
  0x29   :  { %1043 = vmatprep.subr.bf16.mxu1 %v2941_v17  ;;  %v2959_v29 = vld [vmem:[#allocation2 + $0x224] ss:$16 sps:$4 sm:$0xff]   ;;  %v2962_v31 = vld [vmem:[#allocation2 + $0x220] ss:$16 sps:$4 sm:$0xff]  }
  0x2a   :  { %v2963_v32 = vld [vmem:[#allocation2 + $0x4] ss:$16 sps:$4 sm:$0xff]   ;;  %v2967_v34 = vld [vmem:[#allocation2] ss:$16 sps:$4 sm:$0xff]  }
  0x2b   :  { %1003 = vmatpush1.bf16.msra.mxu0 %v2943_v18  ;;  %v2965_v33 = vld [vmem:[#allocation2 + $0x204] ss:$16 sps:$4 sm:$0xff]   ;;  %v2968_v35 = vld [vmem:[#allocation2 + $0x200] ss:$16 sps:$4 sm:$0xff]  }
  0x2c   :  { %1044 = vmatpush1.bf16.msra.mxu1 %v2944_v19  ;;  %1004 = vmatprep.subr.bf16.mxu0 %v2945_v20  ;;  %v2969_v36 = vld [vmem:[#allocation2 + $0x1e4] ss:$16 sps:$4 sm:$0xff]   ;;  %v2973_v38 = vld [vmem:[#allocation2 + $0x1e0] ss:$16 sps:$4 sm:$0xff]  }
  0x2d   :  { %1045 = vmatprep.subr.bf16.mxu1 %v2947_v21  ;;  %v2971_v37 = vld [vmem:[#allocation2 + $0x3e4] ss:$16 sps:$4 sm:$0xff]   ;;  %v2974_v39 = vld [vmem:[#allocation2 + $0x3e0] ss:$16 sps:$4 sm:$0xff]  }
  0x2e   :  { %v2975_v40 = vld [vmem:[#allocation2 + $0x1c4] ss:$16 sps:$4 sm:$0xff]   ;;  %v2979_v42 = vld [vmem:[#allocation2 + $0x1c0] ss:$16 sps:$4 sm:$0xff]  }
  0x2f   :  { %1005 = vmatpush1.bf16.msra.mxu0 %v2949_v22  ;;  %v2977_v41 = vld [vmem:[#allocation2 + $0x3c4] ss:$16 sps:$4 sm:$0xff]   ;;  %v2980_v43 = vld [vmem:[#allocation2 + $0x3c0] ss:$16 sps:$4 sm:$0xff]  }
  0x30   :  { %1046 = vmatpush1.bf16.msra.mxu1 %v2950_v23  ;;  %1006 = vmatprep.subr.bf16.mxu0 %v2951_v24  ;;  %v2981_v44 = vld [vmem:[#allocation2 + $0x1a4] ss:$16 sps:$4 sm:$0xff]   ;;  %v2985_v46 = vld [vmem:[#allocation2 + $0x1a0] ss:$16 sps:$4 sm:$0xff]  }
  0x31   :  { %1047 = vmatprep.subr.bf16.mxu1 %v2953_v25  ;;  %v2983_v45 = vld [vmem:[#allocation2 + $0x3a4] ss:$16 sps:$4 sm:$0xff]   ;;  %v2986_v47 = vld [vmem:[#allocation2 + $0x3a0] ss:$16 sps:$4 sm:$0xff]  }
  0x32   :  { %v2987_v48 = vld [vmem:[#allocation2 + $0x184] ss:$16 sps:$4 sm:$0xff]   ;;  %v2991_v50 = vld [vmem:[#allocation2 + $0x180] ss:$16 sps:$4 sm:$0xff]  }
  0x33   :  { %1007 = vmatpush1.bf16.msra.mxu0 %v2955_v26  ;;  %v2989_v49 = vld [vmem:[#allocation2 + $0x384] ss:$16 sps:$4 sm:$0xff]   ;;  %v2992_v51 = vld [vmem:[#allocation2 + $0x380] ss:$16 sps:$4 sm:$0xff]  }
  0x34   :  { %1048 = vmatpush1.bf16.msra.mxu1 %v2956_v27  ;;  %1008 = vmatprep.subr.bf16.mxu0 %v2957_v28  ;;  %v2993_v52 = vld [vmem:[#allocation2 + $0x164] ss:$16 sps:$4 sm:$0xff]   ;;  %v2997_v54 = vld [vmem:[#allocation2 + $0x160] ss:$16 sps:$4 sm:$0xff]   ;;  %v3460_v27 = vsub.s32 0, %v82_v12 }
  0x35   :  { %1049 = vmatprep.subr.bf16.mxu1 %v2959_v29  ;;  %v2995_v53 = vld [vmem:[#allocation2 + $0x364] ss:$16 sps:$4 sm:$0xff]   ;;  %v2998_v55 = vld [vmem:[#allocation2 + $0x360] ss:$16 sps:$4 sm:$0xff]  }
  0x36   :  { %v2999_v56 = vld [vmem:[#allocation2 + $0x144] ss:$16 sps:$4 sm:$0xff]   ;;  %v3003_v58 = vld [vmem:[#allocation2 + $0x140] ss:$16 sps:$4 sm:$0xff]  }
  0x37   :  { %1009 = vmatpush1.bf16.msra.mxu0 %v2961_v30  ;;  %v3001_v57 = vld [vmem:[#allocation2 + $0x344] ss:$16 sps:$4 sm:$0xff]   ;;  %v3004_v59 = vld [vmem:[#allocation2 + $0x340] ss:$16 sps:$4 sm:$0xff]  }
  0x38   :  { %1050 = vmatpush1.bf16.msra.mxu1 %v2962_v31  ;;  %1010 = vmatprep.subr.bf16.mxu0 %v2963_v32  ;;  %v3005_v60 = vld [vmem:[#allocation2 + $0x124] ss:$16 sps:$4 sm:$0xff]   ;;  %v3009_v62 = vld [vmem:[#allocation2 + $0x120] ss:$16 sps:$4 sm:$0xff]  }
  0x39   :  { %1051 = vmatprep.subr.bf16.mxu1 %v2965_v33  ;;  %v3007_v61 = vld [vmem:[#allocation2 + $0x324] ss:$16 sps:$4 sm:$0xff]   ;;  %v3010_v63 = vld [vmem:[#allocation2 + $0x320] ss:$16 sps:$4 sm:$0xff]  }
  0x3a   :  { %v3011_v1 = vld [vmem:[#allocation2 + $0x104] ss:$16 sps:$4 sm:$0xff]   ;;  %v3015_v3 = vld [vmem:[#allocation2 + $0x100] ss:$16 sps:$4 sm:$0xff]  }
  0x3b   :  { %1011 = vmatpush1.bf16.msra.mxu0 %v2967_v34  ;;  %v3013_v2 = vld [vmem:[#allocation2 + $0x304] ss:$16 sps:$4 sm:$0xff]   ;;  %v3016_v4 = vld [vmem:[#allocation2 + $0x300] ss:$16 sps:$4 sm:$0xff]  }
  0x3c   :  { %1052 = vmatpush1.bf16.msra.mxu1 %v2968_v35  ;;  %1012 = vmatprep.subr.bf16.mxu0 %v2969_v36  ;;  %v2575_v10 = vld.sshfl [vmem:[%s3635_s1] sm:$0x33 pattern:$0x75316420] }
  0x3d   :  { %1053 = vmatprep.subr.bf16.mxu1 %v2971_v37  ;;  %v77_v13 = vcombine.high %v2575_v10, %v2575_v10  ;;  %v2576_v15 = vld.sshfl [vmem:[%s3636_s2] sm:$0x33 pattern:$0x75316420]  ;;  %v84_v16 = vrot.slane %v2575_v10, %v3451_v14 }
  0x3e   :  { %v175_v18 = vcombine.high %v2576_v15, %v2576_v15  ;;  %v182_v22 = vrot.slane %v2576_v15, %v3451_v14 }
  0x3f   :  { %1013 = vmatpush2.bf16.msra.mxu0 %v2973_v38  ;;  %v91_v17 = vrot.slane %v77_v13, %v3451_v14  ;;  %v92_v19 = vcombine.high %v84_v16, %v84_v16  ;;  %v130_v23 = vshrl.u32 %v84_v16, 16  ;;  %v95_v30 = vpack.i.b16 %v84_v16, %v84_v16  ;;  %v3025_v16 = vld [vmem:[#allocation2 + $0xcc] ss:$16 sps:$4 sm:$0xff]  }
  0x40   :  { %1054 = vmatpush2.bf16.msra.mxu1 %v2974_v39  ;;  %1014 = vmatprep.subr.bf16.mxu0 %v2975_v40  ;;  %v189_v21 = vrot.slane %v175_v18, %v3451_v14  ;;  %v190_v29 = vcombine.high %v182_v22, %v182_v22  ;;  %v3023_v18 = vld [vmem:[#allocation2 + $0xc8] ss:$16 sps:$4 sm:$0xff]  }
  0x41   :  { %1055 = vmatprep.subr.bf16.mxu1 %v2977_v41  ;;  %v93_v20 = vcombine.high %v91_v17, %v91_v17  ;;  %v137_v24 = vshrl.u32 %v91_v17, 16  ;;  %v144_v25 = vshrl.u32 %v92_v19, 16  ;;  %v102_v31 = vpack.i.b16 %v91_v17, %v91_v17  ;;  %v3028_v17 = vld [vmem:[#allocation2 + $0x2cc] ss:$16 sps:$4 sm:$0xff]  }
  0x42   :  { %v191_v28 = vcombine.high %v189_v21, %v189_v21  ;;  %v109_v32 = vpack.i.b16 %v92_v19, %v92_v19  ;;  %v131_v34 = vpack.i.b16 %v130_v23, %v130_v23  ;;  %v200_v39 = vpack.i.b16 %v189_v21, %v189_v21  ;;  %v3026_v19 = vld [vmem:[#allocation2 + $0x2c8] ss:$16 sps:$4 sm:$0xff]   ;;  %v3034_v21 = vld [vmem:[#allocation2 + $0x2ac] ss:$16 sps:$4 sm:$0xff]  }
  0x43   :  { %1015 = vmatpush2.bf16.msra.mxu0 %v2979_v42  ;;  %v151_v26 = vshrl.u32 %v93_v20, 16  ;;  %v116_v33 = vpack.i.b16 %v93_v20, %v93_v20  ;;  %v138_v35 = vpack.i.b16 %v137_v24, %v137_v24  ;;  %v145_v36 = vpack.i.b16 %v144_v25, %v144_v25  ;;  %v3031_v20 = vld [vmem:[#allocation2 + $0xac] ss:$16 sps:$4 sm:$0xff]   ;;  %v3032_v23 = vld [vmem:[#allocation2 + $0x2a8] ss:$16 sps:$4 sm:$0xff]  }
  0x44   :  { %1056 = vmatpush2.bf16.msra.mxu1 %v2980_v43  ;;  %1016 = vmatprep.subr.bf16.mxu0 %v2981_v44  ;;  %v214_v40 = vpack.i.b16 %v191_v28, %v191_v28  ;;  %v193_v41 = vpack.i.b16 %v182_v22, %v182_v22  ;;  %v207_v42 = vpack.i.b16 %v190_v29, %v190_v29  ;;  %v3029_v22 = vld [vmem:[#allocation2 + $0xa8] ss:$16 sps:$4 sm:$0xff]   ;;  %v3037_v24 = vld [vmem:[#allocation2 + $0x8c] ss:$16 sps:$4 sm:$0xff]  }
  0x45   :  { %1057 = vmatprep.subr.bf16.mxu1 %v2983_v45  ;;  %v152_v37 = vpack.i.b16 %v151_v26, %v151_v26  ;;  %v100_v43 = vrot.slane %v95_v30, %v3460_v27  ;;  %v107_v44 = vrot.slane %v102_v31, %v3460_v27  ;;  %v114_v45 = vrot.slane %v109_v32, %v3460_v27  ;;  %v3040_v25 = vld [vmem:[#allocation2 + $0x28c] ss:$16 sps:$4 sm:$0xff]   ;;  %v3035_v26 = vld [vmem:[#allocation2 + $0x88] ss:$16 sps:$4 sm:$0xff]  }
  0x46   :  { %v3038_v28 = vld [vmem:[#allocation2 + $0x288] ss:$16 sps:$4 sm:$0xff]   ;;  %v3043_v29 = vld [vmem:[#allocation2 + $0x6c] ss:$16 sps:$4 sm:$0xff]  }
  0x47   :  { %1017 = vmatpush2.bf16.msra.mxu0 %v2985_v46  ;;  %v121_v46 = vrot.slane %v116_v33, %v3460_v27  ;;  %v3046_v30 = vld [vmem:[#allocation2 + $0x26c] ss:$16 sps:$4 sm:$0xff]   ;;  %v3041_v31 = vld [vmem:[#allocation2 + $0x68] ss:$16 sps:$4 sm:$0xff]  }
  0x48   :  { %1058 = vmatpush2.bf16.msra.mxu1 %v2986_v47  ;;  %1018 = vmatprep.subr.bf16.mxu0 %v2987_v48  ;;  %v136_v47 = vrot.slane %v131_v34, %v3460_v27  ;;  %v143_v48 = vrot.slane %v138_v35, %v3460_v27  ;;  %v3044_v32 = vld [vmem:[#allocation2 + $0x268] ss:$16 sps:$4 sm:$0xff]   ;;  %v3049_v33 = vld [vmem:[#allocation2 + $0x4c] ss:$16 sps:$4 sm:$0xff]  }
  0x49   :  { %1059 = vmatprep.subr.bf16.mxu1 %v2989_v49  ;;  %v150_v49 = vrot.slane %v145_v36, %v3460_v27  ;;  %v3052_v34 = vld [vmem:[#allocation2 + $0x24c] ss:$16 sps:$4 sm:$0xff]   ;;  %v3047_v35 = vld [vmem:[#allocation2 + $0x48] ss:$16 sps:$4 sm:$0xff]  }
  0x4a   :  { %v3050_v36 = vld [vmem:[#allocation2 + $0x248] ss:$16 sps:$4 sm:$0xff]  }
  0x4b   :  { %1019 = vmatpush2.bf16.msra.mxu0 %v2991_v50  ;;  %v157_v50 = vrot.slane %v152_v37, %v3460_v27  ;;  %v3055_v37 = vld [vmem:[#allocation2 + $0x2c] ss:$16 sps:$4 sm:$0xff]  }
  0x4c   :  { %1060 = vmatpush2.bf16.msra.mxu1 %v2992_v51  ;;  %1020 = vmatprep.subr.bf16.mxu0 %v2993_v52  ;;  %v205_v51 = vrot.slane %v200_v39, %v3460_v27  ;;  %v219_v52 = vrot.slane %v214_v40, %v3460_v27  ;;  %v3053_v39 = vld [vmem:[#allocation2 + $0x28] ss:$16 sps:$4 sm:$0xff]  }
  0x4d   :  { %1061 = vmatprep.subr.bf16.mxu1 %v2995_v53  ;;  %v198_v53 = vrot.slane %v193_v41, %v3460_v27  ;;  %v3056_v40 = vld [vmem:[#allocation2 + $0x228] ss:$16 sps:$4 sm:$0xff]   ;;  %v3061_v41 = vld [vmem:[#allocation2 + $0xc] ss:$16 sps:$4 sm:$0xff]  }
  0x4f   :  { %1021 = vmatpush2.bf16.msra.mxu0 %v2997_v54  ;;  %v212_v54 = vrot.slane %v207_v42, %v3460_v27  ;;  %v3064_v42 = vld [vmem:[#allocation2 + $0x20c] ss:$16 sps:$4 sm:$0xff]  }
  0x50   :  { %1062 = vmatpush2.bf16.msra.mxu1 %v2998_v55  ;;  %1022 = vmatprep.subr.bf16.mxu0 %v2999_v56 }
  0x51   :  { %1063 = vmatprep.subr.bf16.mxu1 %v3001_v57 }
  0x53   :  { %1023 = vmatpush2.bf16.msra.mxu0 %v3003_v58 }
  0x54   :  { %1064 = vmatpush2.bf16.msra.mxu1 %v3004_v59  ;;  %1024 = vmatprep.subr.bf16.mxu0 %v3005_v60 }
  0x55   :  { %1065 = vmatprep.subr.bf16.mxu1 %v3007_v61 }
  0x57   :  { %1025 = vmatpush2.bf16.msra.mxu0 %v3009_v62 }
  0x58   :  { %1066 = vmatpush2.bf16.msra.mxu1 %v3010_v63  ;;  %1026 = vmatprep.subr.bf16.mxu0 %v3011_v1 }
  0x59   :  { %1067 = vmatprep.subr.bf16.mxu1 %v3013_v2 }
  0x5b   :  { %1027 = vmatpush2.bf16.msra.mxu0 %v3015_v3 }
  0x5c   :  { %1068 = vmatpush2.bf16.msra.mxu1 %v3016_v4  ;;  %1078 = vmatprep.subr.bf16.mxu0 %v3019_v5 }
  0x5d   :  { %1119 = vmatprep.subr.bf16.mxu1 %v3022_v6 }
  0x99   :  { %v67_v38 = vpop.permute.xlu0 %66 }
  0x9a   :  { %v122_v55 = vmul.bf16 %v100_v43, %v67_v38  ;;  %v123_v56 = vmul.bf16 %v107_v44, %v67_v38  ;;  %v124_v57 = vmul.bf16 %v114_v45, %v67_v38  ;;  %v125_v58 = vmul.bf16 %v121_v46, %v67_v38  ;;  %v3058_v38 = vld [vmem:[#allocation2 + $0x22c] ss:$16 sps:$4 sm:$0xff]   ;;  %v3059_v43 = vld [vmem:[#allocation2 + $0x8] ss:$16 sps:$4 sm:$0xff]  }
  0x9b   :  { %v3062_v44 = vld [vmem:[#allocation2 + $0x208] ss:$16 sps:$4 sm:$0xff]   ;;  %v3067_v45 = vld [vmem:[#allocation2 + $0x1ec] ss:$16 sps:$4 sm:$0xff]  }
  0x9c   :  { %v3070_v46 = vld [vmem:[#allocation2 + $0x3ec] ss:$16 sps:$4 sm:$0xff]  }
  0x9e   :  { %v128_v59 = vpop.permute.xlu0 %127 }
  0x9f   :  { %v158_v60 = vmul.bf16 %v136_v47, %v128_v59  ;;  %v159_v61 = vmul.bf16 %v143_v48, %v128_v59  ;;  %v160_v62 = vmul.bf16 %v150_v49, %v128_v59  ;;  %v161_v63 = vmul.bf16 %v157_v50, %v128_v59  ;;  %v3065_v47 = vld [vmem:[#allocation2 + $0x1e8] ss:$16 sps:$4 sm:$0xff]   ;;  %v3073_v49 = vld [vmem:[#allocation2 + $0x1cc] ss:$16 sps:$4 sm:$0xff]  }
  0xa0   :  { %v3068_v48 = vld [vmem:[#allocation2 + $0x3e8] ss:$16 sps:$4 sm:$0xff]   ;;  %v3076_v50 = vld [vmem:[#allocation2 + $0x3cc] ss:$16 sps:$4 sm:$0xff]  }
  0xa1   :  { %v162_v1 = vadd.bf16 %v158_v60, %v122_v55  ;;  %v164_v2 = vadd.bf16 %v160_v62, %v124_v57  ;;  %v163_v3 = vadd.bf16 %v159_v61, %v123_v56  ;;  %v165_v4 = vadd.bf16 %v161_v63, %v125_v58  ;;  %v3077_v55 = vld [vmem:[#allocation2 + $0x1a8] ss:$16 sps:$4 sm:$0xff]   ;;  %v3085_v57 = vld [vmem:[#allocation2 + $0x18c] ss:$16 sps:$4 sm:$0xff]  }
  0xa2   :  { %v3080_v56 = vld [vmem:[#allocation2 + $0x3a8] ss:$16 sps:$4 sm:$0xff]   ;;  %v3088_v58 = vld [vmem:[#allocation2 + $0x38c] ss:$16 sps:$4 sm:$0xff]  }
  0xa3   :  { %v221_v5 = vadd.bf16 %v205_v51, %v163_v3  ;;  %v223_v6 = vadd.bf16 %v219_v52, %v165_v4  ;;  %v220_v9 = vadd.bf16 %v198_v53, %v162_v1  ;;  %v222_v10 = vadd.bf16 %v212_v54, %v164_v2  ;;  %v3071_v51 = vld [vmem:[#allocation2 + $0x1c8] ss:$16 sps:$4 sm:$0xff]   ;;  %v3079_v53 = vld [vmem:[#allocation2 + $0x1ac] ss:$16 sps:$4 sm:$0xff]  }
  0xa4   :  { %v3074_v52 = vld [vmem:[#allocation2 + $0x3c8] ss:$16 sps:$4 sm:$0xff]   ;;  %v3082_v54 = vld [vmem:[#allocation2 + $0x3ac] ss:$16 sps:$4 sm:$0xff]  }
  0xa5   :  { %v225_v11 = vmax.bf16 %v3385_v0, %v221_v5  ;;  %v227_v12 = vmax.bf16 %v3385_v0, %v223_v6  ;;  %v3477_v13 = vmax.bf16 %v3385_v0, %v220_v9  ;;  %v3480_v15 = vmax.bf16 %v3385_v0, %v222_v10  ;;  %v3083_v59 = vld [vmem:[#allocation2 + $0x188] ss:$16 sps:$4 sm:$0xff]   ;;  %v3091_v61 = vld [vmem:[#allocation2 + $0x16c] ss:$16 sps:$4 sm:$0xff]  }
  0xa6   :  { %v3086_v60 = vld [vmem:[#allocation2 + $0x388] ss:$16 sps:$4 sm:$0xff]   ;;  %v3094_v62 = vld [vmem:[#allocation2 + $0x36c] ss:$16 sps:$4 sm:$0xff]  }
  0xa7   :  { %1028 = vmatprep.mubr.bf16.mxu0 %v225_v11  ;;  %1069 = vmatprep.mubr.bf16.mxu1 %v227_v12  ;;  %v3089_v63 = vld [vmem:[#allocation2 + $0x168] ss:$16 sps:$4 sm:$0xff]   ;;  %v3097_v2 = vld [vmem:[#allocation2 + $0x14c] ss:$16 sps:$4 sm:$0xff]  }
  0xa8   :  { %1029 = vmatmul.mubr.bf16.vlgmr.msra.gmra.mxu0 %v3477_v13  ;;  %1070 = vmatmul.mubr.bf16.vlgmr.msra.gmra.mxu1 %v3480_v15  ;;  %v3092_v1 = vld [vmem:[#allocation2 + $0x368] ss:$16 sps:$4 sm:$0xff]   ;;  %v3100_v3 = vld [vmem:[#allocation2 + $0x34c] ss:$16 sps:$4 sm:$0xff]  }
  0xa9   :  { %1079 = vmatpush1.bf16.msra.mxu0 %v3017_v7  ;;  %1120 = vmatpush1.bf16.msra.mxu1 %v3020_v8  ;;  %v3095_v4 = vld [vmem:[#allocation2 + $0x148] ss:$16 sps:$4 sm:$0xff]   ;;  %v3103_v6 = vld [vmem:[#allocation2 + $0x12c] ss:$16 sps:$4 sm:$0xff]  }
  0xaa   :  { %1110 = vmatprep.mubr.bf16.mxu0 %v225_v11  ;;  %1151 = vmatprep.mubr.bf16.mxu1 %v227_v12  ;;  %v3098_v5 = vld [vmem:[#allocation2 + $0x348] ss:$16 sps:$4 sm:$0xff]   ;;  %v3106_v7 = vld [vmem:[#allocation2 + $0x32c] ss:$16 sps:$4 sm:$0xff]  }
  0xab   :  { %1080 = vmatprep.subr.bf16.mxu0 %v3025_v16  ;;  %1121 = vmatprep.subr.bf16.mxu1 %v3028_v17  ;;  %v3101_v8 = vld [vmem:[#allocation2 + $0x128] ss:$16 sps:$4 sm:$0xff]   ;;  %v3109_v10 = vld [vmem:[#allocation2 + $0x10c] ss:$16 sps:$4 sm:$0xff]   ;;  %v3115_v17 = vld [vmem:[#allocation4 + $0xe4] ss:$16 sps:$4 sm:$0xff]  }
  0xac   :  { %v3104_v9 = vld [vmem:[#allocation2 + $0x328] ss:$16 sps:$4 sm:$0xff]   ;;  %v3112_v11 = vld [vmem:[#allocation2 + $0x30c] ss:$16 sps:$4 sm:$0xff]  }
  0xad   :  { %1081 = vmatpush1.bf16.msra.mxu0 %v3023_v18  ;;  %1122 = vmatpush1.bf16.msra.mxu1 %v3026_v19  ;;  %v3107_v12 = vld [vmem:[#allocation2 + $0x108] ss:$16 sps:$4 sm:$0xff]   ;;  %v3113_v18 = vld [vmem:[#allocation4 + $0xe0] ss:$16 sps:$4 sm:$0xff]   ;;  %v3118_v19 = vld [vmem:[#allocation4 + $0xc4] ss:$16 sps:$4 sm:$0xff]  }
  0xae   :  { %1082 = vmatprep.subr.bf16.mxu0 %v3031_v20  ;;  %1123 = vmatprep.subr.bf16.mxu1 %v3034_v21  ;;  %v3110_v16 = vld [vmem:[#allocation2 + $0x308] ss:$16 sps:$4 sm:$0xff]   ;;  %v3116_v20 = vld [vmem:[#allocation4 + $0xc0] ss:$16 sps:$4 sm:$0xff]   ;;  %v3121_v21 = vld [vmem:[#allocation4 + $0xa4] ss:$16 sps:$4 sm:$0xff]  }
  0xb1   :  { %1083 = vmatpush1.bf16.msra.mxu0 %v3029_v22  ;;  %1124 = vmatpush1.bf16.msra.mxu1 %v3032_v23  ;;  %v3119_v22 = vld [vmem:[#allocation4 + $0xa0] ss:$16 sps:$4 sm:$0xff]   ;;  %v3124_v23 = vld [vmem:[#allocation4 + $0x84] ss:$16 sps:$4 sm:$0xff]  }
  0xb2   :  { %1084 = vmatprep.subr.bf16.mxu0 %v3037_v24  ;;  %1125 = vmatprep.subr.bf16.mxu1 %v3040_v25  ;;  %v3161_v24 = vld [vmem:[#allocation4 + $0x2e0] ss:$16 sps:$4 sm:$0xff]   ;;  %v3163_v25 = vld [vmem:[#allocation4 + $0x2e4] ss:$16 sps:$4 sm:$0xff]  }
  0xb5   :  { %1085 = vmatpush1.bf16.msra.mxu0 %v3035_v26  ;;  %1126 = vmatpush1.bf16.msra.mxu1 %v3038_v28  ;;  %v3122_v26 = vld [vmem:[#allocation4 + $0x80] ss:$16 sps:$4 sm:$0xff]   ;;  %v3127_v28 = vld [vmem:[#allocation4 + $0x64] ss:$16 sps:$4 sm:$0xff]  }
  0xb6   :  { %1086 = vmatprep.subr.bf16.mxu0 %v3043_v29  ;;  %1127 = vmatprep.subr.bf16.mxu1 %v3046_v30  ;;  %v3167_v29 = vld [vmem:[#allocation4 + $0x2c0] ss:$16 sps:$4 sm:$0xff]   ;;  %v3130_v30 = vld [vmem:[#allocation4 + $0x44] ss:$16 sps:$4 sm:$0xff]  }
  0xb9   :  { %1087 = vmatpush1.bf16.msra.mxu0 %v3041_v31  ;;  %1128 = vmatpush1.bf16.msra.mxu1 %v3044_v32  ;;  %v3128_v31 = vld [vmem:[#allocation4 + $0x40] ss:$16 sps:$4 sm:$0xff]  }
  0xba   :  { %1088 = vmatprep.subr.bf16.mxu0 %v3049_v33  ;;  %1129 = vmatprep.subr.bf16.mxu1 %v3052_v34  ;;  %v3173_v32 = vld [vmem:[#allocation4 + $0x2a0] ss:$16 sps:$4 sm:$0xff]   ;;  %v3175_v33 = vld [vmem:[#allocation4 + $0x2a4] ss:$16 sps:$4 sm:$0xff]  }
  0xbb   :  { %v3133_v34 = vld [vmem:[#allocation4 + $0x24] ss:$16 sps:$4 sm:$0xff]  }
  0xbd   :  { %1089 = vmatpush1.bf16.msra.mxu0 %v3047_v35  ;;  %1130 = vmatpush1.bf16.msra.mxu1 %v3050_v36  ;;  %v3131_v35 = vld [vmem:[#allocation4 + $0x20] ss:$16 sps:$4 sm:$0xff]  }
  0xbe   :  { %1090 = vmatprep.subr.bf16.mxu0 %v3055_v37  ;;  %1131 = vmatprep.subr.bf16.mxu1 %v3058_v38  ;;  %v3179_v36 = vld [vmem:[#allocation4 + $0x280] ss:$16 sps:$4 sm:$0xff]   ;;  %v3181_v37 = vld [vmem:[#allocation4 + $0x284] ss:$16 sps:$4 sm:$0xff]  }
  0xbf   :  { %v3136_v38 = vld [vmem:[#allocation4 + $0x4] ss:$16 sps:$4 sm:$0xff]  }
  0xc1   :  { %1091 = vmatpush1.bf16.msra.mxu0 %v3053_v39  ;;  %1132 = vmatpush1.bf16.msra.mxu1 %v3056_v40  ;;  %v3134_v39 = vld [vmem:[#allocation4] ss:$16 sps:$4 sm:$0xff]  }
  0xc2   :  { %1092 = vmatprep.subr.bf16.mxu0 %v3061_v41  ;;  %1133 = vmatprep.subr.bf16.mxu1 %v3064_v42  ;;  %v3185_v40 = vld [vmem:[#allocation4 + $0x260] ss:$16 sps:$4 sm:$0xff]   ;;  %v3187_v41 = vld [vmem:[#allocation4 + $0x264] ss:$16 sps:$4 sm:$0xff]  }
  0xc3   :  { %v3139_v42 = vld [vmem:[#allocation4 + $0x1e4] ss:$16 sps:$4 sm:$0xff]  }
  0xc5   :  { %1093 = vmatpush1.bf16.msra.mxu0 %v3059_v43  ;;  %1134 = vmatpush1.bf16.msra.mxu1 %v3062_v44  ;;  %v3137_v43 = vld [vmem:[#allocation4 + $0x1e0] ss:$16 sps:$4 sm:$0xff]  }
  0xc6   :  { %1094 = vmatprep.subr.bf16.mxu0 %v3067_v45  ;;  %1135 = vmatprep.subr.bf16.mxu1 %v3070_v46  ;;  %v3191_v44 = vld [vmem:[#allocation4 + $0x240] ss:$16 sps:$4 sm:$0xff]   ;;  %v3193_v45 = vld [vmem:[#allocation4 + $0x244] ss:$16 sps:$4 sm:$0xff]  }
  0xc7   :  { %v3142_v46 = vld [vmem:[#allocation4 + $0x1c4] ss:$16 sps:$4 sm:$0xff]  }
  0xc9   :  { %1095 = vmatpush2.bf16.msra.mxu0 %v3065_v47  ;;  %1136 = vmatpush2.bf16.msra.mxu1 %v3068_v48  ;;  %v3140_v47 = vld [vmem:[#allocation4 + $0x1c0] ss:$16 sps:$4 sm:$0xff]  }
  0xca   :  { %1096 = vmatprep.subr.bf16.mxu0 %v3073_v49  ;;  %1137 = vmatprep.subr.bf16.mxu1 %v3076_v50  ;;  %v3197_v48 = vld [vmem:[#allocation4 + $0x220] ss:$16 sps:$4 sm:$0xff]   ;;  %v3199_v49 = vld [vmem:[#allocation4 + $0x224] ss:$16 sps:$4 sm:$0xff]  }
  0xcb   :  { %v3145_v50 = vld [vmem:[#allocation4 + $0x1a4] ss:$16 sps:$4 sm:$0xff]  }
  0xcd   :  { %1097 = vmatpush2.bf16.msra.mxu0 %v3071_v51  ;;  %1138 = vmatpush2.bf16.msra.mxu1 %v3074_v52  ;;  %v3143_v51 = vld [vmem:[#allocation4 + $0x1a0] ss:$16 sps:$4 sm:$0xff]  }
  0xce   :  { %1098 = vmatprep.subr.bf16.mxu0 %v3079_v53  ;;  %1139 = vmatprep.subr.bf16.mxu1 %v3082_v54  ;;  %v3203_v52 = vld [vmem:[#allocation4 + $0x200] ss:$16 sps:$4 sm:$0xff]   ;;  %v3205_v53 = vld [vmem:[#allocation4 + $0x204] ss:$16 sps:$4 sm:$0xff]  }
  0xcf   :  { %v3148_v54 = vld [vmem:[#allocation4 + $0x184] ss:$16 sps:$4 sm:$0xff]  }
  0xd1   :  { %1099 = vmatpush2.bf16.msra.mxu0 %v3077_v55  ;;  %1140 = vmatpush2.bf16.msra.mxu1 %v3080_v56  ;;  %v3146_v55 = vld [vmem:[#allocation4 + $0x180] ss:$16 sps:$4 sm:$0xff]  }
  0xd2   :  { %1100 = vmatprep.subr.bf16.mxu0 %v3085_v57  ;;  %1141 = vmatprep.subr.bf16.mxu1 %v3088_v58  ;;  %v3209_v56 = vld [vmem:[#allocation4 + $0x3e0] ss:$16 sps:$4 sm:$0xff]   ;;  %v3211_v57 = vld [vmem:[#allocation4 + $0x3e4] ss:$16 sps:$4 sm:$0xff]  }
  0xd3   :  { %v3151_v58 = vld [vmem:[#allocation4 + $0x164] ss:$16 sps:$4 sm:$0xff]  }
  0xd5   :  { %1101 = vmatpush2.bf16.msra.mxu0 %v3083_v59  ;;  %1142 = vmatpush2.bf16.msra.mxu1 %v3086_v60  ;;  %v3149_v59 = vld [vmem:[#allocation4 + $0x160] ss:$16 sps:$4 sm:$0xff]  }
  0xd6   :  { %1102 = vmatprep.subr.bf16.mxu0 %v3091_v61  ;;  %1143 = vmatprep.subr.bf16.mxu1 %v3094_v62  ;;  %v3215_v60 = vld [vmem:[#allocation4 + $0x3c0] ss:$16 sps:$4 sm:$0xff]   ;;  %v3217_v61 = vld [vmem:[#allocation4 + $0x3c4] ss:$16 sps:$4 sm:$0xff]  }
  0xd7   :  { %v3154_v62 = vld [vmem:[#allocation4 + $0x144] ss:$16 sps:$4 sm:$0xff]  }
  0xd9   :  { %1103 = vmatpush2.bf16.msra.mxu0 %v3089_v63  ;;  %1144 = vmatpush2.bf16.msra.mxu1 %v3092_v1  ;;  %v3152_v63 = vld [vmem:[#allocation4 + $0x140] ss:$16 sps:$4 sm:$0xff]  }
  0xda   :  { %1104 = vmatprep.subr.bf16.mxu0 %v3097_v2  ;;  %1145 = vmatprep.subr.bf16.mxu1 %v3100_v3  ;;  %v3221_v1 = vld [vmem:[#allocation4 + $0x3a0] ss:$16 sps:$4 sm:$0xff]   ;;  %v3223_v2 = vld [vmem:[#allocation4 + $0x3a4] ss:$16 sps:$4 sm:$0xff]  }
  0xdb   :  { %v3157_v3 = vld [vmem:[#allocation4 + $0x124] ss:$16 sps:$4 sm:$0xff]  }
  0xdd   :  { %1105 = vmatpush2.bf16.msra.mxu0 %v3095_v4  ;;  %1146 = vmatpush2.bf16.msra.mxu1 %v3098_v5  ;;  %v3155_v4 = vld [vmem:[#allocation4 + $0x120] ss:$16 sps:$4 sm:$0xff]  }
  0xde   :  { %1106 = vmatprep.subr.bf16.mxu0 %v3103_v6  ;;  %1147 = vmatprep.subr.bf16.mxu1 %v3106_v7  ;;  %v3227_v5 = vld [vmem:[#allocation4 + $0x380] ss:$16 sps:$4 sm:$0xff]   ;;  %v3229_v6 = vld [vmem:[#allocation4 + $0x384] ss:$16 sps:$4 sm:$0xff]  }
  0xdf   :  { %v3160_v7 = vld [vmem:[#allocation4 + $0x104] ss:$16 sps:$4 sm:$0xff]  }
  0xe1   :  { %1107 = vmatpush2.bf16.msra.mxu0 %v3101_v8  ;;  %1148 = vmatpush2.bf16.msra.mxu1 %v3104_v9  ;;  %v3158_v8 = vld [vmem:[#allocation4 + $0x100] ss:$16 sps:$4 sm:$0xff]  }
  0xe2   :  { %1108 = vmatprep.subr.bf16.mxu0 %v3109_v10  ;;  %1149 = vmatprep.subr.bf16.mxu1 %v3112_v11  ;;  %v3233_v9 = vld [vmem:[#allocation4 + $0x360] ss:$16 sps:$4 sm:$0xff]   ;;  %v3235_v10 = vld [vmem:[#allocation4 + $0x364] ss:$16 sps:$4 sm:$0xff]   ;;  %v3166_v11 = vld [vmem:[#allocation4 + $0xec] ss:$16 sps:$4 sm:$0xff]  }
  0xe5   :  { %1109 = vmatpush2.bf16.msra.mxu0 %v3107_v12  ;;  %1150 = vmatpush2.bf16.msra.mxu1 %v3110_v16  ;;  %v3239_v12 = vld [vmem:[#allocation4 + $0x340] ss:$16 sps:$4 sm:$0xff]   ;;  %v3241_v16 = vld [vmem:[#allocation4 + $0x344] ss:$16 sps:$4 sm:$0xff]  }
  0xe6   :  { %1994 = vmatprep.subr.bf16.mxu0 %v3115_v17  ;;  %2035 = vmatprep.subr.bf16.mxu1 %v3163_v25  ;;  %v3247_v17 = vld [vmem:[#allocation4 + $0x324] ss:$16 sps:$4 sm:$0xff]  }
  0xe8   :  { %1111 = vmatmul.mubr.bf16.vlgmr.msra.gmra.mxu0 %v3477_v13  ;;  %1152 = vmatmul.mubr.bf16.vlgmr.msra.gmra.mxu1 %v3480_v15  ;;  %v3125_v13 = vld [vmem:[#allocation4 + $0x60] ss:$16 sps:$4 sm:$0xff]   ;;  %v3169_v15 = vld [vmem:[#allocation4 + $0x2c4] ss:$16 sps:$4 sm:$0xff]  }
  0xe9   :  { %1995 = vmatpush1.bf16.msra.mxu0 %v3113_v18  ;;  %2036 = vmatpush1.bf16.msra.mxu1 %v3161_v24  ;;  %v3245_v18 = vld [vmem:[#allocation4 + $0x320] ss:$16 sps:$4 sm:$0xff]  }
  0xea   :  { %1996 = vmatprep.subr.bf16.mxu0 %v3118_v19  ;;  %2037 = vmatprep.subr.bf16.mxu1 %v3169_v15  ;;  %v3253_v19 = vld [vmem:[#allocation4 + $0x304] ss:$16 sps:$4 sm:$0xff]  }
  0xed   :  { %1997 = vmatpush1.bf16.msra.mxu0 %v3116_v20  ;;  %2038 = vmatpush1.bf16.msra.mxu1 %v3167_v29  ;;  %v3251_v20 = vld [vmem:[#allocation4 + $0x300] ss:$16 sps:$4 sm:$0xff]  }
  0xee   :  { %1998 = vmatprep.subr.bf16.mxu0 %v3121_v21  ;;  %2039 = vmatprep.subr.bf16.mxu1 %v3175_v33  ;;  %v3259_v21 = vld [vmem:[#allocation4 + $0x2ec] ss:$16 sps:$4 sm:$0xff]  }
  0xf1   :  { %1999 = vmatpush1.bf16.msra.mxu0 %v3119_v22  ;;  %2040 = vmatpush1.bf16.msra.mxu1 %v3173_v32  ;;  %v2705_v22 = vld.sshfl [vmem:[%s3638_s4] sm:$0x33 pattern:$0x75316420] }
  0xf2   :  { %2000 = vmatprep.subr.bf16.mxu0 %v3124_v23  ;;  %2041 = vmatprep.subr.bf16.mxu1 %v3181_v37  ;;  %v1173_v23 = vcombine.high %v2705_v22, %v2705_v22  ;;  %v3490_v24 = vrot.slane %v2705_v22, %v3451_v14 }
  0xf4   :  { %v3493_v25 = vrot.slane %v1173_v23, %v3451_v14 }
  0xf5   :  { %2001 = vmatpush1.bf16.msra.mxu0 %v3122_v26  ;;  %2042 = vmatpush1.bf16.msra.mxu1 %v3179_v36  ;;  %v1191_v26 = vpack.i.b16 %v3490_v24, %v3490_v24 }
  0xf6   :  { %2002 = vmatprep.subr.bf16.mxu0 %v3127_v28  ;;  %2043 = vmatprep.subr.bf16.mxu1 %v3187_v41  ;;  %v1198_v28 = vpack.i.b16 %v3493_v25, %v3493_v25 }
  0xf9   :  { %2003 = vmatpush1.bf16.msra.mxu0 %v3125_v13  ;;  %2044 = vmatpush1.bf16.msra.mxu1 %v3185_v40 }
  0xfa   :  { %2004 = vmatprep.subr.bf16.mxu0 %v3130_v30  ;;  %2045 = vmatprep.subr.bf16.mxu1 %v3193_v45  ;;  %v1196_v30 = vrot.slane %v1191_v26, %v3460_v27 }
  0xfd   :  { %2005 = vmatpush1.bf16.msra.mxu0 %v3128_v31  ;;  %2046 = vmatpush1.bf16.msra.mxu1 %v3191_v44  ;;  %v3164_v44 = vld [vmem:[#allocation4 + $0xe8] ss:$16 sps:$4 sm:$0xff]  }
  0xfe   :  { %2006 = vmatprep.subr.bf16.mxu0 %v3133_v34  ;;  %2047 = vmatprep.subr.bf16.mxu1 %v3199_v49  ;;  %v3176_v49 = vld [vmem:[#allocation4 + $0xa8] ss:$16 sps:$4 sm:$0xff]  }
 0x101   :  { %2007 = vmatpush1.bf16.msra.mxu0 %v3131_v35  ;;  %2048 = vmatpush1.bf16.msra.mxu1 %v3197_v48  ;;  %v1203_v35 = vrot.slane %v1198_v28, %v3460_v27  ;;  %v3178_v48 = vld [vmem:[#allocation4 + $0xac] ss:$16 sps:$4 sm:$0xff]  }
 0x102   :  { %2008 = vmatprep.subr.bf16.mxu0 %v3136_v38  ;;  %2049 = vmatprep.subr.bf16.mxu1 %v3205_v53  ;;  %v3188_v53 = vld [vmem:[#allocation4 + $0x68] ss:$16 sps:$4 sm:$0xff]  }
 0x105   :  { %2009 = vmatpush1.bf16.msra.mxu0 %v3134_v39  ;;  %2050 = vmatpush1.bf16.msra.mxu1 %v3203_v52  ;;  %v3190_v52 = vld [vmem:[#allocation4 + $0x6c] ss:$16 sps:$4 sm:$0xff]  }
 0x106   :  { %2010 = vmatprep.subr.bf16.mxu0 %v3139_v42  ;;  %2051 = vmatprep.subr.bf16.mxu1 %v3211_v57  ;;  %v3200_v57 = vld [vmem:[#allocation4 + $0x28] ss:$16 sps:$4 sm:$0xff]  }
 0x109   :  { %2011 = vmatpush2.bf16.msra.mxu0 %v3137_v43  ;;  %2052 = vmatpush2.bf16.msra.mxu1 %v3209_v56  ;;  %v3202_v56 = vld [vmem:[#allocation4 + $0x2c] ss:$16 sps:$4 sm:$0xff]  }
 0x10a   :  { %2012 = vmatprep.subr.bf16.mxu0 %v3142_v46  ;;  %2053 = vmatprep.subr.bf16.mxu1 %v3217_v61  ;;  %v3172_v46 = vld [vmem:[#allocation4 + $0xcc] ss:$16 sps:$4 sm:$0xff]   ;;  %v3212_v61 = vld [vmem:[#allocation4 + $0x1e8] ss:$16 sps:$4 sm:$0xff]  }
 0x10d   :  { %2013 = vmatpush2.bf16.msra.mxu0 %v3140_v47  ;;  %2054 = vmatpush2.bf16.msra.mxu1 %v3215_v60  ;;  %v3170_v47 = vld [vmem:[#allocation4 + $0xc8] ss:$16 sps:$4 sm:$0xff]   ;;  %v3214_v60 = vld [vmem:[#allocation4 + $0x1ec] ss:$16 sps:$4 sm:$0xff]  }
 0x10e   :  { %2014 = vmatprep.subr.bf16.mxu0 %v3145_v50  ;;  %2055 = vmatprep.subr.bf16.mxu1 %v3223_v2  ;;  %v3184_v50 = vld [vmem:[#allocation4 + $0x8c] ss:$16 sps:$4 sm:$0xff]   ;;  %v3224_v2 = vld [vmem:[#allocation4 + $0x1a8] ss:$16 sps:$4 sm:$0xff]  }
 0x111   :  { %2015 = vmatpush2.bf16.msra.mxu0 %v3143_v51  ;;  %2056 = vmatpush2.bf16.msra.mxu1 %v3221_v1  ;;  %v3182_v51 = vld [vmem:[#allocation4 + $0x88] ss:$16 sps:$4 sm:$0xff]   ;;  %v3226_v1 = vld [vmem:[#allocation4 + $0x1ac] ss:$16 sps:$4 sm:$0xff]  }
 0x112   :  { %2016 = vmatprep.subr.bf16.mxu0 %v3148_v54  ;;  %2057 = vmatprep.subr.bf16.mxu1 %v3229_v6  ;;  %v3196_v54 = vld [vmem:[#allocation4 + $0x4c] ss:$16 sps:$4 sm:$0xff]   ;;  %v3236_v6 = vld [vmem:[#allocation4 + $0x168] ss:$16 sps:$4 sm:$0xff]  }
 0x115   :  { %2017 = vmatpush2.bf16.msra.mxu0 %v3146_v55  ;;  %2058 = vmatpush2.bf16.msra.mxu1 %v3227_v5  ;;  %v3194_v55 = vld [vmem:[#allocation4 + $0x48] ss:$16 sps:$4 sm:$0xff]   ;;  %v3238_v5 = vld [vmem:[#allocation4 + $0x16c] ss:$16 sps:$4 sm:$0xff]  }
 0x116   :  { %2018 = vmatprep.subr.bf16.mxu0 %v3151_v58  ;;  %2059 = vmatprep.subr.bf16.mxu1 %v3235_v10  ;;  %v3208_v58 = vld [vmem:[#allocation4 + $0xc] ss:$16 sps:$4 sm:$0xff]   ;;  %v3242_v10 = vld [vmem:[#allocation4 + $0x148] ss:$16 sps:$4 sm:$0xff]  }
 0x119   :  { %2019 = vmatpush2.bf16.msra.mxu0 %v3149_v59  ;;  %2060 = vmatpush2.bf16.msra.mxu1 %v3233_v9  ;;  %v3206_v59 = vld [vmem:[#allocation4 + $0x8] ss:$16 sps:$4 sm:$0xff]   ;;  %v1189_v9 = vcombine.high %v3493_v25, %v3493_v25 }
 0x11a   :  { %2020 = vmatprep.subr.bf16.mxu0 %v3154_v62  ;;  %2061 = vmatprep.subr.bf16.mxu1 %v3241_v16  ;;  %v3220_v62 = vld [vmem:[#allocation4 + $0x1cc] ss:$16 sps:$4 sm:$0xff]  }
 0x11b   :  { %v1212_v16 = vpack.i.b16 %v1189_v9, %v1189_v9  ;;  %v3298_v9 = vld [vmem:[#allocation4 + $0x34c] ss:$16 sps:$4 sm:$0xff]  }
 0x11d   :  { %2021 = vmatpush2.bf16.msra.mxu0 %v3152_v63  ;;  %2062 = vmatpush2.bf16.msra.mxu1 %v3239_v12  ;;  %v3218_v63 = vld [vmem:[#allocation4 + $0x1c8] ss:$16 sps:$4 sm:$0xff]   ;;  %v3250_v12 = vld [vmem:[#allocation4 + $0x12c] ss:$16 sps:$4 sm:$0xff]   ;;  %v1217_v25 = vrot.slane %v1212_v16, %v3460_v27 }
 0x11e   :  { %2022 = vmatprep.subr.bf16.mxu0 %v3157_v3  ;;  %2063 = vmatprep.subr.bf16.mxu1 %v3247_v17  ;;  %v3232_v3 = vld [vmem:[#allocation4 + $0x18c] ss:$16 sps:$4 sm:$0xff]  }
 0x11f   :  { %v3304_v16 = vld [vmem:[#allocation4 + $0x30c] ss:$16 sps:$4 sm:$0xff]  }
 0x121   :  { %2023 = vmatpush2.bf16.msra.mxu0 %v3155_v4  ;;  %2064 = vmatpush2.bf16.msra.mxu1 %v3245_v18  ;;  %v3230_v4 = vld [vmem:[#allocation4 + $0x188] ss:$16 sps:$4 sm:$0xff]  }
 0x122   :  { %2024 = vmatprep.subr.bf16.mxu0 %v3160_v7  ;;  %2065 = vmatprep.subr.bf16.mxu1 %v3253_v19  ;;  %v1188_v7 = vcombine.high %v3490_v24, %v3490_v24  ;;  %v3256_v24 = vld [vmem:[#allocation4 + $0x10c] ss:$16 sps:$4 sm:$0xff]  }
 0x125   :  { %2025 = vmatpush2.bf16.msra.mxu0 %v3158_v8  ;;  %2066 = vmatpush2.bf16.msra.mxu1 %v3251_v20  ;;  %v3244_v8 = vld [vmem:[#allocation4 + $0x14c] ss:$16 sps:$4 sm:$0xff]   ;;  %v3248_v20 = vld [vmem:[#allocation4 + $0x128] ss:$16 sps:$4 sm:$0xff]  }
 0x126   :  { %2076 = vmatprep.subr.bf16.mxu0 %v3166_v11  ;;  %2117 = vmatprep.subr.bf16.mxu1 %v3259_v21  ;;  %v1205_v11 = vpack.i.b16 %v1188_v7, %v1188_v7  ;;  %v3295_v7 = vld [vmem:[#allocation4 + $0x36c] ss:$16 sps:$4 sm:$0xff]  }
 0x128   :  { %v1210_v21 = vrot.slane %v1205_v11, %v3460_v27  ;;  %v3301_v11 = vld [vmem:[#allocation4 + $0x32c] ss:$16 sps:$4 sm:$0xff]  }
 0x168   :  { %v1030_v13 = vpop.f32.mrf.mxu0  ;;  %v1071_v29 = vpop.f32.mrf.mxu1 }
 0x169   :  { %v1072_v15 = vadd.f32 %v1071_v29, %v1030_v13 }
 0x16a   :  { %v1032_v31 = vpop.f32.mrf.mxu0  ;;  %v1073_v32 = vpop.f32.mrf.mxu1 }
 0x16b   :  { %v1160_v33 = vpack.c.bf16 %v1072_v15, %v1072_v15  ;;  %v1074_v34 = vadd.f32 %v1073_v32, %v1032_v31 }
 0x16c   :  { %v1034_v36 = vpop.f32.mrf.mxu0  ;;  %v1075_v37 = vpop.f32.mrf.mxu1 }
 0x16d   :  { %v1161_v38 = vpack.c.bf16 %v1074_v34, %v1074_v34  ;;  %v1218_v39 = vadd.bf16 %v1196_v30, %v1160_v33  ;;  %v3254_v30 = vld [vmem:[#allocation4 + $0x108] ss:$16 sps:$4 sm:$0xff]  }
 0x16e   :  { %v1035_v40 = vpop.f32.mrf.mxu0  ;;  %v1076_v41 = vpop.f32.mrf.mxu1  ;;  %v3257_v36 = vld [vmem:[#allocation4 + $0x2e8] ss:$16 sps:$4 sm:$0xff]  }
 0x16f   :  { %v1219_v42 = vadd.bf16 %v1203_v35, %v1161_v38  ;;  %v3503_v45 = vmax.bf16 %v3385_v0, %v1218_v39  ;;  %v3262_v38 = vld [vmem:[#allocation4 + $0x2cc] ss:$16 sps:$4 sm:$0xff]   ;;  %v3260_v39 = vld [vmem:[#allocation4 + $0x2c8] ss:$16 sps:$4 sm:$0xff]  }
 0x170   :  { %v3265_v40 = vld [vmem:[#allocation4 + $0x2ac] ss:$16 sps:$4 sm:$0xff]   ;;  %v3263_v41 = vld [vmem:[#allocation4 + $0x2a8] ss:$16 sps:$4 sm:$0xff]  }
 0x171   :  { %v1223_v43 = vmax.bf16 %v3385_v0, %v1219_v42  ;;  %v3268_v42 = vld [vmem:[#allocation4 + $0x28c] ss:$16 sps:$4 sm:$0xff]  }
 0x173   :  { %2026 = vmatprep.mubr.bf16.mxu0 %v1223_v43 }
 0x174   :  { %2027 = vmatmul.mubr.bf16.vlgmr.msra.gmra.mxu0 %v3503_v45 }
 0x175   :  { %2077 = vmatpush1.bf16.msra.mxu0 %v3164_v44  ;;  %2108 = vmatprep.mubr.bf16.mxu0 %v1223_v43  ;;  %v3305_v43 = vld [vmem:[%s3641_s7 + $0x78] sm:$0xff]  }
 0x176   :  { %2078 = vmatprep.subr.bf16.mxu0 %v3172_v46  ;;  %v3306_v44 = vld [vmem:[%s3641_s7 + $0x38] sm:$0xff]  }
 0x177   :  { %v3266_v46 = vld [vmem:[#allocation4 + $0x288] ss:$16 sps:$4 sm:$0xff]  }
 0x179   :  { %2079 = vmatpush1.bf16.msra.mxu0 %v3170_v47  ;;  %v3308_v47 = vld [vmem:[%s3641_s7 + $0x30] sm:$0xff]  }
 0x17a   :  { %2080 = vmatprep.subr.bf16.mxu0 %v3178_v48  ;;  %v3271_v48 = vld [vmem:[#allocation4 + $0x26c] ss:$16 sps:$4 sm:$0xff]  }
 0x17d   :  { %2081 = vmatpush1.bf16.msra.mxu0 %v3176_v49  ;;  %v3309_v49 = vld [vmem:[%s3641_s7 + $0x68] sm:$0xff]  }
 0x17e   :  { %2082 = vmatprep.subr.bf16.mxu0 %v3184_v50  ;;  %v3269_v50 = vld [vmem:[#allocation4 + $0x268] ss:$16 sps:$4 sm:$0xff]  }
 0x181   :  { %2083 = vmatpush1.bf16.msra.mxu0 %v3182_v51  ;;  %v3310_v51 = vld [vmem:[%s3641_s7 + $0x28] sm:$0xff]  }
 0x182   :  { %2084 = vmatprep.subr.bf16.mxu0 %v3190_v52  ;;  %v3274_v52 = vld [vmem:[#allocation4 + $0x24c] ss:$16 sps:$4 sm:$0xff]  }
 0x185   :  { %2085 = vmatpush1.bf16.msra.mxu0 %v3188_v53  ;;  %v3311_v53 = vld [vmem:[%s3641_s7 + $0x60] sm:$0xff]  }
 0x186   :  { %2086 = vmatprep.subr.bf16.mxu0 %v3196_v54  ;;  %v3272_v54 = vld [vmem:[#allocation4 + $0x248] ss:$16 sps:$4 sm:$0xff]  }
 0x189   :  { %2087 = vmatpush1.bf16.msra.mxu0 %v3194_v55  ;;  %v3312_v55 = vld [vmem:[%s3641_s7 + $0x20] sm:$0xff]  }
 0x18a   :  { %2088 = vmatprep.subr.bf16.mxu0 %v3202_v56  ;;  %v3277_v56 = vld [vmem:[#allocation4 + $0x22c] ss:$16 sps:$4 sm:$0xff]  }
 0x18d   :  { %2089 = vmatpush1.bf16.msra.mxu0 %v3200_v57  ;;  %v3313_v57 = vld [vmem:[%s3641_s7 + $0x58] sm:$0xff]  }
 0x18e   :  { %2090 = vmatprep.subr.bf16.mxu0 %v3208_v58  ;;  %v3275_v58 = vld [vmem:[#allocation4 + $0x228] ss:$16 sps:$4 sm:$0xff]  }
 0x191   :  { %2091 = vmatpush1.bf16.msra.mxu0 %v3206_v59  ;;  %v3314_v59 = vld [vmem:[%s3641_s7 + $0x18] sm:$0xff]  }
 0x192   :  { %2092 = vmatprep.subr.bf16.mxu0 %v3214_v60  ;;  %v3280_v60 = vld [vmem:[#allocation4 + $0x20c] ss:$16 sps:$4 sm:$0xff]  }
 0x195   :  { %2093 = vmatpush2.bf16.msra.mxu0 %v3212_v61  ;;  %v3278_v61 = vld [vmem:[#allocation4 + $0x208] ss:$16 sps:$4 sm:$0xff]  }
 0x196   :  { %2094 = vmatprep.subr.bf16.mxu0 %v3220_v62  ;;  %v3283_v62 = vld [vmem:[#allocation4 + $0x3ec] ss:$16 sps:$4 sm:$0xff]  }
 0x199   :  { %2095 = vmatpush2.bf16.msra.mxu0 %v3218_v63  ;;  %v3281_v63 = vld [vmem:[#allocation4 + $0x3e8] ss:$16 sps:$4 sm:$0xff]  }
 0x19a   :  { %2096 = vmatprep.subr.bf16.mxu0 %v3226_v1  ;;  %v3286_v1 = vld [vmem:[#allocation4 + $0x3cc] ss:$16 sps:$4 sm:$0xff]  }
 0x19d   :  { %2097 = vmatpush2.bf16.msra.mxu0 %v3224_v2  ;;  %v3284_v2 = vld [vmem:[#allocation4 + $0x3c8] ss:$16 sps:$4 sm:$0xff]  }
 0x19e   :  { %2098 = vmatprep.subr.bf16.mxu0 %v3232_v3  ;;  %v3289_v3 = vld [vmem:[#allocation4 + $0x3ac] ss:$16 sps:$4 sm:$0xff]  }
 0x1a1   :  { %2099 = vmatpush2.bf16.msra.mxu0 %v3230_v4  ;;  %v3287_v4 = vld [vmem:[#allocation4 + $0x3a8] ss:$16 sps:$4 sm:$0xff]  }
 0x1a2   :  { %2100 = vmatprep.subr.bf16.mxu0 %v3238_v5  ;;  %v3292_v5 = vld [vmem:[#allocation4 + $0x38c] ss:$16 sps:$4 sm:$0xff]  }
 0x1a5   :  { %2101 = vmatpush2.bf16.msra.mxu0 %v3236_v6  ;;  %v3290_v6 = vld [vmem:[#allocation4 + $0x388] ss:$16 sps:$4 sm:$0xff]  }
 0x1a6   :  { %2102 = vmatprep.subr.bf16.mxu0 %v3244_v8  ;;  %v3293_v8 = vld [vmem:[#allocation4 + $0x368] ss:$16 sps:$4 sm:$0xff]  }
 0x1a8   :  { %v1112_v17 = vpop.f32.mrf.mxu0  ;;  %v1153_v18 = vpop.f32.mrf.mxu1 }
 0x1a9   :  { %v1154_v19 = vadd.f32 %v1153_v18, %v1112_v17  ;;  %2103 = vmatpush2.bf16.msra.mxu0 %v3242_v10  ;;  %v3296_v10 = vld [vmem:[#allocation4 + $0x348] ss:$16 sps:$4 sm:$0xff]   ;;  %v3315_v18 = vld [vmem:[%s3641_s7 + $0x50] sm:$0xff]  }
 0x1aa   :  { %v1114_v22 = vpop.f32.mrf.mxu0  ;;  %v1155_v23 = vpop.f32.mrf.mxu1  ;;  %2104 = vmatprep.subr.bf16.mxu0 %v3250_v12  ;;  %v3299_v12 = vld [vmem:[#allocation4 + $0x328] ss:$16 sps:$4 sm:$0xff]  }
 0x1ab   :  { %v1162_v26 = vpack.c.bf16 %v1154_v19, %v1154_v19  ;;  %v1156_v28 = vadd.f32 %v1155_v23, %v1114_v22  ;;  %v3302_v17 = vld [vmem:[#allocation4 + $0x308] ss:$16 sps:$4 sm:$0xff]   ;;  %v3316_v19 = vld [vmem:[%s3641_s7 + $0x10] sm:$0xff]   ;;  %v3319_v22 = vld [vmem:[%s3641_s7 + $0x40] sm:$0xff]  }
 0x1ac   :  { %v1116_v13 = vpop.f32.mrf.mxu0  ;;  %v1157_v29 = vpop.f32.mrf.mxu1  ;;  %v3320_v23 = vld [vmem:[%s3641_s7] sm:$0xff]  }
 0x1ad   :  { %v1163_v15 = vpack.c.bf16 %v1156_v28, %v1156_v28  ;;  %2105 = vmatpush2.bf16.msra.mxu0 %v3248_v20  ;;  %v1220_v31 = vadd.bf16 %v1210_v21, %v1162_v26  ;;  %v3317_v20 = vld [vmem:[%s3641_s7 + $0x48] sm:$0xff]   ;;  %v3322_v26 = vld [vmem:[%s3641_s7 + $0xb8] sm:$0xff]   ;;  %v3323_v28 = vld [vmem:[%s3641_s7 + $0xf0] sm:$0xff]  }
 0x1ae   :  { %v1117_v32 = vpop.f32.mrf.mxu0  ;;  %v1158_v33 = vpop.f32.mrf.mxu1  ;;  %2106 = vmatprep.subr.bf16.mxu0 %v3256_v24  ;;  %v3318_v21 = vld [vmem:[%s3641_s7 + $0x8] sm:$0xff]   ;;  %v3321_v24 = vld [vmem:[%s3641_s7 + $0xf8] sm:$0xff]  }
 0x1af   :  { %v1221_v34 = vadd.bf16 %v1217_v25, %v1163_v15  ;;  %v3514_v37 = vmax.bf16 %v3385_v0, %v1220_v31  ;;  %v3324_v25 = vld [vmem:[%s3641_s7 + $0xb0] sm:$0xff]   ;;  %v3325_v13 = vld [vmem:[%s3641_s7 + $0xe8] sm:$0xff]   ;;  %v3327_v15 = vld [vmem:[%s3641_s7 + $0xe0] sm:$0xff]  }
 0x1b0   :  { %v3326_v29 = vld [vmem:[%s3641_s7 + $0xa8] sm:$0xff]   ;;  %v3329_v31 = vld [vmem:[%s3641_s7 + $0xd8] sm:$0xff]   ;;  %v3331_v33 = vld [vmem:[%s3641_s7 + $0xd0] sm:$0xff]  }
 0x1b1   :  { %2107 = vmatpush2.bf16.msra.mxu0 %v3254_v30  ;;  %v1225_v35 = vmax.bf16 %v3385_v0, %v1221_v34  ;;  %v3328_v30 = vld [vmem:[%s3641_s7 + $0xa0] sm:$0xff]   ;;  %v3330_v32 = vld [vmem:[%s3641_s7 + $0x98] sm:$0xff]   ;;  %v3332_v34 = vld [vmem:[%s3641_s7 + $0x90] sm:$0xff]  }
 0x1b2   :  { %2868 = vmatprep.subr.bf16.mxu0 %v3305_v43  ;;  %v2834_v43 = vld.sshfl [vmem:[%s3640_s6] sm:$0x33 pattern:$0x75316420] }
 0x1b3   :  { %2067 = vmatprep.mubr.bf16.mxu1 %v1225_v35 }
 0x1b4   :  { %2068 = vmatmul.mubr.bf16.vlgmr.msra.gmra.mxu1 %v3514_v37  ;;  %2109 = vmatmul.mubr.bf16.vlgmr.msra.gmra.mxu0 %v3503_v45  ;;  %v3307_v45 = vld [vmem:[%s3641_s7 + $0x70] sm:$0xff]  }
 0x1b5   :  { %2118 = vmatpush1.bf16.msra.mxu1 %v3257_v36  ;;  %2149 = vmatprep.mubr.bf16.mxu1 %v1225_v35 }
 0x1b6   :  { %2119 = vmatprep.subr.bf16.mxu1 %v3262_v38  ;;  %2869 = vmatpush3.bf16.msra.mxu0 %v3306_v44  ;;  %v3334_v38 = vld [vmem:[%s3641_s7 + $0x88] sm:$0xff]   ;;  %v2171_v44 = vcombine.high %v2834_v43, %v2834_v43 }
 0x1b7   :  { %2870 = vmatprep.subr.bf16.mxu0 %v3307_v45  ;;  %v2178_v45 = vrot.slane %v2834_v43, %v3451_v14 }
 0x1b9   :  { %2120 = vmatpush1.bf16.msra.mxu1 %v3260_v39 }
 0x1ba   :  { %2121 = vmatprep.subr.bf16.mxu1 %v3265_v40  ;;  %2871 = vmatpush3.bf16.msra.mxu0 %v3308_v47  ;;  %v2189_v47 = vpack.i.b16 %v2178_v45, %v2178_v45 }
 0x1bb   :  { %2872 = vmatprep.subr.bf16.mxu0 %v3309_v49 }
 0x1bd   :  { %2122 = vmatpush1.bf16.msra.mxu1 %v3263_v41  ;;  %v3335_v41 = vld [vmem:[%s3641_s7 + $0xc0] sm:$0xff]  }
 0x1be   :  { %2123 = vmatprep.subr.bf16.mxu1 %v3268_v42  ;;  %2873 = vmatpush3.bf16.msra.mxu0 %v3310_v51  ;;  %v3336_v42 = vld [vmem:[%s3641_s7 + $0x80] sm:$0xff]  }
 0x1bf   :  { %2874 = vmatprep.subr.bf16.mxu0 %v3311_v53 }
 0x1c1   :  { %2124 = vmatpush1.bf16.msra.mxu1 %v3266_v46  ;;  %v2185_v46 = vrot.slane %v2171_v44, %v3451_v14 }
 0x1c2   :  { %2125 = vmatprep.subr.bf16.mxu1 %v3271_v48  ;;  %2875 = vmatpush3.bf16.msra.mxu0 %v3312_v55 }
 0x1c3   :  { %2876 = vmatprep.subr.bf16.mxu0 %v3313_v57  ;;  %v2196_v48 = vpack.i.b16 %v2185_v46, %v2185_v46 }
 0x1c5   :  { %2126 = vmatpush1.bf16.msra.mxu1 %v3269_v50  ;;  %v2201_v57 = vrot.slane %v2196_v48, %v3460_v27 }
 0x1c6   :  { %2127 = vmatprep.subr.bf16.mxu1 %v3274_v52  ;;  %2877 = vmatpush3.bf16.msra.mxu0 %v3314_v59  ;;  %v2194_v52 = vrot.slane %v2189_v47, %v3460_v27 }
 0x1c7   :  { %2878 = vmatprep.subr.bf16.mxu0 %v3315_v18 }
 0x1c9   :  { %2128 = vmatpush1.bf16.msra.mxu1 %v3272_v54 }
 0x1ca   :  { %2129 = vmatprep.subr.bf16.mxu1 %v3277_v56  ;;  %2879 = vmatpush3.bf16.msra.mxu0 %v3316_v19 }
 0x1cb   :  { %2880 = vmatprep.subr.bf16.mxu0 %v3317_v20 }
 0x1cd   :  { %2130 = vmatpush1.bf16.msra.mxu1 %v3275_v58 }
 0x1ce   :  { %2131 = vmatprep.subr.bf16.mxu1 %v3280_v60  ;;  %2881 = vmatpush3.bf16.msra.mxu0 %v3318_v21 }
 0x1cf   :  { %2882 = vmatprep.subr.bf16.mxu0 %v3319_v22 }
 0x1d1   :  { %2132 = vmatpush1.bf16.msra.mxu1 %v3278_v61 }
 0x1d2   :  { %2133 = vmatprep.subr.bf16.mxu1 %v3283_v62  ;;  %2883 = vmatpush3.bf16.msra.mxu0 %v3320_v23 }
 0x1d5   :  { %2134 = vmatpush2.bf16.msra.mxu1 %v3281_v63 }
 0x1d6   :  { %2135 = vmatprep.subr.bf16.mxu1 %v3286_v1 }
 0x1d9   :  { %2136 = vmatpush2.bf16.msra.mxu1 %v3284_v2 }
 0x1da   :  { %2137 = vmatprep.subr.bf16.mxu1 %v3289_v3  ;;  %v2186_v3 = vcombine.high %v2178_v45, %v2178_v45 }
 0x1dd   :  { %2138 = vmatpush2.bf16.msra.mxu1 %v3287_v4  ;;  %v2187_v4 = vcombine.high %v2185_v46, %v2185_v46 }
 0x1de   :  { %2139 = vmatprep.subr.bf16.mxu1 %v3292_v5  ;;  %v2203_v5 = vpack.i.b16 %v2186_v3, %v2186_v3 }
 0x1e1   :  { %2140 = vmatpush2.bf16.msra.mxu1 %v3290_v6  ;;  %v2210_v6 = vpack.i.b16 %v2187_v4, %v2187_v4 }
 0x1e2   :  { %2141 = vmatprep.subr.bf16.mxu1 %v3295_v7 }
 0x1e5   :  { %2142 = vmatpush2.bf16.msra.mxu1 %v3293_v8 }
 0x1e6   :  { %2143 = vmatprep.subr.bf16.mxu1 %v3298_v9  ;;  %v2208_v9 = vrot.slane %v2203_v5, %v3460_v27 }
 0x1e9   :  { %2144 = vmatpush2.bf16.msra.mxu1 %v3296_v10 }
 0x1ea   :  { %2145 = vmatprep.subr.bf16.mxu1 %v3301_v11 }
 0x1ed   :  { %2146 = vmatpush2.bf16.msra.mxu1 %v3299_v12 }
 0x1ee   :  { %2147 = vmatprep.subr.bf16.mxu1 %v3304_v16  ;;  %v2215_v16 = vrot.slane %v2210_v6, %v3460_v27  ;;  %v2835_v27 = vld [vmem:[%s3642_s8] ss:$0 sm:$0xff] }
 0x1f1   :  { %2148 = vmatpush2.bf16.msra.mxu1 %v3302_v17 }
 0x1f2   :  { %2890 = vmatprep.subr.bf16.mxu1 %v3321_v24 }
 0x1f4   :  { %2150 = vmatmul.mubr.bf16.vlgmr.msra.gmra.mxu1 %v3514_v37  ;;  %v3333_v37 = vld [vmem:[%s3641_s7 + $0xc8] sm:$0xff]  }
 0x1f5   :  { %2891 = vmatpush3.bf16.msra.mxu1 %v3322_v26 }
 0x1f6   :  { %2892 = vmatprep.subr.bf16.mxu1 %v3323_v28 }
 0x1f9   :  { %2893 = vmatpush3.bf16.msra.mxu1 %v3324_v25 }
 0x1fa   :  { %2894 = vmatprep.subr.bf16.mxu1 %v3325_v13 }
 0x1fd   :  { %2895 = vmatpush3.bf16.msra.mxu1 %v3326_v29 }
 0x1fe   :  { %2896 = vmatprep.subr.bf16.mxu1 %v3327_v15 }
 0x201   :  { %2897 = vmatpush3.bf16.msra.mxu1 %v3328_v30 }
 0x202   :  { %2898 = vmatprep.subr.bf16.mxu1 %v3329_v31 }
 0x205   :  { %2899 = vmatpush3.bf16.msra.mxu1 %v3330_v32 }
 0x206   :  { %2900 = vmatprep.subr.bf16.mxu1 %v3331_v33 }
 0x209   :  { %2901 = vmatpush3.bf16.msra.mxu1 %v3332_v34 }
 0x20a   :  { %2902 = vmatprep.subr.bf16.mxu1 %v3333_v37 }
 0x20d   :  { %2903 = vmatpush3.bf16.msra.mxu1 %v3334_v38 }
 0x20e   :  { %2904 = vmatprep.subr.bf16.mxu1 %v3335_v41 }
 0x211   :  { %2905 = vmatpush3.bf16.msra.mxu1 %v3336_v42 }
 0x234   :  { %v2028_v35 = vpop.f32.mrf.mxu0 }
 0x236   :  { %v2030_v36 = vpop.f32.mrf.mxu0 }
 0x238   :  { %v2032_v39 = vpop.f32.mrf.mxu0 }
 0x23a   :  { %v2033_v40 = vpop.f32.mrf.mxu0 }
 0x274   :  { %v2069_v49 = vpop.f32.mrf.mxu1  ;;  %v2110_v50 = vpop.f32.mrf.mxu0 }
 0x275   :  { %v2070_v51 = vadd.f32 %v2069_v49, %v2028_v35 }
 0x276   :  { %v2071_v53 = vpop.f32.mrf.mxu1  ;;  %v2112_v54 = vpop.f32.mrf.mxu0 }
 0x277   :  { %v2158_v55 = vpack.c.bf16 %v2070_v51, %v2070_v51  ;;  %v2072_v56 = vadd.f32 %v2071_v53, %v2030_v36 }
 0x278   :  { %v2073_v58 = vpop.f32.mrf.mxu1  ;;  %v2114_v59 = vpop.f32.mrf.mxu0 }
 0x279   :  { %v2159_v60 = vpack.c.bf16 %v2072_v56, %v2072_v56  ;;  %v2216_v61 = vadd.bf16 %v2194_v52, %v2158_v55 }
 0x27a   :  { %v2074_v62 = vpop.f32.mrf.mxu1  ;;  %v2115_v63 = vpop.f32.mrf.mxu0 }
 0x27b   :  { %v2217_v14 = vadd.bf16 %v2201_v57, %v2159_v60  ;;  %v2220_v2 = vmax.bf16 %v3385_v0, %v2216_v61 }
 0x27d   :  { %v2221_v1 = vmax.bf16 %v3385_v0, %v2217_v14 }
 0x27f   :  { %2519 = vmatprep.mubr.bf16.mxu0 %v2221_v1 }
 0x280   :  { %2520 = vmatmul.mubr.bf16.vlgmr.msra.gmra.mxu0 %v2220_v2 }
 0x2b4   :  { %v2151_v7 = vpop.f32.mrf.mxu1 }
 0x2b5   :  { %v2152_v8 = vadd.f32 %v2151_v7, %v2110_v50 }
 0x2b6   :  { %v2153_v10 = vpop.f32.mrf.mxu1 }
 0x2b7   :  { %v2160_v11 = vpack.c.bf16 %v2152_v8, %v2152_v8  ;;  %v2154_v12 = vadd.f32 %v2153_v10, %v2112_v54 }
 0x2b8   :  { %v2155_v17 = vpop.f32.mrf.mxu1 }
 0x2b9   :  { %v2161_v18 = vpack.c.bf16 %v2154_v12, %v2154_v12  ;;  %v2218_v19 = vadd.bf16 %v2208_v9, %v2160_v11 }
 0x2ba   :  { %v2156_v20 = vpop.f32.mrf.mxu1 }
 0x2bb   :  { %v2219_v21 = vadd.bf16 %v2215_v16, %v2161_v18  ;;  %v2222_v23 = vmax.bf16 %v3385_v0, %v2218_v19 }
 0x2bd   :  { %v2223_v22 = vmax.bf16 %v3385_v0, %v2219_v21 }
 0x2bf   :  { %2559 = vmatprep.mubr.bf16.mxu1 %v2223_v22 }
 0x2c0   :  { %2560 = vmatmul.mubr.bf16.vlgmr.msra.gmra.mxu1 %v2222_v23 }
 0x340   :  { %v2884_v24 = vpop.f32.mrf.mxu0 }
 0x342   :  { %v2885_v26 = vpop.f32.mrf.mxu0 }
 0x343   :  { %v2886_v13 = vadd.f32 %v2885_v26, %v2884_v24 }
 0x344   :  { %v2887_v28 = vpop.f32.mrf.mxu0 }
 0x345   :  { %v2522_v30 = vadd.f32 %v2886_v13, %v2835_v27 }
 0x346   :  { %v2888_v25 = vpop.f32.mrf.mxu0 }
 0x380   :  { %v2906_v29 = vpop.f32.mrf.mxu1 }
 0x382   :  { %v2907_v15 = vpop.f32.mrf.mxu1 }
 0x383   :  { %v2908_v31 = vadd.f32 %v2907_v15, %v2906_v29 }
 0x384   :  { %v2909_v32 = vpop.f32.mrf.mxu1 }
 0x385   :  { %v2562_v33 = vadd.f32 %v2908_v31, %v2522_v30 }
 0x386   :  { %v2910_v34 = vpop.f32.mrf.mxu1 }
 0x387   :  { %2568 = vst.msk [vmem:[%s3643_s9] sm:$0xff] %vm2567_vm0, %v2562_v33 }
 0x388   :  { %2573 = vsyncpa [#allocation3], 1 }
 0x389   :  { %2574 = vsyncpa [#allocation5], 1 }

</bundles_post_ra>
